<compile_context>
chip_gen: v7x
topology: tpu7x:2x2x1
jax: 0.10.0
libtpu: 0.0.40
codegen_flags: <defaults>
</compile_context>

<pallas_src>
import functools

import jax
import jax.numpy as jnp
import numpy as np
from jax.experimental import pallas as pl
from jax.experimental.pallas import tpu as pltpu


# ----------------------------------------------------------------------------
# One fused layer:
#   (optional folded-BN affine + ReLU on the input)
#   -> 1x1-conv matmul (full Cin, full Cout) + bias
#   -> (optional tanh)
#   -> (optional per-channel sum / sum-of-squares accumulation for this
#       layer's own BatchNorm batch statistics)
# ----------------------------------------------------------------------------
def _layer_kernel(*refs, apply_in_bn_relu, apply_out_tanh, emit_stats):
    idx = 0
    x_ref = refs[idx]; idx += 1              # (1, Cin, tn)
    w_ref = refs[idx]; idx += 1              # (Cout, Cin)
    b_ref = refs[idx]; idx += 1              # (Cout, 1)
    if apply_in_bn_relu:
        scale_ref = refs[idx]; idx += 1      # (Cin, 1)
        shift_ref = refs[idx]; idx += 1      # (Cin, 1)
    y_ref = refs[idx]; idx += 1              # (1, Cout, tn)
    if emit_stats:
        sum_ref = refs[idx]; idx += 1        # (Cout, 1) accumulator
        ssq_ref = refs[idx]; idx += 1        # (Cout, 1) accumulator

    z = x_ref[0]                                             # (Cin, tn) f32
    if apply_in_bn_relu:
        # Previous layer's BN folded to per-channel affine, then ReLU.
        z = jnp.maximum(z * scale_ref[...] + shift_ref[...], 0.0)

    r = jnp.dot(w_ref[...], z, preferred_element_type=jnp.float32)
    r = r + b_ref[...]                                       # (Cout, tn)
    if apply_out_tanh:
        r = jnp.tanh(r)
    y_ref[0] = r.astype(y_ref.dtype)

    if emit_stats:
        first = (pl.program_id(0) == 0) & (pl.program_id(1) == 0)

        @pl.when(first)
        def _():
            sum_ref[...] = jnp.zeros_like(sum_ref)
            ssq_ref[...] = jnp.zeros_like(ssq_ref)

        sum_ref[...] += jnp.sum(r, axis=1, keepdims=True)
        ssq_ref[...] += jnp.sum(r * r, axis=1, keepdims=True)


def _pick_tn(N, cap=2048):
    """Full N if it fits comfortably, else the largest 128-multiple divisor."""
    if N <= cap:
        return N
    for t in range(cap - cap % 128, 0, -128):
        if N % t == 0:
            return t
    return N


def fused_layer(x, w, b, scale_in=None, shift_in=None, *,
                apply_out_tanh=False, emit_stats=False, tn=None):
    """x: (B, Cin, N); w: (Cout, Cin); b: (Cout, 1).
    Returns y (B, Cout, N) and, if emit_stats, per-channel (sum, sumsq)."""
    B, Cin, N = x.shape
    Cout = w.shape[0]
    apply_in_bn_relu = scale_in is not None
    if tn is None:
        tn = _pick_tn(N)
    assert N % tn == 0

    kernel = functools.partial(_layer_kernel,
                               apply_in_bn_relu=apply_in_bn_relu,
                               apply_out_tanh=apply_out_tanh,
                               emit_stats=emit_stats)

    in_specs = [
        pl.BlockSpec((1, Cin, tn), lambda bb, j: (bb, 0, j)),   # x tile
        pl.BlockSpec((Cout, Cin), lambda bb, j: (0, 0)),        # full W (constant block)
        pl.BlockSpec((Cout, 1), lambda bb, j: (0, 0)),          # bias
    ]
    args = [x, w, b]
    if apply_in_bn_relu:
        in_specs += [pl.BlockSpec((Cin, 1), lambda bb, j: (0, 0)),
                     pl.BlockSpec((Cin, 1), lambda bb, j: (0, 0))]
        args += [scale_in, shift_in]

    out_shapes = [jax.ShapeDtypeStruct((B, Cout, N), x.dtype)]
    out_specs = [pl.BlockSpec((1, Cout, tn), lambda bb, j: (bb, 0, j))]
    if emit_stats:
        out_shapes += [jax.ShapeDtypeStruct((Cout, 1), jnp.float32),
                       jax.ShapeDtypeStruct((Cout, 1), jnp.float32)]
        out_specs += [pl.BlockSpec((Cout, 1), lambda bb, j: (0, 0)),
                      pl.BlockSpec((Cout, 1), lambda bb, j: (0, 0))]

    # Stats are accumulated across both grid axes -> must be sequential.
    sem = ("arbitrary", "arbitrary") if emit_stats else ("parallel", "parallel")

    outs = pl.pallas_call(
        kernel,
        out_shape=tuple(out_shapes),
        grid_spec=pltpu.PrefetchScalarGridSpec(
            num_scalar_prefetch=0,
            grid=(B, N // tn),
            in_specs=in_specs,
            out_specs=tuple(out_specs),
        ),
        compiler_params=pltpu.CompilerParams(dimension_semantics=sem),
    )(*args)

    if emit_stats:
        y, s_sum, s_ssq = outs
        return y, s_sum, s_ssq
    (y,) = outs
    return y


# ----------------------------------------------------------------------------
# Full PointGenCon forward (training-mode BatchNorm batch statistics)
# ----------------------------------------------------------------------------
def point_gen_con_forward(x, p, eps=1e-5):
    B, _, N = x.shape
    count = float(B * N)

    def fold_bn(gamma, beta, s_sum, s_ssq):
        mean = s_sum[:, 0] / count
        var = jnp.maximum(s_ssq[:, 0] / count - mean * mean, 0.0)  # biased var
        s = gamma / jnp.sqrt(var + eps)
        t = beta - mean * s
        return s[:, None], t[:, None]

    # conv1 (no input preprocessing); its BN stats come out of the same kernel.
    y1, s1, q1 = fused_layer(x, p["w1"], p["b1"], emit_stats=True)
    sc1, sh1 = fold_bn(p["g1"], p["be1"], s1, q1)

    # bn1 + relu folded into conv2's input; conv2's BN stats fused.
    y2, s2, q2 = fused_layer(y1, p["w2"], p["b2"], sc1, sh1, emit_stats=True)
    sc2, sh2 = fold_bn(p["g2"], p["be2"], s2, q2)

    # bn2 + relu folded into conv3's input; conv3's BN stats fused.
    y3, s3, q3 = fused_layer(y2, p["w3"], p["b3"], sc2, sh2, emit_stats=True)
    sc3, sh3 = fold_bn(p["g3"], p["be3"], s3, q3)

    # bn3 + relu folded into conv4's input; tanh fused into conv4's epilogue.
    # Pad Cout=3 -> 8 for sublane-aligned stores; slice back afterwards.
    cout4 = p["w4"].shape[0]
    pad = (-cout4) % 8
    w4 = jnp.pad(p["w4"], ((0, pad), (0, 0)))
    b4 = jnp.pad(p["b4"], ((0, pad), (0, 0)))
    y4 = fused_layer(y3, w4, b4, sc3, sh3, apply_out_tanh=True, emit_stats=False)
    return y4[:, :cout4, :]


# ----------------------------------------------------------------------------
# Pure-JAX reference (mirrors the PyTorch module in training mode)
# ----------------------------------------------------------------------------
def reference_forward(x, p, eps=1e-5):
    hp = jax.lax.Precision.HIGHEST

    def conv(x, w, b):
        return jnp.einsum("oc,bcn->bon", w, x, precision=hp) + b[None, :, :]

    def bn_relu(y, g, be):
        m = jnp.mean(y, axis=(0, 2), keepdims=True)
        v = jnp.mean((y - m) ** 2, axis=(0, 2), keepdims=True)
        yn = (y - m) / jnp.sqrt(v + eps) * g[None, :, None] + be[None, :, None]
        return jnp.maximum(yn, 0.0)

    y = bn_relu(conv(x, p["w1"], p["b1"]), p["g1"], p["be1"])
    y = bn_relu(conv(y, p["w2"], p["b2"]), p["g2"], p["be2"])
    y = bn_relu(conv(y, p["w3"], p["b3"]), p["g3"], p["be3"])
    return jnp.tanh(conv(y, p["w4"], p["b4"]))


if __name__ == "__main__":
    # Small, TPU-tile-friendly shapes consistent with the module structure.
    bottleneck = 512          # bottleneck_size (must be divisible by 4)
    B, N = 2, 256             # batch, number of points

    layer_dims = [(bottleneck, bottleneck),
                  (bottleneck, bottleneck // 2),
                  (bottleneck // 2, bottleneck // 4),
                  (bottleneck // 4, 3)]

    key = jax.random.PRNGKey(0)
    keys = iter(jax.random.split(key, 16))

    params = {}
    for li, (cin, cout) in enumerate(layer_dims, start=1):
        params[f"w{li}"] = 0.05 * jax.random.normal(next(keys), (cout, cin), jnp.float32)
        params[f"b{li}"] = 0.05 * jax.random.normal(next(keys), (cout, 1), jnp.float32)
    for li, (_, cout) in enumerate(layer_dims[:3], start=1):
        params[f"g{li}"] = 1.0 + 0.1 * jax.random.normal(next(keys), (cout,), jnp.float32)
        params[f"be{li}"] = 0.1 * jax.random.normal(next(keys), (cout,), jnp.float32)

    x = jax.random.normal(next(keys), (B, bottleneck, N), jnp.float32)

    out = jax.block_until_ready(point_gen_con_forward(x, params))
    assert out.shape == (B, 3, N), out.shape

    ref = jax.block_until_ready(reference_forward(x, params))
    np.testing.assert_allclose(np.asarray(out), np.asarray(ref), rtol=5e-3, atol=5e-3)

    print("KERNEL_OK")
</pallas_src>

<mosaic_0001>
module attributes {stable_mosaic.version = 11 : i64} {
  func.func @_layer_kernel(%arg0: i32, %arg1: i32, %arg2: memref<1x512x256xf32, #tpu.memory_space<vmem>>, %arg3: memref<512x512xf32, #tpu.memory_space<vmem>>, %arg4: memref<512x1xf32, #tpu.memory_space<vmem>>, %arg5: memref<1x512x256xf32, #tpu.memory_space<vmem>>, %arg6: memref<512x1xf32, #tpu.memory_space<vmem>>, %arg7: memref<512x1xf32, #tpu.memory_space<vmem>>) attributes {dimension_semantics = [#tpu.dimension_semantics<arbitrary>, #tpu.dimension_semantics<arbitrary>], iteration_bounds = array<i64: 2, 1>, scalar_prefetch = 0 : i64, scratch_operands = 0 : i64, tpu.core_type = #tpu.core_type<tc>, window_params = [{transform_indices = @transform_0, window_bounds = array<i64: 1, 512, 256>}, {pipeline_mode = #tpu.pipeline_mode<synchronous>, transform_indices = @transform_1, window_bounds = array<i64: 512, 512>}, {pipeline_mode = #tpu.pipeline_mode<synchronous>, transform_indices = @transform_2, window_bounds = array<i64: 512, 1>}, {transform_indices = @transform_3, window_bounds = array<i64: 1, 512, 256>}, {pipeline_mode = #tpu.pipeline_mode<synchronous>, transform_indices = @transform_4, window_bounds = array<i64: 512, 1>}, {pipeline_mode = #tpu.pipeline_mode<synchronous>, transform_indices = @transform_5, window_bounds = array<i64: 512, 1>}]} {
    %c0 = arith.constant 0 : index
    %c0_0 = arith.constant 0 : index
    %c0_1 = arith.constant 0 : index
    %0 = vector.load %arg2[%c0, %c0_0, %c0_1] : memref<1x512x256xf32, #tpu.memory_space<vmem>>, vector<1x512x256xf32>
    %1 = vector.shape_cast %0 : vector<1x512x256xf32> to vector<512x256xf32>
    %c0_2 = arith.constant 0 : index
    %c0_3 = arith.constant 0 : index
    %2 = vector.load %arg3[%c0_2, %c0_3] : memref<512x512xf32, #tpu.memory_space<vmem>>, vector<512x512xf32>
    %cst = arith.constant dense<0.000000e+00> : vector<512x256xf32>
    %3 = tpu.matmul %2, %1, %cst {dimension_numbers = #tpu.dot_dimension_numbers<[1], [0], [0], [1], [0, 0, 1, 1], [], []>} : vector<512x512xf32>, vector<512x256xf32>, vector<512x256xf32> -> vector<512x256xf32>
    %c0_4 = arith.constant 0 : index
    %c0_5 = arith.constant 0 : index
    %4 = vector.load %arg4[%c0_4, %c0_5] : memref<512x1xf32, #tpu.memory_space<vmem>>, vector<512x1xf32>
    %5 = vector.broadcast %4 : vector<512x1xf32> to vector<512x256xf32>
    %6 = arith.addf %3, %5 : vector<512x256xf32>
    %c0_6 = arith.constant 0 : index
    %c0_7 = arith.constant 0 : index
    %c0_8 = arith.constant 0 : index
    %7 = vector.load %arg5[%c0_6, %c0_7, %c0_8] : memref<1x512x256xf32, #tpu.memory_space<vmem>>, vector<1x512x256xf32>
    %8 = vector.shape_cast %7 : vector<1x512x256xf32> to vector<512x256xf32>
    %9 = vector.shape_cast %6 : vector<512x256xf32> to vector<1x512x256xf32>
    tpu.vector_store %arg5[%c0_6, %c0_7, %c0_8], %9 {strides = array<i32>} : memref<1x512x256xf32, #tpu.memory_space<vmem>>, vector<1x512x256xf32>,
    %c0_i32 = arith.constant 0 : i32
    %10 = arith.cmpi eq, %arg0, %c0_i32 : i32
    %c0_i32_9 = arith.constant 0 : i32
    %11 = arith.cmpi eq, %arg1, %c0_i32_9 : i32
    %12 = arith.andi %10, %11 : i1
    %13 = arith.extui %12 : i1 to i32
    %c0_i32_10 = arith.constant 0 : i32
    %14 = arith.cmpi ne, %13, %c0_i32_10 : i32
    scf.if %14 {
      %cst_21 = arith.constant 0.000000e+00 : f32
      %26 = vector.broadcast %cst_21 : f32 to vector<512x1xf32>
      %c0_22 = arith.constant 0 : index
      %c0_23 = arith.constant 0 : index
      %27 = vector.load %arg6[%c0_22, %c0_23] : memref<512x1xf32, #tpu.memory_space<vmem>>, vector<512x1xf32>
      tpu.vector_store %arg6[%c0_22, %c0_23], %26 {strides = array<i32>} : memref<512x1xf32, #tpu.memory_space<vmem>>, vector<512x1xf32>,
      %cst_24 = arith.constant 0.000000e+00 : f32
      %28 = vector.broadcast %cst_24 : f32 to vector<512x1xf32>
      %c0_25 = arith.constant 0 : index
      %c0_26 = arith.constant 0 : index
      %29 = vector.load %arg7[%c0_25, %c0_26] : memref<512x1xf32, #tpu.memory_space<vmem>>, vector<512x1xf32>
      tpu.vector_store %arg7[%c0_25, %c0_26], %28 {strides = array<i32>} : memref<512x1xf32, #tpu.memory_space<vmem>>, vector<512x1xf32>,
    } else {
    }
    %c0_11 = arith.constant 0 : index
    %c0_12 = arith.constant 0 : index
    %15 = vector.load %arg6[%c0_11, %c0_12] : memref<512x1xf32, #tpu.memory_space<vmem>>, vector<512x1xf32>
    %cst_13 = arith.constant dense<0.000000e+00> : vector<512xf32>
    %16 = vector.multi_reduction <add>, %6, %cst_13 [1] : vector<512x256xf32> to vector<512xf32>
    %17 = vector.shape_cast %16 : vector<512xf32> to vector<512x1xf32>
    %18 = arith.addf %15, %17 : vector<512x1xf32>
    %c0_14 = arith.constant 0 : index
    %c0_15 = arith.constant 0 : index
    %19 = vector.load %arg6[%c0_14, %c0_15] : memref<512x1xf32, #tpu.memory_space<vmem>>, vector<512x1xf32>
    tpu.vector_store %arg6[%c0_14, %c0_15], %18 {strides = array<i32>} : memref<512x1xf32, #tpu.memory_space<vmem>>, vector<512x1xf32>,
    %c0_16 = arith.constant 0 : index
    %c0_17 = arith.constant 0 : index
    %20 = vector.load %arg7[%c0_16, %c0_17] : memref<512x1xf32, #tpu.memory_space<vmem>>, vector<512x1xf32>
    %21 = arith.mulf %6, %6 : vector<512x256xf32>
    %cst_18 = arith.constant dense<0.000000e+00> : vector<512xf32>
    %22 = vector.multi_reduction <add>, %21, %cst_18 [1] : vector<512x256xf32> to vector<512xf32>
    %23 = vector.shape_cast %22 : vector<512xf32> to vector<512x1xf32>
    %24 = arith.addf %20, %23 : vector<512x1xf32>
    %c0_19 = arith.constant 0 : index
    %c0_20 = arith.constant 0 : index
    %25 = vector.load %arg7[%c0_19, %c0_20] : memref<512x1xf32, #tpu.memory_space<vmem>>, vector<512x1xf32>
    tpu.vector_store %arg7[%c0_19, %c0_20], %24 {strides = array<i32>} : memref<512x1xf32, #tpu.memory_space<vmem>>, vector<512x1xf32>,
    return
  }
  func.func @transform_0(%arg0: i32, %arg1: i32) -> (i32, i32, i32) {
    %c0_i32 = arith.constant 0 : i32
    %c0_i32_0 = arith.constant 0 : i32
    return %arg0, %c0_i32, %arg1 : i32, i32, i32
  }
  func.func @transform_1(%arg0: i32, %arg1: i32) -> (i32, i32) {
    %c0_i32 = arith.constant 0 : i32
    %c0_i32_0 = arith.constant 0 : i32
    %c0_i32_1 = arith.constant 0 : i32
    return %c0_i32, %c0_i32_0 : i32, i32
  }
  func.func @transform_2(%arg0: i32, %arg1: i32) -> (i32, i32) {
    %c0_i32 = arith.constant 0 : i32
    %c0_i32_0 = arith.constant 0 : i32
    %c0_i32_1 = arith.constant 0 : i32
    return %c0_i32, %c0_i32_0 : i32, i32
  }
  func.func @transform_3(%arg0: i32, %arg1: i32) -> (i32, i32, i32) {
    %c0_i32 = arith.constant 0 : i32
    %c0_i32_0 = arith.constant 0 : i32
    return %arg0, %c0_i32, %arg1 : i32, i32, i32
  }
  func.func @transform_4(%arg0: i32, %arg1: i32) -> (i32, i32) {
    %c0_i32 = arith.constant 0 : i32
    %c0_i32_0 = arith.constant 0 : i32
    %c0_i32_1 = arith.constant 0 : i32
    return %c0_i32, %c0_i32_0 : i32, i32
  }
  func.func @transform_5(%arg0: i32, %arg1: i32) -> (i32, i32) {
    %c0_i32 = arith.constant 0 : i32
    %c0_i32_0 = arith.constant 0 : i32
    %c0_i32_1 = arith.constant 0 : i32
    return %c0_i32, %c0_i32_0 : i32, i32
  }
}

</mosaic_0001>

<bundles_post_ra>
// kernel: tpu_custom_call.1
= control target key start
LH: loop header
LB: loop body
LE: loop exit
PB: predicated region body
PF: predicated region fallthrough
CT: control target
= control target key end

     0   :  { %11 = vsyncpa [#allocation3], 0  ;;  %s6882_s0 = inlined_call_operand.hbm [shape: f32[2,512,256], index: 0, kind: input, shape index: {}]   ;;  %s6883_s1 = inlined_call_operand.hbm [shape: f32[512,512], index: 1, kind: input, shape index: {}]   ;;  %s6884_s2 = inlined_call_operand.vmem [shape: f32[512,1], index: 2, kind: input, shape index: {}]   ;;  %s6885_s3 = inlined_call_operand.hbm [shape: f32[2,512,256], index: 3, kind: output, shape index: {0}]   ;;  %s6886_s4 = inlined_call_operand.vmem [shape: f32[512,1], index: 4, kind: output, shape index: {1}]   ;;  %s6887_s5 = inlined_call_operand.vmem [shape: f32[512,1], index: 5, kind: output, shape index: {2}]  }
   0x1   :  { %13 = vsyncpa [#allocation3 + $0x1], 0 }
   0x2   :  { %14 = vsyncpa [#allocation6], 0 }
   0x3   :  { %15 = vsyncpa [#allocation4], 0 }
   0x4   :  { %17 = vsyncpa [#allocation4 + $0x1], 0  ;;  %s3899_s18 = smov 0   ;;  %s3901_s19 = smov 0  }
   0x5   :  { %s3903_s20 = smov 0   ;;  %s3905_s21 = smov 0  }
   0x6   :  { %s3907_s22 = smov 0   ;;  %s3909_s23 = smov 0  }
   0x7 LB: > { %s3224_s24 = sadd.s32 4294967295, %s3856_s23   ;;  %s3225_s25 = sadd.s32 4294967294, %s3856_s23   ;;  %s3856_s23 = sphi %s3909_s23, %s23_s23   ;;  %s3852_s22 = sphi %s3907_s22, %s7305_s22   ;;  %s3848_s21 = sphi %s3905_s21, %s7304_s21   ;;  %s3844_s20 = sphi %s3903_s20, %s7303_s20   ;;  %s3840_s19 = sphi %s3901_s19, %s7302_s19   ;;  %s3836_s18 = sphi %s3899_s18, %s7301_s18  }
   0x8   : > { %p57_p0 = scmp.ne.s32.totalorder %s3840_s19, %s3836_s18  ;;  %p3933_p1 = scmp.eq.s32.totalorder %s3224_s24, 0 }
   0x9   : > { %p3937_p2 = scmp.eq.s32.totalorder %s3224_s24, 1  ;;  %p131_p3 = scmp.eq.s32.totalorder %s3225_s25, 1 }
   0xa   : > { %s7052_s26 = scalar_select %p3933_p1, 1, 0 }
   0xb   : > { %s7053_s27 = scalar_select %p3937_p2, 1, 0 }
   0xc   : > { %p3943_p4 = por %p3933_p1, %p57_p0  ;;  %p3226_p5 = scmp.ge.s32.totalorder %s3856_s23, 1 }
   0xd   : > { %p3948_p6 = por %p131_p3, %p57_p0  ;;  %p180_p7 = scmp.lt.s32.totalorder %s3856_s23, 3 }
   0xe   : > { %s7054_s28 = scalar_select %p3943_p4, 1, 0 }
   0xf   : > { %s7055_s29 = scalar_select %p3948_p6, 1, 0 }
  0x10   : > { %p3953_p8 = pnand %p3226_p5, %p180_p7  ;;  %s3858_s6 = smov [#allocation5]  }
  0x11   : > { %s192_s7 = sshll.u32 %s3858_s6, 4  ;;  %s35_s9 = sadd.s32 1, %s3852_s22  ;;  %s193_s7 = int_to_ptr.vmem [resolvable:$true] %s192_s7 }
  0x12   : > { %s7056_s30 = scalar_select %p3953_p8, 1, 0 }
  0x13   : > { %p3637_p9 = pneg %p3953_p8  ;;  %s3712_s12 = scalar_lea.hbm %s6883_s1, 32768 }
  0x14   : > { %p3713_p12 = scmp.ne.s32.totalorder %s6883_s1, %s3712_s12  ;;  %p3719_p5 = scmp.lt.u32.totalorder %s3712_s12, %s6883_s1 }
  0x15   : > { %p3962_p11 = pnand %p3637_p9, %p3933_p1 }
  0x17   : > { %p3714_p13 = pneg %p3962_p11 }
  0x19   : > { %p3715_p0 = pnand %p3714_p13, %p3713_p12 }
  0x1b   : > { %p3716_p3 = pneg %p3715_p0 }
  0x1d   : > { %p3721_p7 = pnand %p3719_p5, %p3716_p3 }
  0x1f   : > { %3724 = shalt.err (!%p3721_p7)
}
  0x20   : > { %s3725_s17 = scalar_lea.vmem %s193_s7, 32768  ;;  %p3733_p1 = scmp.lt.s32.totalorder %s193_s7, %s193_s7 }
  0x21   : > { %p3726_p9 = scmp.ne.s32.totalorder %s193_s7, %s3725_s17  ;;  %p3734_p4 = scmp.lt.s32.totalorder %s3725_s17, %s3725_s17 }
  0x23   : > { %p3728_p10 = pnand %p3726_p9, %p3714_p13  ;;  %p3735_p8 = por %p3734_p4, %p3733_p1 }
  0x25   : > { %p3729_p6 = pneg %p3728_p10 }
  0x27   : > { %p3736_p2 = pnand %p3735_p8, %p3729_p6 }
  0x29   : > { %3739 = shalt.err (!%p3736_p2)
}
  0x2a   : > { %s3859_s24 = smov 512   ;;  %s3860_s25 = smov 32  }
  0x2b   : > { %3640 = dma.hbm_to_vmem [thread:$0]  (!%p3962_p11), %s6883_s1, 32768, %s193_s7, [#allocation6], %s3859_s24, %s3859_s24, %s3860_s25  }
  0x2c   : > { %p37_p1 = scmp.ge.s32.totalorder %s35_s9, 2  ;;  %s44_s11 = sadd.s32 1, %s3844_s20 }
  0x2d   : > { %p51_p2 = scmp.ne.s32.totalorder %s3844_s20, %s3840_s19  ;;  %p52_p4 = scmp.eq.s32.totalorder %s3856_s23, 0 }
  0x2e   : > { %s7307_s9 = smov (%p37_p1, %s35_s9), 0  ;;  %p7059_p8 = scmp.ne.s32.totalorder %s7053_s27, 0 }
  0x2f   : > { %p3989_p6 = por %p52_p4, %p51_p2  ;;  %s39_s8 = ssub.s32 %s3852_s22, %s7307_s9 }
  0x30   : > { %p3995_p10 = por %p7059_p8, %p51_p2  ;;  %p3650_p12 = scmp.lt.s32.totalorder %s3856_s23, 2 }
  0x31   : > { %p42_p11 = scmp.eq.s32.totalorder %s39_s8, 0  ;;  %s209_s7 = sand.u32 1, %s3844_s20  }
  0x32   : > { %s3229_s14 = sshll.u32 %s209_s7, 10  ;;  %s3242_s16 = sshll.u32 %s3852_s22, 14 }
  0x33   : > { %s4004_s15 = scalar_select %p42_p11, %s3844_s20, %s44_s11  }
  0x34   : > { %s4010_s25 = scalar_lea.hbm %s6882_s0, %s3242_s16  ;;  %s213_s27 = scalar_lea.vmem [#allocation2], %s3229_s14 }
  0x35   : > { %s222_s6 = sshll.u32 %s213_s27, 4  ;;  %p4016_p13 = pnand %p3650_p12, %p3989_p6  ;;  %s4012_s6 = int_to_ptr.vmem [resolvable:$true] %s222_s6 }
  0x36   : > { %s4020_s11 = scalar_lea.sflag [#allocation3], %s209_s7  ;;  %s3740_s8 = scalar_lea.hbm %s4010_s25, 16384 }
  0x37   : > { %p3741_p0 = scmp.ne.s32.totalorder %s4010_s25, %s3740_s8  ;;  %p3742_p3 = pneg %p4016_p13 }
  0x38   : > { %s3745_s12 = scalar_lea.hbm %s6882_s0, 32768  ;;  %p3746_p9 = scmp.lt.u32.totalorder %s4010_s25, %s6882_s0 }
  0x39   : > { %p3743_p5 = pnand %p3742_p3, %p3741_p0  ;;  %p3747_p1 = scmp.lt.u32.totalorder %s3745_s12, %s3740_s8 }
  0x3a   : > { %p3749_p4 = scmp.lt.u32.totalorder %s3740_s8, %s4010_s25 }
  0x3b   : > { %p3744_p7 = pneg %p3743_p5  ;;  %p3748_p2 = por %p3747_p1, %p3746_p9 }
  0x3d   : > { %p3750_p6 = por %p3749_p4, %p3748_p2 }
  0x3f   : > { %p3751_p8 = pnand %p3750_p6, %p3744_p7 }
  0x41   : > { %3754 = shalt.err (!%p3751_p8)
}
  0x42   : > { %s3755_s7 = scalar_lea.vmem %s4012_s6, 16384  ;;  %s3861_s27 = smov [#allocation2]  }
  0x43   : > { %p3756_p12 = scmp.ne.s32.totalorder %s4012_s6, %s3755_s7  ;;  %s3760_s14 = sshll.u32 %s3861_s27, 4  ;;  %s3761_s14 = int_to_ptr.vmem [resolvable:$false] %s3760_s14 }
  0x44   : > { %s3762_s16 = scalar_lea.vmem %s3761_s14, 32768  ;;  %p3763_p5 = scmp.lt.s32.totalorder %s4012_s6, %s3761_s14 }
  0x45   : > { %p3758_p11 = pnand %p3756_p12, %p3742_p3  ;;  %p3764_p9 = scmp.lt.s32.totalorder %s3762_s16, %s3755_s7 }
  0x47   : > { %p3759_p0 = pneg %p3758_p11  ;;  %p3765_p1 = por %p3764_p9, %p3763_p5 }
  0x49   : > { %p3766_p2 = pnand %p3765_p1, %p3759_p0 }
  0x4b   : > { %3769 = shalt.err (!%p3766_p2)
}
  0x4c   : > { %s3862_s8 = smov 256   ;;  %s3863_s12 = smov 16  }
  0x4d   : > { %3644 = dma.hbm_to_vmem [thread:$0]  (!%p4016_p13), %s4010_s25, 16384, %s4012_s6, %s4020_s11, %s3862_s8, %s3862_s8, %s3863_s12  }
  0x4e   : > { %p7062_p3 = scmp.ne.s32.totalorder %s7056_s30, 0 }
  0x50   : > { %234 = sbr.rel (%p7062_p3) target bundleno = 1100 (0x44c), region = 32 }
  0x57   : > { %s4051_s17 = sand.u32 1, %s3840_s19   ;;  %p7063_p7 = scmp.ne.s32.totalorder %s7054_s28, 0 }
  0x58   : > { %s3233_s24 = sshll.u32 %s4051_s17, 10  ;;  %s237_s7 = scalar_lea.sflag [#allocation3], %s4051_s17 }
  0x59   : > { %s4057_s27 = scalar_lea.vmem [#allocation2], %s3233_s24 }
  0x5a   : > { %3823 = dma.done.wait (%p7063_p7), %s237_s7, 16384  }
  0x5b   : > { %3825 = vsyncadd (%p7063_p7), %s237_s7, 4294950912  ;;  %p7064_p13 = scmp.ne.s32.totalorder %s7052_s26, 0 }
  0x5d   : > { %3827 = dma.done.wait (%p7064_p13), [#allocation6], 32768  }
  0x5e   : > { %3829 = vsyncadd (%p7064_p13), [#allocation6], 4294934528  ;;  %v274_v0 = vld [vmem:[%s4057_s27 + $0x8] sm:$0xff]  ;;  %v276_v1 = vld [vmem:[%s4057_s27 + $0x18] sm:$0xff]  ;;  %s4393_s7 = scalar_lea.vmem [#allocation7], %s3233_s24  ;;  %p2067_p4 = scmp.eq.s32.totalorder %s3848_s21, 0 }
  0x5f   : > { %v273_v2 = vld [vmem:[%s4057_s27] sm:$0xff]  ;;  %v3245_v3 = vpack.c.bf16 %v276_v1, %v274_v0  ;;  %v275_v4 = vld [vmem:[%s4057_s27 + $0x10] sm:$0xff]  ;;  %v338_v5 = vld [vmem:[%s4057_s27 + $0x208] sm:$0xff]  ;;  %vm2073_vm0 = vcmask (%p2067_p4), 7168  }
  0x60   : > { %v340_v6 = vld [vmem:[%s4057_s27 + $0x218] sm:$0xff]  ;;  %v3247_v7 = vpack.c.bf16 %v275_v4, %v273_v2  ;;  %v337_v9 = vld [vmem:[%s4057_s27 + $0x200] sm:$0xff]  ;;  %v339_v10 = vld [vmem:[%s4057_s27 + $0x210] sm:$0xff] }
  0x61   : > { %v3309_v8 = vpack.c.bf16 %v340_v6, %v338_v5  ;;  %v278_v11 = vld [vmem:[%s4057_s27 + $0x28] sm:$0xff]  ;;  %3246 = vmatprep.subr.bf16.mxu1 %v3245_v3  ;;  %v3311_v12 = vpack.c.bf16 %v339_v10, %v337_v9  ;;  %v280_v13 = vld [vmem:[%s4057_s27 + $0x38] sm:$0xff]  ;;  %v277_v14 = vld [vmem:[%s4057_s27 + $0x20] sm:$0xff] }
  0x62   : > { %v279_v15 = vld [vmem:[%s4057_s27 + $0x30] sm:$0xff]  ;;  %3248 = vmatpush1.bf16.msra.mxu1 %v3247_v7  ;;  %v3249_v16 = vpack.c.bf16 %v280_v13, %v278_v11  ;;  %v342_v18 = vld [vmem:[%s4057_s27 + $0x228] sm:$0xff]  ;;  %v344_v19 = vld [vmem:[%s4057_s27 + $0x238] sm:$0xff] }
  0x63   : > { %3310 = vmatprep.subr.bf16.mxu0 %v3309_v8  ;;  %v3251_v17 = vpack.c.bf16 %v279_v15, %v277_v14  ;;  %v341_v20 = vld [vmem:[%s4057_s27 + $0x220] sm:$0xff]  ;;  %v3313_v21 = vpack.c.bf16 %v344_v19, %v342_v18  ;;  %v343_v22 = vld [vmem:[%s4057_s27 + $0x230] sm:$0xff]  ;;  %v282_v23 = vld [vmem:[%s4057_s27 + $0x48] sm:$0xff] }
  0x64   : > { %3312 = vmatpush1.bf16.msra.mxu0 %v3311_v12  ;;  %v284_v24 = vld [vmem:[%s4057_s27 + $0x58] sm:$0xff]  ;;  %3250 = vmatprep.subr.bf16.mxu1 %v3249_v16  ;;  %v3315_v25 = vpack.c.bf16 %v343_v22, %v341_v20  ;;  %v281_v27 = vld [vmem:[%s4057_s27 + $0x40] sm:$0xff]  ;;  %v283_v28 = vld [vmem:[%s4057_s27 + $0x50] sm:$0xff]  ;;  %v3864_v20 = vmov 0  }
  0x65   : > { %v3253_v26 = vpack.c.bf16 %v284_v24, %v282_v23  ;;  %v346_v29 = vld [vmem:[%s4057_s27 + $0x248] sm:$0xff]  ;;  %3314 = vmatprep.subr.bf16.mxu0 %v3313_v21  ;;  %v348_v30 = vld [vmem:[%s4057_s27 + $0x258] sm:$0xff]  ;;  %v345_v31 = vld [vmem:[%s4057_s27 + $0x240] sm:$0xff]  ;;  %v3255_v33 = vpack.c.bf16 %v283_v28, %v281_v27  ;;  %3710 = vset.pattern.permute.xlu0 %v3864_v20 }
  0x66   : > { %v347_v32 = vld [vmem:[%s4057_s27 + $0x250] sm:$0xff]  ;;  %3252 = vmatpush1.bf16.msra.mxu1 %v3251_v17  ;;  %v3317_v34 = vpack.c.bf16 %v348_v30, %v346_v29  ;;  %v286_v35 = vld [vmem:[%s4057_s27 + $0x68] sm:$0xff]  ;;  %v288_v36 = vld [vmem:[%s4057_s27 + $0x78] sm:$0xff]  ;;  %3711 = vset.pattern.permute.xlu1 %v3864_v20 }
  0x67   : > { %v285_v37 = vld [vmem:[%s4057_s27 + $0x60] sm:$0xff]  ;;  %3254 = vmatprep.subr.bf16.mxu1 %v3253_v26  ;;  %v3319_v38 = vpack.c.bf16 %v347_v32, %v345_v31  ;;  %v3257_v39 = vpack.c.bf16 %v288_v36, %v286_v35  ;;  %v287_v40 = vld [vmem:[%s4057_s27 + $0x70] sm:$0xff]  ;;  %v350_v41 = vld [vmem:[%s4057_s27 + $0x268] sm:$0xff] }
  0x68   : > { %3316 = vmatpush1.bf16.msra.mxu0 %v3315_v25  ;;  %v352_v42 = vld [vmem:[%s4057_s27 + $0x278] sm:$0xff]  ;;  %v349_v44 = vld [vmem:[%s4057_s27 + $0x260] sm:$0xff]  ;;  %v351_v45 = vld [vmem:[%s4057_s27 + $0x270] sm:$0xff]  ;;  %v3259_v48 = vpack.c.bf16 %v287_v40, %v285_v37 }
  0x69   : > { %3318 = vmatprep.subr.bf16.mxu0 %v3317_v34  ;;  %v3321_v43 = vpack.c.bf16 %v352_v42, %v350_v41  ;;  %v290_v46 = vld [vmem:[%s4057_s27 + $0x88] sm:$0xff]  ;;  %v292_v47 = vld [vmem:[%s4057_s27 + $0x98] sm:$0xff]  ;;  %v3323_v51 = vpack.c.bf16 %v351_v45, %v349_v44  ;;  %v289_v53 = vld [vmem:[%s4057_s27 + $0x80] sm:$0xff] }
  0x6a   : > { %3256 = vmatpush1.bf16.msra.mxu1 %v3255_v33  ;;  %v354_v49 = vld [vmem:[%s4057_s27 + $0x288] sm:$0xff]  ;;  %v356_v50 = vld [vmem:[%s4057_s27 + $0x298] sm:$0xff]  ;;  %v3261_v52 = vpack.c.bf16 %v292_v47, %v290_v46  ;;  %v291_v54 = vld [vmem:[%s4057_s27 + $0x90] sm:$0xff] }
  0x6b   : > { %3258 = vmatprep.subr.bf16.mxu1 %v3257_v39  ;;  %v353_v55 = vld [vmem:[%s4057_s27 + $0x280] sm:$0xff]  ;;  %v3325_v56 = vpack.c.bf16 %v356_v50, %v354_v49  ;;  %v355_v57 = vld [vmem:[%s4057_s27 + $0x290] sm:$0xff]  ;;  %v294_v58 = vld [vmem:[%s4057_s27 + $0xa8] sm:$0xff]  ;;  %v3263_v62 = vpack.c.bf16 %v291_v54, %v289_v53 }
  0x6c   : > { %3320 = vmatpush1.bf16.msra.mxu0 %v3319_v38  ;;  %v296_v59 = vld [vmem:[%s4057_s27 + $0xb8] sm:$0xff]  ;;  %v358_v60 = vld [vmem:[%s4057_s27 + $0x2a8] sm:$0xff]  ;;  %v3327_v63 = vpack.c.bf16 %v355_v57, %v353_v55  ;;  %v293_v1 = vld [vmem:[%s4057_s27 + $0xa0] sm:$0xff] }
  0x6d   : > { %3322 = vmatprep.subr.bf16.mxu0 %v3321_v43  ;;  %v360_v61 = vld [vmem:[%s4057_s27 + $0x2b8] sm:$0xff]  ;;  %v3265_v0 = vpack.c.bf16 %v296_v59, %v294_v58  ;;  %v295_v2 = vld [vmem:[%s4057_s27 + $0xb0] sm:$0xff]  ;;  %v357_v3 = vld [vmem:[%s4057_s27 + $0x2a0] sm:$0xff] }
  0x6e   : > { %3260 = vmatpush1.bf16.msra.mxu1 %v3259_v48  ;;  %v3329_v4 = vpack.c.bf16 %v360_v61, %v358_v60  ;;  %v359_v5 = vld [vmem:[%s4057_s27 + $0x2b0] sm:$0xff]  ;;  %v298_v6 = vld [vmem:[%s4057_s27 + $0xc8] sm:$0xff]  ;;  %v300_v7 = vld [vmem:[%s4057_s27 + $0xd8] sm:$0xff]  ;;  %v3267_v10 = vpack.c.bf16 %v295_v2, %v293_v1 }
  0x6f   : > { %3262 = vmatprep.subr.bf16.mxu1 %v3261_v52  ;;  %v362_v8 = vld [vmem:[%s4057_s27 + $0x2c8] sm:$0xff]  ;;  %v364_v9 = vld [vmem:[%s4057_s27 + $0x2d8] sm:$0xff]  ;;  %v3331_v11 = vpack.c.bf16 %v359_v5, %v357_v3  ;;  %v3269_v12 = vpack.c.bf16 %v300_v7, %v298_v6  ;;  %v297_v13 = vld [vmem:[%s4057_s27 + $0xc0] sm:$0xff] }
  0x70   : > { %3324 = vmatpush1.bf16.msra.mxu0 %v3323_v51  ;;  %v299_v14 = vld [vmem:[%s4057_s27 + $0xd0] sm:$0xff]  ;;  %v361_v15 = vld [vmem:[%s4057_s27 + $0x2c0] sm:$0xff]  ;;  %v3333_v16 = vpack.c.bf16 %v364_v9, %v362_v8  ;;  %v302_v18 = vld [vmem:[%s4057_s27 + $0xe8] sm:$0xff] }
  0x71   : > { %3326 = vmatprep.subr.bf16.mxu0 %v3325_v56  ;;  %v363_v17 = vld [vmem:[%s4057_s27 + $0x2d0] sm:$0xff]  ;;  %v304_v19 = vld [vmem:[%s4057_s27 + $0xf8] sm:$0xff]  ;;  %v366_v21 = vld [vmem:[%s4057_s27 + $0x2e8] sm:$0xff]  ;;  %v3271_v23 = vpack.c.bf16 %v299_v14, %v297_v13 }
  0x72   : > { %3264 = vmatpush1.bf16.msra.mxu1 %v3263_v62  ;;  %v368_v22 = vld [vmem:[%s4057_s27 + $0x2f8] sm:$0xff]  ;;  %v3335_v24 = vpack.c.bf16 %v363_v17, %v361_v15  ;;  %v3273_v25 = vpack.c.bf16 %v304_v19, %v302_v18  ;;  %v301_v26 = vld [vmem:[%s4057_s27 + $0xe0] sm:$0xff]  ;;  %v303_v27 = vld [vmem:[%s4057_s27 + $0xf0] sm:$0xff] }
  0x73   : > { %3266 = vmatprep.subr.bf16.mxu1 %v3265_v0  ;;  %v365_v28 = vld [vmem:[%s4057_s27 + $0x2e0] sm:$0xff]  ;;  %v3337_v29 = vpack.c.bf16 %v368_v22, %v366_v21  ;;  %v367_v30 = vld [vmem:[%s4057_s27 + $0x2f0] sm:$0xff]  ;;  %v306_v31 = vld [vmem:[%s4057_s27 + $0x108] sm:$0xff]  ;;  %v3275_v35 = vpack.c.bf16 %v303_v27, %v301_v26 }
  0x74   : > { %3328 = vmatpush1.bf16.msra.mxu0 %v3327_v63  ;;  %v308_v32 = vld [vmem:[%s4057_s27 + $0x118] sm:$0xff]  ;;  %v370_v33 = vld [vmem:[%s4057_s27 + $0x308] sm:$0xff]  ;;  %v3339_v36 = vpack.c.bf16 %v367_v30, %v365_v28  ;;  %v305_v38 = vld [vmem:[%s4057_s27 + $0x100] sm:$0xff] }
  0x75   : > { %3330 = vmatprep.subr.bf16.mxu0 %v3329_v4  ;;  %v372_v34 = vld [vmem:[%s4057_s27 + $0x318] sm:$0xff]  ;;  %v3277_v37 = vpack.c.bf16 %v308_v32, %v306_v31  ;;  %v307_v39 = vld [vmem:[%s4057_s27 + $0x110] sm:$0xff]  ;;  %v369_v40 = vld [vmem:[%s4057_s27 + $0x300] sm:$0xff] }
  0x76   : > { %3268 = vmatpush1.bf16.msra.mxu1 %v3267_v10  ;;  %v3341_v41 = vpack.c.bf16 %v372_v34, %v370_v33  ;;  %v371_v42 = vld [vmem:[%s4057_s27 + $0x310] sm:$0xff]  ;;  %v310_v43 = vld [vmem:[%s4057_s27 + $0x128] sm:$0xff]  ;;  %v312_v44 = vld [vmem:[%s4057_s27 + $0x138] sm:$0xff]  ;;  %v3279_v47 = vpack.c.bf16 %v307_v39, %v305_v38 }
  0x77   : > { %3270 = vmatprep.subr.bf16.mxu1 %v3269_v12  ;;  %v374_v45 = vld [vmem:[%s4057_s27 + $0x328] sm:$0xff]  ;;  %v376_v46 = vld [vmem:[%s4057_s27 + $0x338] sm:$0xff]  ;;  %v3343_v48 = vpack.c.bf16 %v371_v42, %v369_v40  ;;  %v3281_v49 = vpack.c.bf16 %v312_v44, %v310_v43  ;;  %v309_v50 = vld [vmem:[%s4057_s27 + $0x120] sm:$0xff] }
  0x78   : > { %3332 = vmatpush1.bf16.msra.mxu0 %v3331_v11  ;;  %v311_v51 = vld [vmem:[%s4057_s27 + $0x130] sm:$0xff]  ;;  %v373_v52 = vld [vmem:[%s4057_s27 + $0x320] sm:$0xff]  ;;  %v3345_v53 = vpack.c.bf16 %v376_v46, %v374_v45  ;;  %v314_v55 = vld [vmem:[%s4057_s27 + $0x148] sm:$0xff] }
  0x79   : > { %3334 = vmatprep.subr.bf16.mxu0 %v3333_v16  ;;  %v375_v54 = vld [vmem:[%s4057_s27 + $0x330] sm:$0xff]  ;;  %v316_v56 = vld [vmem:[%s4057_s27 + $0x158] sm:$0xff]  ;;  %v378_v57 = vld [vmem:[%s4057_s27 + $0x348] sm:$0xff]  ;;  %v3283_v59 = vpack.c.bf16 %v311_v51, %v309_v50 }
  0x7a   : > { %3272 = vmatpush1.bf16.msra.mxu1 %v3271_v23  ;;  %v380_v58 = vld [vmem:[%s4057_s27 + $0x358] sm:$0xff]  ;;  %v3347_v60 = vpack.c.bf16 %v375_v54, %v373_v52  ;;  %v3285_v61 = vpack.c.bf16 %v316_v56, %v314_v55  ;;  %v313_v62 = vld [vmem:[%s4057_s27 + $0x140] sm:$0xff]  ;;  %v315_v63 = vld [vmem:[%s4057_s27 + $0x150] sm:$0xff] }
  0x7b   : > { %3274 = vmatprep.subr.bf16.mxu1 %v3273_v25  ;;  %v377_v0 = vld [vmem:[%s4057_s27 + $0x340] sm:$0xff]  ;;  %v3349_v1 = vpack.c.bf16 %v380_v58, %v378_v57  ;;  %v379_v2 = vld [vmem:[%s4057_s27 + $0x350] sm:$0xff]  ;;  %v318_v3 = vld [vmem:[%s4057_s27 + $0x168] sm:$0xff]  ;;  %v3287_v7 = vpack.c.bf16 %v315_v63, %v313_v62 }
  0x7c   : > { %3336 = vmatpush1.bf16.msra.mxu0 %v3335_v24  ;;  %v320_v4 = vld [vmem:[%s4057_s27 + $0x178] sm:$0xff]  ;;  %v382_v5 = vld [vmem:[%s4057_s27 + $0x368] sm:$0xff]  ;;  %v317_v8 = vld [vmem:[%s4057_s27 + $0x160] sm:$0xff]  ;;  %v3351_v9 = vpack.c.bf16 %v379_v2, %v377_v0 }
  0x7d   : > { %3338 = vmatprep.subr.bf16.mxu0 %v3337_v29  ;;  %v384_v6 = vld [vmem:[%s4057_s27 + $0x378] sm:$0xff]  ;;  %v3289_v10 = vpack.c.bf16 %v320_v4, %v318_v3  ;;  %v319_v11 = vld [vmem:[%s4057_s27 + $0x170] sm:$0xff]  ;;  %v381_v12 = vld [vmem:[%s4057_s27 + $0x360] sm:$0xff] }
  0x7e   : > { %3276 = vmatpush1.bf16.msra.mxu1 %v3275_v35  ;;  %v383_v13 = vld [vmem:[%s4057_s27 + $0x370] sm:$0xff]  ;;  %v3353_v14 = vpack.c.bf16 %v384_v6, %v382_v5  ;;  %v322_v15 = vld [vmem:[%s4057_s27 + $0x188] sm:$0xff]  ;;  %v324_v16 = vld [vmem:[%s4057_s27 + $0x198] sm:$0xff]  ;;  %v3291_v21 = vpack.c.bf16 %v319_v11, %v317_v8 }
  0x7f   : > { %3278 = vmatprep.subr.bf16.mxu1 %v3277_v37  ;;  %v402_v17 = vld [vmem:[#allocation5 + $0x8] sm:$0xff]  ;;  %v388_v19 = vld [vmem:[%s4057_s27 + $0x398] sm:$0xff]  ;;  %v3355_v22 = vpack.c.bf16 %v383_v13, %v381_v12  ;;  %v3293_v23 = vpack.c.bf16 %v324_v16, %v322_v15  ;;  %v321_v24 = vld [vmem:[%s4057_s27 + $0x180] sm:$0xff] }
  0x80   : > { %3340 = vmatpush1.bf16.msra.mxu0 %v3339_v36  ;;  %v386_v18 = vld [vmem:[%s4057_s27 + $0x388] sm:$0xff]  ;;  %1105 = vmatprep.mubr.f32.mxu1 %v402_v17  ;;  %v404_v20 = vld [vmem:[#allocation5 + $0x18] sm:$0xff]  ;;  %v323_v25 = vld [vmem:[%s4057_s27 + $0x190] sm:$0xff] }
  0x81   : > { %3342 = vmatprep.subr.bf16.mxu0 %v3341_v41  ;;  %1554 = vmatprep.mubr.f32.mxu0 %v404_v20  ;;  %v385_v26 = vld [vmem:[%s4057_s27 + $0x380] sm:$0xff]  ;;  %v3357_v27 = vpack.c.bf16 %v388_v19, %v386_v18  ;;  %v387_v28 = vld [vmem:[%s4057_s27 + $0x390] sm:$0xff]  ;;  %v326_v29 = vld [vmem:[%s4057_s27 + $0x1a8] sm:$0xff]  ;;  %v3295_v33 = vpack.c.bf16 %v323_v25, %v321_v24 }
  0x82   : > { %3280 = vmatpush1.bf16.msra.mxu1 %v3279_v47  ;;  %v328_v30 = vld [vmem:[%s4057_s27 + $0x1b8] sm:$0xff]  ;;  %v390_v31 = vld [vmem:[%s4057_s27 + $0x3a8] sm:$0xff]  ;;  %v3359_v34 = vpack.c.bf16 %v387_v28, %v385_v26  ;;  %v325_v36 = vld [vmem:[%s4057_s27 + $0x1a0] sm:$0xff] }
  0x83   : > { %3282 = vmatprep.subr.bf16.mxu1 %v3281_v49  ;;  %v392_v32 = vld [vmem:[%s4057_s27 + $0x3b8] sm:$0xff]  ;;  %v3297_v35 = vpack.c.bf16 %v328_v30, %v326_v29  ;;  %v327_v37 = vld [vmem:[%s4057_s27 + $0x1b0] sm:$0xff]  ;;  %v389_v38 = vld [vmem:[%s4057_s27 + $0x3a0] sm:$0xff] }
  0x84   : > { %3344 = vmatpush1.bf16.msra.mxu0 %v3343_v48  ;;  %v3361_v39 = vpack.c.bf16 %v392_v32, %v390_v31  ;;  %v391_v40 = vld [vmem:[%s4057_s27 + $0x3b0] sm:$0xff]  ;;  %v330_v41 = vld [vmem:[%s4057_s27 + $0x1c8] sm:$0xff]  ;;  %v332_v42 = vld [vmem:[%s4057_s27 + $0x1d8] sm:$0xff]  ;;  %v3299_v45 = vpack.c.bf16 %v327_v37, %v325_v36 }
  0x85   : > { %3346 = vmatprep.subr.bf16.mxu0 %v3345_v53  ;;  %v394_v43 = vld [vmem:[%s4057_s27 + $0x3c8] sm:$0xff]  ;;  %v396_v44 = vld [vmem:[%s4057_s27 + $0x3d8] sm:$0xff]  ;;  %v3363_v46 = vpack.c.bf16 %v391_v40, %v389_v38  ;;  %v3301_v47 = vpack.c.bf16 %v332_v42, %v330_v41  ;;  %v329_v48 = vld [vmem:[%s4057_s27 + $0x1c0] sm:$0xff] }
  0x86   : > { %3284 = vmatpush1.bf16.msra.mxu1 %v3283_v59  ;;  %v331_v49 = vld [vmem:[%s4057_s27 + $0x1d0] sm:$0xff]  ;;  %v393_v50 = vld [vmem:[%s4057_s27 + $0x3c0] sm:$0xff]  ;;  %v3365_v51 = vpack.c.bf16 %v396_v44, %v394_v43  ;;  %v334_v53 = vld [vmem:[%s4057_s27 + $0x1e8] sm:$0xff] }
  0x87   : > { %3286 = vmatprep.subr.bf16.mxu1 %v3285_v61  ;;  %v395_v52 = vld [vmem:[%s4057_s27 + $0x3d0] sm:$0xff]  ;;  %v336_v54 = vld [vmem:[%s4057_s27 + $0x1f8] sm:$0xff]  ;;  %v398_v55 = vld [vmem:[%s4057_s27 + $0x3e8] sm:$0xff]  ;;  %v3303_v57 = vpack.c.bf16 %v331_v49, %v329_v48 }
  0x88   : > { %3348 = vmatpush1.bf16.msra.mxu0 %v3347_v60  ;;  %v400_v56 = vld [vmem:[%s4057_s27 + $0x3f8] sm:$0xff]  ;;  %v3367_v58 = vpack.c.bf16 %v395_v52, %v393_v50  ;;  %v3305_v59 = vpack.c.bf16 %v336_v54, %v334_v53  ;;  %v333_v60 = vld [vmem:[%s4057_s27 + $0x1e0] sm:$0xff]  ;;  %v335_v61 = vld [vmem:[%s4057_s27 + $0x1f0] sm:$0xff] }
  0x89   : > { %3350 = vmatprep.subr.bf16.mxu0 %v3349_v1  ;;  %v3369_v62 = vpack.c.bf16 %v400_v56, %v398_v55  ;;  %v397_v63 = vld [vmem:[%s4057_s27 + $0x3e0] sm:$0xff]  ;;  %v399_v0 = vld [vmem:[%s4057_s27 + $0x3f0] sm:$0xff]  ;;  %v3307_v1 = vpack.c.bf16 %v335_v61, %v333_v60  ;;  %v406_v5 = vld [vmem:[#allocation5 + $0x28] sm:$0xff] }
  0x8a   : > { %3288 = vmatpush1.bf16.msra.mxu1 %v3287_v7  ;;  %v3371_v2 = vpack.c.bf16 %v399_v0, %v397_v63  ;;  %v401_v3 = vld [vmem:[#allocation5] sm:$0xff]  ;;  %v403_v4 = vld [vmem:[#allocation5 + $0x10] sm:$0xff]  ;;  %v408_v6 = vld [vmem:[#allocation5 + $0x38] sm:$0xff] }
  0x8b   : > { %3290 = vmatprep.subr.bf16.mxu1 %v3289_v10  ;;  %v405_v7 = vld [vmem:[#allocation5 + $0x20] sm:$0xff]  ;;  %v407_v8 = vld [vmem:[#allocation5 + $0x30] sm:$0xff]  ;;  %v412_v10 = vld [vmem:[#allocation5 + $0x58] sm:$0xff] }
  0x8c   : > { %3352 = vmatpush1.bf16.msra.mxu0 %v3351_v9  ;;  %v410_v9 = vld [vmem:[#allocation5 + $0x48] sm:$0xff]  ;;  %v657_v11 = vld [vmem:[%s6884_s2] sm:$0xff]  ;;  %v411_v13 = vld [vmem:[#allocation5 + $0x50] sm:$0xff] }
  0x8d   : > { %3354 = vmatprep.subr.bf16.mxu0 %v3353_v14  ;;  %v409_v12 = vld [vmem:[#allocation5 + $0x40] sm:$0xff]  ;;  %v414_v14 = vld [vmem:[#allocation5 + $0x68] sm:$0xff]  ;;  %723 = vperm.xlu0 %3710, %v657_v11   ;;  %v659_v15 = vld [vmem:[%s6884_s2 + $0x10] sm:$0xff] }
  0x8e   : > { %3292 = vmatpush1.bf16.msra.mxu1 %v3291_v21  ;;  %v416_v16 = vld [vmem:[#allocation5 + $0x78] sm:$0xff]  ;;  %v658_v17 = vld [vmem:[%s6884_s2 + $0x8] sm:$0xff]  ;;  %733 = vperm.xlu1 %3711, %v659_v15   ;;  %v413_v19 = vld [vmem:[#allocation5 + $0x60] sm:$0xff] }
  0x8f   : > { %3294 = vmatprep.subr.bf16.mxu1 %v3293_v23  ;;  %v660_v18 = vld [vmem:[%s6884_s2 + $0x18] sm:$0xff]  ;;  %v415_v20 = vld [vmem:[#allocation5 + $0x70] sm:$0xff]  ;;  %v418_v21 = vld [vmem:[#allocation5 + $0x88] sm:$0xff] }
  0x90   : > { %3356 = vmatpush1.bf16.msra.mxu0 %v3355_v22  ;;  %v420_v22 = vld [vmem:[#allocation5 + $0x98] sm:$0xff]  ;;  %v661_v23 = vld [vmem:[%s6884_s2 + $0x20] sm:$0xff]  ;;  %v662_v24 = vld [vmem:[%s6884_s2 + $0x28] sm:$0xff] }
  0x91   : > { %3358 = vmatprep.subr.bf16.mxu0 %v3357_v27  ;;  %728 = vperm.xlu0 %3710, %v658_v17   ;;  %v417_v25 = vld [vmem:[#allocation5 + $0x80] sm:$0xff]  ;;  %v419_v26 = vld [vmem:[#allocation5 + $0x90] sm:$0xff]  ;;  %v422_v27 = vld [vmem:[#allocation5 + $0xa8] sm:$0xff] }
  0x92   : > { %3296 = vmatpush1.bf16.msra.mxu1 %v3295_v33  ;;  %738 = vperm.xlu1 %3711, %v660_v18   ;;  %v424_v28 = vld [vmem:[#allocation5 + $0xb8] sm:$0xff]  ;;  %v663_v29 = vld [vmem:[%s6884_s2 + $0x30] sm:$0xff]  ;;  %v421_v31 = vld [vmem:[#allocation5 + $0xa0] sm:$0xff] }
  0x93   : > { %3298 = vmatprep.subr.bf16.mxu1 %v3297_v35  ;;  %v664_v30 = vld [vmem:[%s6884_s2 + $0x38] sm:$0xff]  ;;  %v423_v32 = vld [vmem:[#allocation5 + $0xb0] sm:$0xff]  ;;  %v426_v33 = vld [vmem:[#allocation5 + $0xc8] sm:$0xff] }
  0x94   : > { %3360 = vmatpush1.bf16.msra.mxu0 %v3359_v34  ;;  %v428_v34 = vld [vmem:[#allocation5 + $0xd8] sm:$0xff]  ;;  %v665_v35 = vld [vmem:[%s6884_s2 + $0x40] sm:$0xff]  ;;  %v666_v36 = vld [vmem:[%s6884_s2 + $0x48] sm:$0xff] }
  0x95   : > { %3362 = vmatprep.subr.bf16.mxu0 %v3361_v39  ;;  %743 = vperm.xlu0 %3710, %v661_v23   ;;  %v425_v37 = vld [vmem:[#allocation5 + $0xc0] sm:$0xff]  ;;  %v427_v38 = vld [vmem:[#allocation5 + $0xd0] sm:$0xff]  ;;  %v430_v39 = vld [vmem:[#allocation5 + $0xe8] sm:$0xff] }
  0x96   : > { %3300 = vmatpush1.bf16.msra.mxu1 %v3299_v45  ;;  %748 = vperm.xlu1 %3711, %v662_v24   ;;  %v432_v40 = vld [vmem:[#allocation5 + $0xf8] sm:$0xff]  ;;  %v667_v41 = vld [vmem:[%s6884_s2 + $0x50] sm:$0xff]  ;;  %v429_v43 = vld [vmem:[#allocation5 + $0xe0] sm:$0xff] }
  0x97   : > { %3302 = vmatprep.subr.bf16.mxu1 %v3301_v47  ;;  %v668_v42 = vld [vmem:[%s6884_s2 + $0x58] sm:$0xff]  ;;  %v431_v44 = vld [vmem:[#allocation5 + $0xf0] sm:$0xff]  ;;  %v434_v45 = vld [vmem:[#allocation5 + $0x108] sm:$0xff] }
  0x98   : > { %3364 = vmatpush1.bf16.msra.mxu0 %v3363_v46  ;;  %v436_v46 = vld [vmem:[#allocation5 + $0x118] sm:$0xff]  ;;  %v669_v47 = vld [vmem:[%s6884_s2 + $0x60] sm:$0xff]  ;;  %v670_v48 = vld [vmem:[%s6884_s2 + $0x68] sm:$0xff] }
  0x99   : > { %3366 = vmatprep.subr.bf16.mxu0 %v3365_v51  ;;  %753 = vperm.xlu0 %3710, %v663_v29   ;;  %v433_v49 = vld [vmem:[#allocation5 + $0x100] sm:$0xff]  ;;  %v435_v50 = vld [vmem:[#allocation5 + $0x110] sm:$0xff]  ;;  %v438_v51 = vld [vmem:[#allocation5 + $0x128] sm:$0xff] }
  0x9a   : > { %3304 = vmatpush1.bf16.msra.mxu1 %v3303_v57  ;;  %758 = vperm.xlu1 %3711, %v664_v30   ;;  %v440_v52 = vld [vmem:[#allocation5 + $0x138] sm:$0xff]  ;;  %v671_v53 = vld [vmem:[%s6884_s2 + $0x70] sm:$0xff]  ;;  %v437_v55 = vld [vmem:[#allocation5 + $0x120] sm:$0xff] }
  0x9b   : > { %3306 = vmatprep.subr.bf16.mxu1 %v3305_v59  ;;  %v672_v54 = vld [vmem:[%s6884_s2 + $0x78] sm:$0xff]  ;;  %v439_v56 = vld [vmem:[#allocation5 + $0x130] sm:$0xff]  ;;  %v442_v57 = vld [vmem:[#allocation5 + $0x148] sm:$0xff] }
  0x9c   : > { %3368 = vmatpush1.bf16.msra.mxu0 %v3367_v58  ;;  %v444_v58 = vld [vmem:[#allocation5 + $0x158] sm:$0xff]  ;;  %v673_v59 = vld [vmem:[%s6884_s2 + $0x80] sm:$0xff]  ;;  %v674_v60 = vld [vmem:[%s6884_s2 + $0x88] sm:$0xff] }
  0x9d   : > { %3370 = vmatprep.subr.bf16.mxu0 %v3369_v62  ;;  %763 = vperm.xlu0 %3710, %v665_v35   ;;  %v441_v61 = vld [vmem:[#allocation5 + $0x140] sm:$0xff]  ;;  %v443_v62 = vld [vmem:[#allocation5 + $0x150] sm:$0xff]  ;;  %v446_v63 = vld [vmem:[#allocation5 + $0x168] sm:$0xff] }
  0x9e   : > { %3308 = vmatpush1.bf16.msra.mxu1 %v3307_v1  ;;  %768 = vperm.xlu1 %3711, %v666_v36   ;;  %v448_v0 = vld [vmem:[#allocation5 + $0x178] sm:$0xff]  ;;  %v675_v1 = vld [vmem:[%s6884_s2 + $0x90] sm:$0xff]  ;;  %v454_v11 = vld [vmem:[#allocation5 + $0x1a8] sm:$0xff] }
  0x9f   : > { %v453_v15 = vld [vmem:[#allocation5 + $0x1a0] sm:$0xff]  ;;  %v458_v17 = vld [vmem:[#allocation5 + $0x1c8] sm:$0xff]  ;;  %v460_v18 = vld [vmem:[#allocation5 + $0x1d8] sm:$0xff] }
  0xa0   : > { %3372 = vmatpush1.bf16.msra.mxu0 %v3371_v2  ;;  %v676_v2 = vld [vmem:[%s6884_s2 + $0x98] sm:$0xff]  ;;  %v462_v23 = vld [vmem:[#allocation5 + $0x1e8] sm:$0xff] }
  0xa1   : > { %1106 = vmatmul.mubr.f32.vlgmr.msra.gmra.mrb[0].mxu1 %v401_v3  ;;  %773 = vperm.xlu0 %3710, %v667_v41   ;;  %v445_v3 = vld [vmem:[#allocation5 + $0x160] sm:$0xff]  ;;  %v464_v24 = vld [vmem:[#allocation5 + $0x1f8] sm:$0xff]  ;;  %v466_v29 = vld [vmem:[#allocation5 + $0x208] sm:$0xff] }
  0xa2   : > { %1111 = vmatprep.mubr.f32.mxu1 %v406_v5  ;;  %778 = vperm.xlu1 %3711, %v668_v42   ;;  %v450_v5 = vld [vmem:[#allocation5 + $0x188] sm:$0xff]  ;;  %v468_v30 = vld [vmem:[#allocation5 + $0x218] sm:$0xff] }
  0xa3   : > { %1555 = vmatmul.mubr.f32.vlgmr.msra.gmra.mrb[0].mxu0 %v403_v4  ;;  %v447_v4 = vld [vmem:[#allocation5 + $0x170] sm:$0xff]  ;;  %v470_v35 = vld [vmem:[#allocation5 + $0x228] sm:$0xff]  ;;  %v472_v36 = vld [vmem:[#allocation5 + $0x238] sm:$0xff] }
  0xa4   : > { %1560 = vmatprep.mubr.f32.mxu0 %v408_v6  ;;  %v452_v6 = vld [vmem:[#allocation5 + $0x198] sm:$0xff]  ;;  %v474_v41 = vld [vmem:[#allocation5 + $0x248] sm:$0xff] }
  0xa5   : > { %1112 = vmatmul.mubr.f32.gmra.mrb[2].mxu1 %v405_v7  ;;  %783 = vperm.xlu0 %3710, %v669_v47   ;;  %v677_v7 = vld [vmem:[%s6884_s2 + $0xa0] sm:$0xff]  ;;  %v476_v42 = vld [vmem:[#allocation5 + $0x258] sm:$0xff]  ;;  %v478_v47 = vld [vmem:[#allocation5 + $0x268] sm:$0xff] }
  0xa6   : > { %1117 = vmatprep.mubr.f32.mxu1 %v410_v9  ;;  %788 = vperm.xlu1 %3711, %v670_v48   ;;  %v449_v9 = vld [vmem:[#allocation5 + $0x180] sm:$0xff]  ;;  %v480_v48 = vld [vmem:[#allocation5 + $0x278] sm:$0xff] }
  0xa7   : > { %1561 = vmatmul.mubr.f32.gmra.mrb[2].mxu0 %v407_v8  ;;  %v678_v8 = vld [vmem:[%s6884_s2 + $0xa8] sm:$0xff] }
  0xa8   : > { %1566 = vmatprep.mubr.f32.mxu0 %v412_v10  ;;  %v451_v10 = vld [vmem:[#allocation5 + $0x190] sm:$0xff] }
  0xa9   : > { %1118 = vmatmul.mubr.f32.gmra.mrb[4].mxu1 %v409_v12  ;;  %793 = vperm.xlu0 %3710, %v671_v53   ;;  %v456_v12 = vld [vmem:[#allocation5 + $0x1b8] sm:$0xff]  ;;  %v482_v53 = vld [vmem:[#allocation5 + $0x288] sm:$0xff] }
  0xaa   : > { %1123 = vmatprep.mubr.f32.mxu1 %v414_v14  ;;  %798 = vperm.xlu1 %3711, %v672_v54   ;;  %v680_v14 = vld [vmem:[%s6884_s2 + $0xb8] sm:$0xff] }
  0xab   : > { %1567 = vmatmul.mubr.f32.gmra.mrb[4].mxu0 %v411_v13  ;;  %v679_v13 = vld [vmem:[%s6884_s2 + $0xb0] sm:$0xff]  ;;  %v484_v54 = vld [vmem:[#allocation5 + $0x298] sm:$0xff] }
  0xac   : > { %1572 = vmatprep.mubr.f32.mxu0 %v416_v16  ;;  %v455_v16 = vld [vmem:[#allocation5 + $0x1b0] sm:$0xff] }
  0xad   : > { %1124 = vmatmul.mubr.f32.gmra.mrb[6].mxu1 %v413_v19  ;;  %803 = vperm.xlu0 %3710, %v673_v59   ;;  %v681_v19 = vld [vmem:[%s6884_s2 + $0xc0] sm:$0xff]  ;;  %v486_v59 = vld [vmem:[#allocation5 + $0x2a8] sm:$0xff] }
  0xae   : > { %1129 = vmatprep.mubr.f32.mxu1 %v418_v21  ;;  %808 = vperm.xlu1 %3711, %v674_v60   ;;  %v457_v21 = vld [vmem:[#allocation5 + $0x1c0] sm:$0xff]  ;;  %v488_v60 = vld [vmem:[#allocation5 + $0x2b8] sm:$0xff] }
  0xaf   : > { %1573 = vmatmul.mubr.f32.gmra.mrb[6].mxu0 %v415_v20  ;;  %v682_v20 = vld [vmem:[%s6884_s2 + $0xc8] sm:$0xff] }
  0xb0   : > { %1578 = vmatprep.mubr.f32.mxu0 %v420_v22  ;;  %v459_v22 = vld [vmem:[#allocation5 + $0x1d0] sm:$0xff] }
  0xb1   : > { %1130 = vmatmul.mubr.f32.gmra.mrb[8].mxu1 %v417_v25  ;;  %813 = vperm.xlu0 %3710, %v675_v1   ;;  %v683_v25 = vld [vmem:[%s6884_s2 + $0xd0] sm:$0xff]  ;;  %v490_v1 = vld [vmem:[#allocation5 + $0x2c8] sm:$0xff] }
  0xb2   : > { %1135 = vmatprep.mubr.f32.mxu1 %v422_v27  ;;  %818 = vperm.xlu1 %3711, %v676_v2   ;;  %v461_v27 = vld [vmem:[#allocation5 + $0x1e0] sm:$0xff]  ;;  %v492_v2 = vld [vmem:[#allocation5 + $0x2d8] sm:$0xff] }
  0xb3   : > { %1579 = vmatmul.mubr.f32.gmra.mrb[8].mxu0 %v419_v26  ;;  %v684_v26 = vld [vmem:[%s6884_s2 + $0xd8] sm:$0xff] }
  0xb4   : > { %1584 = vmatprep.mubr.f32.mxu0 %v424_v28  ;;  %v463_v28 = vld [vmem:[#allocation5 + $0x1f0] sm:$0xff] }
  0xb5   : > { %1136 = vmatmul.mubr.f32.gmra.mrb[10].mxu1 %v421_v31  ;;  %823 = vperm.xlu0 %3710, %v677_v7   ;;  %v685_v31 = vld [vmem:[%s6884_s2 + $0xe0] sm:$0xff]  ;;  %v494_v7 = vld [vmem:[#allocation5 + $0x2e8] sm:$0xff] }
  0xb6   : > { %1141 = vmatprep.mubr.f32.mxu1 %v426_v33  ;;  %828 = vperm.xlu1 %3711, %v678_v8   ;;  %v465_v33 = vld [vmem:[#allocation5 + $0x200] sm:$0xff]  ;;  %v496_v8 = vld [vmem:[#allocation5 + $0x2f8] sm:$0xff] }
  0xb7   : > { %1585 = vmatmul.mubr.f32.gmra.mrb[10].mxu0 %v423_v32  ;;  %v686_v32 = vld [vmem:[%s6884_s2 + $0xe8] sm:$0xff] }
  0xb8   : > { %1590 = vmatprep.mubr.f32.mxu0 %v428_v34  ;;  %v467_v34 = vld [vmem:[#allocation5 + $0x210] sm:$0xff] }
  0xb9   : > { %1142 = vmatmul.mubr.f32.gmra.mrb[12].mxu1 %v425_v37  ;;  %833 = vperm.xlu0 %3710, %v679_v13   ;;  %v687_v37 = vld [vmem:[%s6884_s2 + $0xf0] sm:$0xff]  ;;  %v498_v13 = vld [vmem:[#allocation5 + $0x308] sm:$0xff] }
  0xba   : > { %1147 = vmatprep.mubr.f32.mxu1 %v430_v39  ;;  %838 = vperm.xlu1 %3711, %v680_v14   ;;  %v469_v39 = vld [vmem:[#allocation5 + $0x220] sm:$0xff]  ;;  %v500_v14 = vld [vmem:[#allocation5 + $0x318] sm:$0xff] }
  0xbb   : > { %1591 = vmatmul.mubr.f32.gmra.mrb[12].mxu0 %v427_v38  ;;  %v688_v38 = vld [vmem:[%s6884_s2 + $0xf8] sm:$0xff] }
  0xbc   : > { %1596 = vmatprep.mubr.f32.mxu0 %v432_v40  ;;  %v471_v40 = vld [vmem:[#allocation5 + $0x230] sm:$0xff] }
  0xbd   : > { %1148 = vmatmul.mubr.f32.gmra.mrb[14].mxu1 %v429_v43  ;;  %843 = vperm.xlu0 %3710, %v681_v19   ;;  %v689_v43 = vld [vmem:[%s6884_s2 + $0x100] sm:$0xff]  ;;  %v502_v19 = vld [vmem:[#allocation5 + $0x328] sm:$0xff] }
  0xbe   : > { %1153 = vmatprep.mubr.f32.mxu1 %v434_v45  ;;  %848 = vperm.xlu1 %3711, %v682_v20   ;;  %v473_v45 = vld [vmem:[#allocation5 + $0x240] sm:$0xff]  ;;  %v504_v20 = vld [vmem:[#allocation5 + $0x338] sm:$0xff] }
  0xbf   : > { %1597 = vmatmul.mubr.f32.gmra.mrb[14].mxu0 %v431_v44  ;;  %v690_v44 = vld [vmem:[%s6884_s2 + $0x108] sm:$0xff] }
  0xc0   : > { %1602 = vmatprep.mubr.f32.mxu0 %v436_v46  ;;  %v475_v46 = vld [vmem:[#allocation5 + $0x250] sm:$0xff] }
  0xc1   : > { %1154 = vmatmul.mubr.f32.gmra.mrb[16].mxu1 %v433_v49  ;;  %853 = vperm.xlu0 %3710, %v683_v25   ;;  %v691_v49 = vld [vmem:[%s6884_s2 + $0x110] sm:$0xff]  ;;  %v506_v25 = vld [vmem:[#allocation5 + $0x348] sm:$0xff] }
  0xc2   : > { %1159 = vmatprep.mubr.f32.mxu1 %v438_v51  ;;  %858 = vperm.xlu1 %3711, %v684_v26   ;;  %v477_v51 = vld [vmem:[#allocation5 + $0x260] sm:$0xff]  ;;  %v508_v26 = vld [vmem:[#allocation5 + $0x358] sm:$0xff] }
  0xc3   : > { %1603 = vmatmul.mubr.f32.gmra.mrb[16].mxu0 %v435_v50  ;;  %v692_v50 = vld [vmem:[%s6884_s2 + $0x118] sm:$0xff] }
  0xc4   : > { %1608 = vmatprep.mubr.f32.mxu0 %v440_v52  ;;  %v479_v52 = vld [vmem:[#allocation5 + $0x270] sm:$0xff] }
  0xc5   : > { %1160 = vmatmul.mubr.f32.gmra.mrb[18].mxu1 %v437_v55  ;;  %863 = vperm.xlu0 %3710, %v685_v31   ;;  %v693_v55 = vld [vmem:[%s6884_s2 + $0x120] sm:$0xff]  ;;  %v510_v31 = vld [vmem:[#allocation5 + $0x368] sm:$0xff] }
  0xc6   : > { %1165 = vmatprep.mubr.f32.mxu1 %v442_v57  ;;  %868 = vperm.xlu1 %3711, %v686_v32   ;;  %v481_v57 = vld [vmem:[#allocation5 + $0x280] sm:$0xff]  ;;  %v512_v32 = vld [vmem:[#allocation5 + $0x378] sm:$0xff] }
  0xc7   : > { %1609 = vmatmul.mubr.f32.gmra.mrb[18].mxu0 %v439_v56  ;;  %v694_v56 = vld [vmem:[%s6884_s2 + $0x128] sm:$0xff] }
  0xc8   : > { %1614 = vmatprep.mubr.f32.mxu0 %v444_v58  ;;  %v483_v58 = vld [vmem:[#allocation5 + $0x290] sm:$0xff] }
  0xc9   : > { %1166 = vmatmul.mubr.f32.gmra.mrb[20].mxu1 %v441_v61  ;;  %873 = vperm.xlu0 %3710, %v687_v37   ;;  %v695_v61 = vld [vmem:[%s6884_s2 + $0x130] sm:$0xff]  ;;  %v514_v37 = vld [vmem:[#allocation5 + $0x388] sm:$0xff] }
  0xca   : > { %1171 = vmatprep.mubr.f32.mxu1 %v446_v63  ;;  %878 = vperm.xlu1 %3711, %v688_v38   ;;  %v485_v63 = vld [vmem:[#allocation5 + $0x2a0] sm:$0xff]  ;;  %v516_v38 = vld [vmem:[#allocation5 + $0x398] sm:$0xff] }
  0xcb   : > { %1615 = vmatmul.mubr.f32.gmra.mrb[20].mxu0 %v443_v62  ;;  %v696_v62 = vld [vmem:[%s6884_s2 + $0x138] sm:$0xff] }
  0xcc   : > { %1620 = vmatprep.mubr.f32.mxu0 %v448_v0  ;;  %v487_v0 = vld [vmem:[#allocation5 + $0x2b0] sm:$0xff] }
  0xcd   : > { %1172 = vmatmul.mubr.f32.gmra.mrb[22].mxu1 %v445_v3  ;;  %883 = vperm.xlu0 %3710, %v689_v43   ;;  %v697_v3 = vld [vmem:[%s6884_s2 + $0x140] sm:$0xff]  ;;  %v518_v43 = vld [vmem:[#allocation5 + $0x3a8] sm:$0xff] }
  0xce   : > { %1177 = vmatprep.mubr.f32.mxu1 %v450_v5  ;;  %888 = vperm.xlu1 %3711, %v690_v44   ;;  %v489_v5 = vld [vmem:[#allocation5 + $0x2c0] sm:$0xff]  ;;  %v520_v44 = vld [vmem:[#allocation5 + $0x3b8] sm:$0xff] }
  0xcf   : > { %1621 = vmatmul.mubr.f32.gmra.mrb[22].mxu0 %v447_v4  ;;  %v698_v4 = vld [vmem:[%s6884_s2 + $0x148] sm:$0xff] }
  0xd0   : > { %1626 = vmatprep.mubr.f32.mxu0 %v452_v6  ;;  %v491_v6 = vld [vmem:[#allocation5 + $0x2d0] sm:$0xff] }
  0xd1   : > { %1178 = vmatmul.mubr.f32.gmra.mrb[24].mxu1 %v449_v9  ;;  %893 = vperm.xlu0 %3710, %v691_v49   ;;  %v699_v9 = vld [vmem:[%s6884_s2 + $0x150] sm:$0xff]  ;;  %v522_v49 = vld [vmem:[#allocation5 + $0x3c8] sm:$0xff] }
  0xd2   : > { %1183 = vmatprep.mubr.f32.mxu1 %v454_v11  ;;  %898 = vperm.xlu1 %3711, %v692_v50   ;;  %v493_v11 = vld [vmem:[#allocation5 + $0x2e0] sm:$0xff]  ;;  %v524_v50 = vld [vmem:[#allocation5 + $0x3d8] sm:$0xff] }
  0xd3   : > { %1627 = vmatmul.mubr.f32.gmra.mrb[24].mxu0 %v451_v10  ;;  %v700_v10 = vld [vmem:[%s6884_s2 + $0x158] sm:$0xff] }
  0xd4   : > { %1632 = vmatprep.mubr.f32.mxu0 %v456_v12  ;;  %v495_v12 = vld [vmem:[#allocation5 + $0x2f0] sm:$0xff] }
  0xd5   : > { %1184 = vmatmul.mubr.f32.gmra.mrb[26].mxu1 %v453_v15  ;;  %903 = vperm.xlu0 %3710, %v693_v55   ;;  %v701_v15 = vld [vmem:[%s6884_s2 + $0x160] sm:$0xff]  ;;  %v526_v55 = vld [vmem:[#allocation5 + $0x3e8] sm:$0xff] }
  0xd6   : > { %1189 = vmatprep.mubr.f32.mxu1 %v458_v17  ;;  %908 = vperm.xlu1 %3711, %v694_v56   ;;  %v497_v17 = vld [vmem:[#allocation5 + $0x300] sm:$0xff]  ;;  %v528_v56 = vld [vmem:[#allocation5 + $0x3f8] sm:$0xff] }
  0xd7   : > { %1633 = vmatmul.mubr.f32.gmra.mrb[26].mxu0 %v455_v16  ;;  %v702_v16 = vld [vmem:[%s6884_s2 + $0x168] sm:$0xff] }
  0xd8   : > { %1638 = vmatprep.mubr.f32.mxu0 %v460_v18  ;;  %v499_v18 = vld [vmem:[#allocation5 + $0x310] sm:$0xff] }
  0xd9   : > { %1190 = vmatmul.mubr.f32.gmra.mrb[28].mxu1 %v457_v21  ;;  %913 = vperm.xlu0 %3710, %v695_v61   ;;  %v703_v21 = vld [vmem:[%s6884_s2 + $0x170] sm:$0xff]  ;;  %v530_v61 = vld [vmem:[#allocation5 + $0x408] sm:$0xff] }
  0xda   : > { %1195 = vmatprep.mubr.f32.mxu1 %v462_v23  ;;  %918 = vperm.xlu1 %3711, %v696_v62   ;;  %v501_v23 = vld [vmem:[#allocation5 + $0x320] sm:$0xff]  ;;  %v532_v62 = vld [vmem:[#allocation5 + $0x418] sm:$0xff] }
  0xdb   : > { %1639 = vmatmul.mubr.f32.gmra.mrb[28].mxu0 %v459_v22  ;;  %v704_v22 = vld [vmem:[%s6884_s2 + $0x178] sm:$0xff] }
  0xdc   : > { %1644 = vmatprep.mubr.f32.mxu0 %v464_v24  ;;  %v503_v24 = vld [vmem:[#allocation5 + $0x330] sm:$0xff] }
  0xdd   : > { %1196 = vmatmul.mubr.f32.gmra.mrb[30].mxu1 %v461_v27  ;;  %923 = vperm.xlu0 %3710, %v697_v3   ;;  %v705_v27 = vld [vmem:[%s6884_s2 + $0x180] sm:$0xff]  ;;  %v534_v3 = vld [vmem:[#allocation5 + $0x428] sm:$0xff] }
  0xde   : > { %1201 = vmatprep.mubr.f32.mxu1 %v466_v29  ;;  %928 = vperm.xlu1 %3711, %v698_v4   ;;  %v505_v29 = vld [vmem:[#allocation5 + $0x340] sm:$0xff]  ;;  %v536_v4 = vld [vmem:[#allocation5 + $0x438] sm:$0xff] }
  0xdf   : > { %1645 = vmatmul.mubr.f32.gmra.mrb[30].mxu0 %v463_v28  ;;  %v706_v28 = vld [vmem:[%s6884_s2 + $0x188] sm:$0xff] }
  0xe0   : > { %1650 = vmatprep.mubr.f32.mxu0 %v468_v30  ;;  %v507_v30 = vld [vmem:[#allocation5 + $0x350] sm:$0xff] }
  0xe1   : > { %1202 = vmatmul.mubr.f32.gmra.mrb[32].mxu1 %v465_v33  ;;  %933 = vperm.xlu0 %3710, %v699_v9   ;;  %v707_v33 = vld [vmem:[%s6884_s2 + $0x190] sm:$0xff]  ;;  %v538_v9 = vld [vmem:[#allocation5 + $0x448] sm:$0xff] }
  0xe2   : > { %1207 = vmatprep.mubr.f32.mxu1 %v470_v35  ;;  %938 = vperm.xlu1 %3711, %v700_v10   ;;  %v509_v35 = vld [vmem:[#allocation5 + $0x360] sm:$0xff]  ;;  %v540_v10 = vld [vmem:[#allocation5 + $0x458] sm:$0xff] }
  0xe3   : > { %1651 = vmatmul.mubr.f32.gmra.mrb[32].mxu0 %v467_v34  ;;  %v708_v34 = vld [vmem:[%s6884_s2 + $0x198] sm:$0xff] }
  0xe4   : > { %1656 = vmatprep.mubr.f32.mxu0 %v472_v36  ;;  %v511_v36 = vld [vmem:[#allocation5 + $0x370] sm:$0xff] }
  0xe5   : > { %1208 = vmatmul.mubr.f32.gmra.mrb[34].mxu1 %v469_v39  ;;  %943 = vperm.xlu0 %3710, %v701_v15   ;;  %v709_v39 = vld [vmem:[%s6884_s2 + $0x1a0] sm:$0xff] }
  0xe6   : > { %1213 = vmatprep.mubr.f32.mxu1 %v474_v41  ;;  %948 = vperm.xlu1 %3711, %v702_v16   ;;  %v513_v41 = vld [vmem:[#allocation5 + $0x380] sm:$0xff]  ;;  %v543_v16 = vld [vmem:[#allocation5 + $0x470] sm:$0xff] }
  0xe7   : > { %1657 = vmatmul.mubr.f32.gmra.mrb[34].mxu0 %v471_v40  ;;  %v710_v40 = vld [vmem:[%s6884_s2 + $0x1a8] sm:$0xff]  ;;  %v541_v15 = vld [vmem:[#allocation5 + $0x460] sm:$0xff] }
  0xe8   : > { %1662 = vmatprep.mubr.f32.mxu0 %v476_v42  ;;  %v515_v42 = vld [vmem:[#allocation5 + $0x390] sm:$0xff] }
  0xe9   : > { %1214 = vmatmul.mubr.f32.gmra.mrb[36].mxu1 %v473_v45  ;;  %953 = vperm.xlu0 %3710, %v703_v21   ;;  %v711_v45 = vld [vmem:[%s6884_s2 + $0x1b0] sm:$0xff]  ;;  %v550_v21 = vld [vmem:[#allocation5 + $0x4a8] sm:$0xff] }
  0xea   : > { %1219 = vmatprep.mubr.f32.mxu1 %v478_v47  ;;  %958 = vperm.xlu1 %3711, %v704_v22   ;;  %v517_v47 = vld [vmem:[#allocation5 + $0x3a0] sm:$0xff]  ;;  %v552_v22 = vld [vmem:[#allocation5 + $0x4b8] sm:$0xff] }
  0xeb   : > { %1663 = vmatmul.mubr.f32.gmra.mrb[36].mxu0 %v475_v46  ;;  %v712_v46 = vld [vmem:[%s6884_s2 + $0x1b8] sm:$0xff] }
  0xec   : > { %1668 = vmatprep.mubr.f32.mxu0 %v480_v48  ;;  %v519_v48 = vld [vmem:[#allocation5 + $0x3b0] sm:$0xff] }
  0xed   : > { %1220 = vmatmul.mubr.f32.gmra.mrb[38].mxu1 %v477_v51  ;;  %963 = vperm.xlu0 %3710, %v705_v27   ;;  %v713_v51 = vld [vmem:[%s6884_s2 + $0x1c0] sm:$0xff] }
  0xee   : > { %1225 = vmatprep.mubr.f32.mxu1 %v482_v53  ;;  %968 = vperm.xlu1 %3711, %v706_v28   ;;  %v521_v53 = vld [vmem:[#allocation5 + $0x3c0] sm:$0xff]  ;;  %v555_v28 = vld [vmem:[#allocation5 + $0x4d0] sm:$0xff] }
  0xef   : > { %1669 = vmatmul.mubr.f32.gmra.mrb[38].mxu0 %v479_v52  ;;  %v714_v52 = vld [vmem:[%s6884_s2 + $0x1c8] sm:$0xff]  ;;  %v553_v27 = vld [vmem:[#allocation5 + $0x4c0] sm:$0xff] }
  0xf0   : > { %1674 = vmatprep.mubr.f32.mxu0 %v484_v54  ;;  %v523_v54 = vld [vmem:[#allocation5 + $0x3d0] sm:$0xff] }
  0xf1   : > { %1226 = vmatmul.mubr.f32.gmra.mrb[40].mxu1 %v481_v57  ;;  %973 = vperm.xlu0 %3710, %v707_v33   ;;  %v715_v57 = vld [vmem:[%s6884_s2 + $0x1d0] sm:$0xff]  ;;  %v562_v33 = vld [vmem:[#allocation5 + $0x508] sm:$0xff] }
  0xf2   : > { %1231 = vmatprep.mubr.f32.mxu1 %v486_v59  ;;  %978 = vperm.xlu1 %3711, %v708_v34   ;;  %v525_v59 = vld [vmem:[#allocation5 + $0x3e0] sm:$0xff]  ;;  %v564_v34 = vld [vmem:[#allocation5 + $0x518] sm:$0xff] }
  0xf3   : > { %1675 = vmatmul.mubr.f32.gmra.mrb[40].mxu0 %v483_v58  ;;  %v716_v58 = vld [vmem:[%s6884_s2 + $0x1d8] sm:$0xff] }
  0xf4   : > { %1680 = vmatprep.mubr.f32.mxu0 %v488_v60  ;;  %v527_v60 = vld [vmem:[#allocation5 + $0x3f0] sm:$0xff] }
  0xf5   : > { %1232 = vmatmul.mubr.f32.gmra.mrb[42].mxu1 %v485_v63  ;;  %983 = vperm.xlu0 %3710, %v709_v39   ;;  %v717_v63 = vld [vmem:[%s6884_s2 + $0x1e0] sm:$0xff] }
  0xf6   : > { %1237 = vmatprep.mubr.f32.mxu1 %v490_v1  ;;  %988 = vperm.xlu1 %3711, %v710_v40   ;;  %v529_v1 = vld [vmem:[#allocation5 + $0x400] sm:$0xff]  ;;  %v567_v40 = vld [vmem:[#allocation5 + $0x530] sm:$0xff] }
  0xf7   : > { %1681 = vmatmul.mubr.f32.gmra.mrb[42].mxu0 %v487_v0  ;;  %v718_v0 = vld [vmem:[%s6884_s2 + $0x1e8] sm:$0xff]  ;;  %v565_v39 = vld [vmem:[#allocation5 + $0x520] sm:$0xff] }
  0xf8   : > { %1686 = vmatprep.mubr.f32.mxu0 %v492_v2  ;;  %v531_v2 = vld [vmem:[#allocation5 + $0x410] sm:$0xff] }
  0xf9   : > { %1238 = vmatmul.mubr.f32.gmra.mrb[44].mxu1 %v489_v5  ;;  %993 = vperm.xlu0 %3710, %v711_v45   ;;  %v719_v5 = vld [vmem:[%s6884_s2 + $0x1f0] sm:$0xff]  ;;  %v574_v45 = vld [vmem:[#allocation5 + $0x568] sm:$0xff] }
  0xfa   : > { %1243 = vmatprep.mubr.f32.mxu1 %v494_v7  ;;  %998 = vperm.xlu1 %3711, %v712_v46   ;;  %v533_v7 = vld [vmem:[#allocation5 + $0x420] sm:$0xff]  ;;  %v576_v46 = vld [vmem:[#allocation5 + $0x578] sm:$0xff] }
  0xfb   : > { %1687 = vmatmul.mubr.f32.gmra.mrb[44].mxu0 %v491_v6  ;;  %v720_v6 = vld [vmem:[%s6884_s2 + $0x1f8] sm:$0xff] }
  0xfc   : > { %1692 = vmatprep.mubr.f32.mxu0 %v496_v8  ;;  %v535_v8 = vld [vmem:[#allocation5 + $0x430] sm:$0xff] }
  0xfd   : > { %1244 = vmatmul.mubr.f32.gmra.mrb[46].mxu1 %v493_v11  ;;  %1003 = vperm.xlu0 %3710, %v713_v51   ;;  %v537_v11 = vld [vmem:[#allocation5 + $0x440] sm:$0xff] }
  0xfe   : > { %1249 = vmatprep.mubr.f32.mxu1 %v498_v13  ;;  %1008 = vperm.xlu1 %3711, %v714_v52   ;;  %v542_v13 = vld [vmem:[#allocation5 + $0x468] sm:$0xff]  ;;  %v577_v51 = vld [vmem:[#allocation5 + $0x580] sm:$0xff]  ;;  %v579_v52 = vld [vmem:[#allocation5 + $0x590] sm:$0xff] }
  0xff   : > { %1693 = vmatmul.mubr.f32.gmra.mrb[46].mxu0 %v495_v12  ;;  %v539_v12 = vld [vmem:[#allocation5 + $0x450] sm:$0xff] }
 0x100   : > { %1698 = vmatprep.mubr.f32.mxu0 %v500_v14  ;;  %v544_v14 = vld [vmem:[#allocation5 + $0x478] sm:$0xff] }
 0x101   : > { %1250 = vmatmul.mubr.f32.gmra.mrb[48].mxu1 %v497_v17  ;;  %1013 = vperm.xlu0 %3710, %v715_v57   ;;  %v546_v17 = vld [vmem:[#allocation5 + $0x488] sm:$0xff] }
 0x102   : > { %1255 = vmatprep.mubr.f32.mxu1 %v502_v19  ;;  %1018 = vperm.xlu1 %3711, %v716_v58   ;;  %v545_v19 = vld [vmem:[#allocation5 + $0x480] sm:$0xff]  ;;  %v586_v57 = vld [vmem:[#allocation5 + $0x5c8] sm:$0xff]  ;;  %v588_v58 = vld [vmem:[#allocation5 + $0x5d8] sm:$0xff] }
 0x103   : > { %1699 = vmatmul.mubr.f32.gmra.mrb[48].mxu0 %v499_v18  ;;  %v548_v18 = vld [vmem:[#allocation5 + $0x498] sm:$0xff] }
 0x104   : > { %1704 = vmatprep.mubr.f32.mxu0 %v504_v20  ;;  %v547_v20 = vld [vmem:[#allocation5 + $0x490] sm:$0xff] }
 0x105   : > { %1256 = vmatmul.mubr.f32.gmra.mrb[50].mxu1 %v501_v23  ;;  %1023 = vperm.xlu0 %3710, %v717_v63   ;;  %v549_v23 = vld [vmem:[#allocation5 + $0x4a0] sm:$0xff] }
 0x106   : > { %1261 = vmatprep.mubr.f32.mxu1 %v506_v25  ;;  %1028 = vperm.xlu1 %3711, %v718_v0   ;;  %v554_v25 = vld [vmem:[#allocation5 + $0x4c8] sm:$0xff]  ;;  %v589_v63 = vld [vmem:[#allocation5 + $0x5e0] sm:$0xff]  ;;  %v591_v0 = vld [vmem:[#allocation5 + $0x5f0] sm:$0xff] }
 0x107   : > { %1705 = vmatmul.mubr.f32.gmra.mrb[50].mxu0 %v503_v24  ;;  %v551_v24 = vld [vmem:[#allocation5 + $0x4b0] sm:$0xff] }
 0x108   : > { %1710 = vmatprep.mubr.f32.mxu0 %v508_v26  ;;  %v556_v26 = vld [vmem:[#allocation5 + $0x4d8] sm:$0xff] }
 0x109   : > { %1262 = vmatmul.mubr.f32.gmra.mrb[52].mxu1 %v505_v29  ;;  %1033 = vperm.xlu0 %3710, %v719_v5   ;;  %v558_v29 = vld [vmem:[#allocation5 + $0x4e8] sm:$0xff] }
 0x10a   : > { %1267 = vmatprep.mubr.f32.mxu1 %v510_v31  ;;  %1038 = vperm.xlu1 %3711, %v720_v6   ;;  %v557_v31 = vld [vmem:[#allocation5 + $0x4e0] sm:$0xff]  ;;  %v598_v5 = vld [vmem:[#allocation5 + $0x628] sm:$0xff]  ;;  %v600_v6 = vld [vmem:[#allocation5 + $0x638] sm:$0xff] }
 0x10b   : > { %1711 = vmatmul.mubr.f32.gmra.mrb[52].mxu0 %v507_v30  ;;  %v560_v30 = vld [vmem:[#allocation5 + $0x4f8] sm:$0xff] }
 0x10c   : > { %1716 = vmatprep.mubr.f32.mxu0 %v512_v32  ;;  %v559_v32 = vld [vmem:[#allocation5 + $0x4f0] sm:$0xff] }
 0x10d   : > { %1268 = vmatmul.mubr.f32.gmra.mrb[54].mxu1 %v509_v35  ;;  %v561_v35 = vld [vmem:[#allocation5 + $0x500] sm:$0xff] }
 0x10e   : > { %1273 = vmatprep.mubr.f32.mxu1 %v514_v37  ;;  %v566_v37 = vld [vmem:[#allocation5 + $0x528] sm:$0xff] }
 0x10f   : > { %1717 = vmatmul.mubr.f32.gmra.mrb[54].mxu0 %v511_v36  ;;  %v563_v36 = vld [vmem:[#allocation5 + $0x510] sm:$0xff] }
 0x110   : > { %1722 = vmatprep.mubr.f32.mxu0 %v516_v38  ;;  %v568_v38 = vld [vmem:[#allocation5 + $0x538] sm:$0xff] }
 0x111   : > { %1274 = vmatmul.mubr.f32.gmra.mrb[56].mxu1 %v513_v41  ;;  %v570_v41 = vld [vmem:[#allocation5 + $0x548] sm:$0xff] }
 0x112   : > { %1279 = vmatprep.mubr.f32.mxu1 %v518_v43  ;;  %v569_v43 = vld [vmem:[#allocation5 + $0x540] sm:$0xff] }
 0x113   : > { %1723 = vmatmul.mubr.f32.gmra.mrb[56].mxu0 %v515_v42  ;;  %v572_v42 = vld [vmem:[#allocation5 + $0x558] sm:$0xff] }
 0x114   : > { %1728 = vmatprep.mubr.f32.mxu0 %v520_v44  ;;  %v571_v44 = vld [vmem:[#allocation5 + $0x550] sm:$0xff] }
 0x115   : > { %1280 = vmatmul.mubr.f32.gmra.mrb[58].mxu1 %v517_v47  ;;  %v573_v47 = vld [vmem:[#allocation5 + $0x560] sm:$0xff] }
 0x116   : > { %1285 = vmatprep.mubr.f32.mxu1 %v522_v49  ;;  %v578_v49 = vld [vmem:[#allocation5 + $0x588] sm:$0xff] }
 0x117   : > { %1729 = vmatmul.mubr.f32.gmra.mrb[58].mxu0 %v519_v48  ;;  %v575_v48 = vld [vmem:[#allocation5 + $0x570] sm:$0xff] }
 0x118   : > { %1734 = vmatprep.mubr.f32.mxu0 %v524_v50  ;;  %v580_v50 = vld [vmem:[#allocation5 + $0x598] sm:$0xff] }
 0x119   : > { %1286 = vmatmul.mubr.f32.gmra.mrb[60].mxu1 %v521_v53  ;;  %v582_v53 = vld [vmem:[#allocation5 + $0x5a8] sm:$0xff] }
 0x11a   : > { %1291 = vmatprep.mubr.f32.mxu1 %v526_v55  ;;  %v581_v55 = vld [vmem:[#allocation5 + $0x5a0] sm:$0xff] }
 0x11b   : > { %1735 = vmatmul.mubr.f32.gmra.mrb[60].mxu0 %v523_v54  ;;  %v584_v54 = vld [vmem:[#allocation5 + $0x5b8] sm:$0xff] }
 0x11c   : > { %1740 = vmatprep.mubr.f32.mxu0 %v528_v56  ;;  %v583_v56 = vld [vmem:[#allocation5 + $0x5b0] sm:$0xff] }
 0x11d   : > { %1292 = vmatmul.mubr.f32.gmra.mrb[62].mxu1 %v525_v59  ;;  %v585_v59 = vld [vmem:[#allocation5 + $0x5c0] sm:$0xff] }
 0x11e   : > { %1297 = vmatprep.mubr.f32.mxu1 %v530_v61  ;;  %v590_v61 = vld [vmem:[#allocation5 + $0x5e8] sm:$0xff] }
 0x11f   : > { %1741 = vmatmul.mubr.f32.gmra.mrb[62].mxu0 %v527_v60  ;;  %v587_v60 = vld [vmem:[#allocation5 + $0x5d0] sm:$0xff] }
 0x120   : > { %1746 = vmatprep.mubr.f32.mxu0 %v532_v62  ;;  %v592_v62 = vld [vmem:[#allocation5 + $0x5f8] sm:$0xff] }
 0x121   : > { %1298 = vmatmul.mubr.f32.gmra.mrb[64].mxu1 %v529_v1  ;;  %v594_v1 = vld [vmem:[#allocation5 + $0x608] sm:$0xff] }
 0x122   : > { %1303 = vmatprep.mubr.f32.mxu1 %v534_v3  ;;  %v593_v3 = vld [vmem:[#allocation5 + $0x600] sm:$0xff] }
 0x123   : > { %1747 = vmatmul.mubr.f32.gmra.mrb[64].mxu0 %v531_v2  ;;  %v596_v2 = vld [vmem:[#allocation5 + $0x618] sm:$0xff] }
 0x124   : > { %1752 = vmatprep.mubr.f32.mxu0 %v536_v4  ;;  %v595_v4 = vld [vmem:[#allocation5 + $0x610] sm:$0xff] }
 0x125   : > { %1304 = vmatmul.mubr.f32.gmra.mrb[66].mxu1 %v533_v7  ;;  %v597_v7 = vld [vmem:[#allocation5 + $0x620] sm:$0xff] }
 0x126   : > { %1309 = vmatprep.mubr.f32.mxu1 %v538_v9  ;;  %v602_v9 = vld [vmem:[#allocation5 + $0x648] sm:$0xff] }
 0x127   : > { %1753 = vmatmul.mubr.f32.gmra.mrb[66].mxu0 %v535_v8  ;;  %v599_v8 = vld [vmem:[#allocation5 + $0x630] sm:$0xff] }
 0x128   : > { %1758 = vmatprep.mubr.f32.mxu0 %v540_v10  ;;  %v604_v10 = vld [vmem:[#allocation5 + $0x658] sm:$0xff] }
 0x129   : > { %1310 = vmatmul.mubr.f32.gmra.mrb[68].mxu1 %v537_v11  ;;  %v601_v11 = vld [vmem:[#allocation5 + $0x640] sm:$0xff] }
 0x12a   : > { %1315 = vmatprep.mubr.f32.mxu1 %v542_v13  ;;  %v606_v13 = vld [vmem:[#allocation5 + $0x668] sm:$0xff] }
 0x12b   : > { %1759 = vmatmul.mubr.f32.gmra.mrb[68].mxu0 %v539_v12  ;;  %v603_v12 = vld [vmem:[#allocation5 + $0x650] sm:$0xff] }
 0x12c   : > { %1764 = vmatprep.mubr.f32.mxu0 %v544_v14  ;;  %v608_v14 = vld [vmem:[#allocation5 + $0x678] sm:$0xff] }
 0x12d   : > { %1316 = vmatmul.mubr.f32.gmra.mrb[70].mxu1 %v541_v15  ;;  %v605_v15 = vld [vmem:[#allocation5 + $0x660] sm:$0xff] }
 0x12e   : > { %1321 = vmatprep.mubr.f32.mxu1 %v546_v17  ;;  %v610_v17 = vld [vmem:[#allocation5 + $0x688] sm:$0xff] }
 0x12f   : > { %1765 = vmatmul.mubr.f32.gmra.mrb[70].mxu0 %v543_v16  ;;  %v607_v16 = vld [vmem:[#allocation5 + $0x670] sm:$0xff] }
 0x130   : > { %1770 = vmatprep.mubr.f32.mxu0 %v548_v18  ;;  %v612_v18 = vld [vmem:[#allocation5 + $0x698] sm:$0xff] }
 0x131   : > { %1322 = vmatmul.mubr.f32.gmra.mrb[72].mxu1 %v545_v19  ;;  %v609_v19 = vld [vmem:[#allocation5 + $0x680] sm:$0xff] }
 0x132   : > { %1327 = vmatprep.mubr.f32.mxu1 %v550_v21  ;;  %v614_v21 = vld [vmem:[#allocation5 + $0x6a8] sm:$0xff] }
 0x133   : > { %1771 = vmatmul.mubr.f32.gmra.mrb[72].mxu0 %v547_v20  ;;  %v611_v20 = vld [vmem:[#allocation5 + $0x690] sm:$0xff] }
 0x134   : > { %1776 = vmatprep.mubr.f32.mxu0 %v552_v22  ;;  %v724_v22 = vpop.permute.xlu0 %723 }
 0x135   : > { %1328 = vmatmul.mubr.f32.gmra.mrb[74].mxu1 %v549_v23  ;;  %v616_v23 = vld [vmem:[#allocation5 + $0x6b8] sm:$0xff] }
 0x136   : > { %1333 = vmatprep.mubr.f32.mxu1 %v554_v25  ;;  %v615_v25 = vld [vmem:[#allocation5 + $0x6b0] sm:$0xff] }
 0x137   : > { %1777 = vmatmul.mubr.f32.gmra.mrb[74].mxu0 %v551_v24  ;;  %v613_v24 = vld [vmem:[#allocation5 + $0x6a0] sm:$0xff] }
 0x138   : > { %1782 = vmatprep.mubr.f32.mxu0 %v556_v26  ;;  %v618_v26 = vld [vmem:[#allocation5 + $0x6c8] sm:$0xff] }
 0x139   : > { %1334 = vmatmul.mubr.f32.gmra.mrb[76].mxu1 %v553_v27 }
 0x13a   : > { %1339 = vmatprep.mubr.f32.mxu1 %v558_v29 }
 0x13b   : > { %1783 = vmatmul.mubr.f32.gmra.mrb[76].mxu0 %v555_v28  ;;  %v620_v28 = vld [vmem:[#allocation5 + $0x6d8] sm:$0xff] }
 0x13c   : > { %1788 = vmatprep.mubr.f32.mxu0 %v560_v30 }
 0x13d   : > { %1340 = vmatmul.mubr.f32.gmra.mrb[78].mxu1 %v557_v31 }
 0x13e   : > { %1345 = vmatprep.mubr.f32.mxu1 %v562_v33 }
 0x13f   : > { %1789 = vmatmul.mubr.f32.gmra.mrb[78].mxu0 %v559_v32 }
 0x140   : > { %1794 = vmatprep.mubr.f32.mxu0 %v564_v34  ;;  %v729_v34 = vpop.permute.xlu0 %728 }
 0x141   : > { %1346 = vmatmul.mubr.f32.gmra.mrb[80].mxu1 %v561_v35  ;;  %v617_v35 = vld [vmem:[#allocation5 + $0x6c0] sm:$0xff] }
 0x142   : > { %1351 = vmatprep.mubr.f32.mxu1 %v566_v37  ;;  %v619_v37 = vld [vmem:[#allocation5 + $0x6d0] sm:$0xff] }
 0x143   : > { %1795 = vmatmul.mubr.f32.gmra.mrb[80].mxu0 %v563_v36 }
 0x144   : > { %1800 = vmatprep.mubr.f32.mxu0 %v568_v38  ;;  %v622_v38 = vld [vmem:[#allocation5 + $0x6e8] sm:$0xff] }
 0x145   : > { %1352 = vmatmul.mubr.f32.gmra.mrb[82].mxu1 %v565_v39 }
 0x146   : > { %1357 = vmatprep.mubr.f32.mxu1 %v570_v41  ;;  %v624_v41 = vld [vmem:[#allocation5 + $0x6f8] sm:$0xff] }
 0x147   : > { %1801 = vmatmul.mubr.f32.gmra.mrb[82].mxu0 %v567_v40 }
 0x148   : > { %1806 = vmatprep.mubr.f32.mxu0 %v572_v42 }
 0x149   : > { %1358 = vmatmul.mubr.f32.gmra.mrb[84].mxu1 %v569_v43 }
 0x14a   : > { %1363 = vmatprep.mubr.f32.mxu1 %v574_v45  ;;  %v734_v45 = vpop.permute.xlu1 %733 }
 0x14b   : > { %1807 = vmatmul.mubr.f32.gmra.mrb[84].mxu0 %v571_v44 }
 0x14c   : > { %1812 = vmatprep.mubr.f32.mxu0 %v576_v46 }
 0x14d   : > { %1364 = vmatmul.mubr.f32.gmra.mrb[86].mxu1 %v573_v47 }
 0x14e   : > { %1369 = vmatprep.mubr.f32.mxu1 %v578_v49 }
 0x14f   : > { %1813 = vmatmul.mubr.f32.gmra.mrb[86].mxu0 %v575_v48  ;;  %v621_v48 = vld [vmem:[#allocation5 + $0x6e0] sm:$0xff] }
 0x150   : > { %1818 = vmatprep.mubr.f32.mxu0 %v580_v50  ;;  %v623_v50 = vld [vmem:[#allocation5 + $0x6f0] sm:$0xff] }
 0x151   : > { %1370 = vmatmul.mubr.f32.gmra.mrb[88].mxu1 %v577_v51  ;;  %v626_v51 = vld [vmem:[#allocation5 + $0x708] sm:$0xff] }
 0x152   : > { %1375 = vmatprep.mubr.f32.mxu1 %v582_v53 }
 0x153   : > { %1819 = vmatmul.mubr.f32.gmra.mrb[88].mxu0 %v579_v52 }
 0x154   : > { %1824 = vmatprep.mubr.f32.mxu0 %v584_v54  ;;  %v628_v54 = vld [vmem:[#allocation5 + $0x718] sm:$0xff] }
 0x155   : > { %1376 = vmatmul.mubr.f32.gmra.mrb[90].mxu1 %v581_v55 }
 0x156   : > { %1381 = vmatprep.mubr.f32.mxu1 %v586_v57 }
 0x157   : > { %1825 = vmatmul.mubr.f32.gmra.mrb[90].mxu0 %v583_v56 }
 0x158   : > { %1830 = vmatprep.mubr.f32.mxu0 %v588_v58 }
 0x159   : > { %1382 = vmatmul.mubr.f32.gmra.mrb[92].mxu1 %v585_v59 }
 0x15a   : > { %1387 = vmatprep.mubr.f32.mxu1 %v590_v61 }
 0x15b   : > { %1831 = vmatmul.mubr.f32.gmra.mrb[92].mxu0 %v587_v60  ;;  %v625_v60 = vld [vmem:[#allocation5 + $0x700] sm:$0xff] }
 0x15c   : > { %1836 = vmatprep.mubr.f32.mxu0 %v592_v62  ;;  %v627_v62 = vld [vmem:[#allocation5 + $0x710] sm:$0xff] }
 0x15d   : > { %1388 = vmatmul.mubr.f32.gmra.mrb[94].mxu1 %v589_v63  ;;  %v630_v63 = vld [vmem:[#allocation5 + $0x728] sm:$0xff] }
 0x15e   : > { %1393 = vmatprep.mubr.f32.mxu1 %v594_v1 }
 0x15f   : > { %1837 = vmatmul.mubr.f32.gmra.mrb[94].mxu0 %v591_v0  ;;  %v739_v0 = vpop.permute.xlu1 %738 }
 0x160   : > { %1842 = vmatprep.mubr.f32.mxu0 %v596_v2 }
 0x161   : > { %1394 = vmatmul.mubr.f32.gmra.mrb[96].mxu1 %v593_v3  ;;  %v632_v3 = vld [vmem:[#allocation5 + $0x738] sm:$0xff] }
 0x162   : > { %1399 = vmatprep.mubr.f32.mxu1 %v598_v5 }
 0x163   : > { %1843 = vmatmul.mubr.f32.gmra.mrb[96].mxu0 %v595_v4 }
 0x164   : > { %1848 = vmatprep.mubr.f32.mxu0 %v600_v6 }
 0x165   : > { %1400 = vmatmul.mubr.f32.gmra.mrb[98].mxu1 %v597_v7 }
 0x166   : > { %1405 = vmatprep.mubr.f32.mxu1 %v602_v9  ;;  %v629_v9 = vld [vmem:[#allocation5 + $0x720] sm:$0xff] }
 0x167   : > { %1849 = vmatmul.mubr.f32.gmra.mrb[98].mxu0 %v599_v8 }
 0x168   : > { %1854 = vmatprep.mubr.f32.mxu0 %v604_v10 }
 0x169   : > { %1406 = vmatmul.mubr.f32.gmra.mrb[100].mxu1 %v601_v11  ;;  %v631_v11 = vld [vmem:[#allocation5 + $0x730] sm:$0xff] }
 0x16a   : > { %1411 = vmatprep.mubr.f32.mxu1 %v606_v13  ;;  %v744_v13 = vpop.permute.xlu0 %743 }
 0x16b   : > { %1855 = vmatmul.mubr.f32.gmra.mrb[100].mxu0 %v603_v12  ;;  %v634_v12 = vld [vmem:[#allocation5 + $0x748] sm:$0xff] }
 0x16c   : > { %1860 = vmatprep.mubr.f32.mxu0 %v608_v14 }
 0x16d   : > { %1412 = vmatmul.mubr.f32.gmra.mrb[102].mxu1 %v605_v15 }
 0x16e   : > { %1417 = vmatprep.mubr.f32.mxu1 %v610_v17 }
 0x16f   : > { %1861 = vmatmul.mubr.f32.gmra.mrb[102].mxu0 %v607_v16  ;;  %v636_v16 = vld [vmem:[#allocation5 + $0x758] sm:$0xff] }
 0x170   : > { %1866 = vmatprep.mubr.f32.mxu0 %v612_v18 }
 0x171   : > { %1418 = vmatmul.mubr.f32.gmra.mrb[104].mxu1 %v609_v19 }
 0x172   : > { %1423 = vmatprep.mubr.f32.mxu1 %v614_v21 }
 0x173   : > { %1867 = vmatmul.mubr.f32.gmra.mrb[104].mxu0 %v611_v20 }
 0x174   : > { %1872 = vmatprep.mubr.f32.mxu0 %v616_v23  ;;  %v1107_v27 = vpop.f32.mrb[0].mxu1 }
 0x175   : > { %v1108_v29 = vadd.f32 %v1107_v27, %v724_v22  ;;  %v1109_v30 = vpop.f32.mrb[1].mxu1  ;;  %1424 = vmatmul.mubr.f32.gmra.mrb[106].mxu1 %v613_v24  ;;  %v635_v24 = vld [vmem:[#allocation5 + $0x750] sm:$0xff] }
 0x176   : > { %v1556_v31 = vpop.f32.mrb[0].mxu0  ;;  %v1110_v32 = vadd.f32 %v1109_v30, %v724_v22  ;;  %1429 = vmatprep.mubr.f32.mxu1 %v618_v26  ;;  %v633_v22 = vld [vmem:[#allocation5 + $0x740] sm:$0xff]  ;;  %v749_v26 = vpop.permute.xlu1 %748 }
 0x177   : > { %v1558_v33 = vpop.f32.mrb[1].mxu0  ;;  %1873 = vmatmul.mubr.f32.gmra.mrb[106].mxu0 %v615_v25  ;;  %v4387_v36 = vadd.f32 %v1556_v31, %v1108_v29  ;;  %v638_v25 = vld [vmem:[#allocation5 + $0x768] sm:$0xff]  ;;  %v640_v29 = vld [vmem:[#allocation5 + $0x778] sm:$0xff] }
 0x178   : > { %1878 = vmatprep.mubr.f32.mxu0 %v620_v28  ;;  %v4389_v39 = vadd.f32 %v1558_v33, %v1110_v32  ;;  %v1113_v40 = vpop.f32.mrb[2].mxu1 }
 0x179   : > { %1939 = vst [vmem:[%s4393_s7] sm:$0xff] %v4387_v36  ;;  %v1114_v42 = vadd.f32 %v1113_v40, %v729_v34  ;;  %v1115_v43 = vpop.f32.mrb[3].mxu1  ;;  %1430 = vmatmul.mubr.f32.gmra.mrb[108].mxu1 %v617_v35  ;;  %v637_v35 = vld [vmem:[#allocation5 + $0x760] sm:$0xff]  ;;  %v642_v40 = vld [vmem:[#allocation5 + $0x788] sm:$0xff] }
 0x17a   : > { %v1562_v44 = vpop.f32.mrb[2].mxu0  ;;  %1940 = vst [vmem:[%s4393_s7 + $0x8] sm:$0xff] %v4389_v39  ;;  %v1116_v46 = vadd.f32 %v1115_v43, %v729_v34  ;;  %1435 = vmatprep.mubr.f32.mxu1 %v622_v38  ;;  %v639_v38 = vld [vmem:[#allocation5 + $0x770] sm:$0xff] }
 0x17b   : > { %v1564_v47 = vpop.f32.mrb[3].mxu0  ;;  %1879 = vmatmul.mubr.f32.gmra.mrb[108].mxu0 %v619_v37  ;;  %v4399_v49 = vadd.f32 %v1562_v44, %v1114_v42  ;;  %v644_v44 = vld [vmem:[#allocation5 + $0x798] sm:$0xff] }
 0x17c   : > { %1884 = vmatprep.mubr.f32.mxu0 %v624_v41  ;;  %v4401_v52 = vadd.f32 %v1564_v47, %v1116_v46  ;;  %v1119_v53 = vpop.f32.mrb[4].mxu1  ;;  %v754_v41 = vpop.permute.xlu0 %753 }
 0x17d   : > { %1941 = vst [vmem:[%s4393_s7 + $0x10] sm:$0xff] %v4399_v49  ;;  %v1120_v55 = vadd.f32 %v1119_v53, %v734_v45  ;;  %v1121_v56 = vpop.f32.mrb[5].mxu1  ;;  %1436 = vmatmul.mubr.f32.gmra.mrb[110].mxu1 %v621_v48 }
 0x17e   : > { %v1568_v57 = vpop.f32.mrb[4].mxu0  ;;  %1942 = vst [vmem:[%s4393_s7 + $0x18] sm:$0xff] %v4401_v52  ;;  %v1122_v58 = vadd.f32 %v1121_v56, %v734_v45  ;;  %1441 = vmatprep.mubr.f32.mxu1 %v626_v51  ;;  %v641_v51 = vld [vmem:[#allocation5 + $0x780] sm:$0xff]  ;;  %v759_v56 = vpop.permute.xlu1 %758 }
 0x17f   : > { %v1570_v59 = vpop.f32.mrb[5].mxu0  ;;  %1885 = vmatmul.mubr.f32.gmra.mrb[110].mxu0 %v623_v50  ;;  %v4407_v61 = vadd.f32 %v1568_v57, %v1120_v55  ;;  %v646_v55 = vld [vmem:[#allocation5 + $0x7a8] sm:$0xff] }
 0x180   : > { %1890 = vmatprep.mubr.f32.mxu0 %v628_v54  ;;  %v4409_v1 = vadd.f32 %v1570_v59, %v1122_v58  ;;  %v1125_v2 = vpop.f32.mrb[6].mxu1  ;;  %v643_v54 = vld [vmem:[#allocation5 + $0x790] sm:$0xff]  ;;  %v648_v59 = vld [vmem:[#allocation5 + $0x7b8] sm:$0xff] }
 0x181   : > { %1943 = vst [vmem:[%s4393_s7 + $0x20] sm:$0xff] %v4407_v61  ;;  %v1126_v4 = vadd.f32 %v1125_v2, %v739_v0  ;;  %v1127_v5 = vpop.f32.mrb[7].mxu1  ;;  %1442 = vmatmul.mubr.f32.gmra.mrb[112].mxu1 %v625_v60 }
 0x182   : > { %v1574_v6 = vpop.f32.mrb[6].mxu0  ;;  %1944 = vst [vmem:[%s4393_s7 + $0x28] sm:$0xff] %v4409_v1  ;;  %v1128_v7 = vadd.f32 %v1127_v5, %v739_v0  ;;  %1447 = vmatprep.mubr.f32.mxu1 %v630_v63  ;;  %v647_v5 = vld [vmem:[#allocation5 + $0x7b0] sm:$0xff] }
 0x183   : > { %v1576_v8 = vpop.f32.mrb[7].mxu0  ;;  %1891 = vmatmul.mubr.f32.gmra.mrb[112].mxu0 %v627_v62  ;;  %v4415_v10 = vadd.f32 %v1574_v6, %v1126_v4  ;;  %v650_v6 = vld [vmem:[#allocation5 + $0x7c8] sm:$0xff] }
 0x184   : > { %1896 = vmatprep.mubr.f32.mxu0 %v632_v3  ;;  %v4417_v14 = vadd.f32 %v1576_v8, %v1128_v7  ;;  %v1131_v15 = vpop.f32.mrb[8].mxu1  ;;  %v645_v3 = vld [vmem:[#allocation5 + $0x7a0] sm:$0xff]  ;;  %v764_v7 = vpop.permute.xlu0 %763 }
 0x185   : > { %1945 = vst [vmem:[%s4393_s7 + $0x30] sm:$0xff] %v4415_v10  ;;  %v1132_v17 = vadd.f32 %v1131_v15, %v744_v13  ;;  %v1133_v18 = vpop.f32.mrb[9].mxu1  ;;  %1448 = vmatmul.mubr.f32.gmra.mrb[114].mxu1 %v629_v9 }
 0x186   : > { %v1580_v19 = vpop.f32.mrb[8].mxu0  ;;  %1946 = vst [vmem:[%s4393_s7 + $0x38] sm:$0xff] %v4417_v14  ;;  %v1134_v20 = vadd.f32 %v1133_v18, %v744_v13  ;;  %1453 = vmatprep.mubr.f32.mxu1 %v634_v12  ;;  %v649_v18 = vld [vmem:[#allocation5 + $0x7c0] sm:$0xff] }
 0x187   : > { %v1582_v21 = vpop.f32.mrb[9].mxu0  ;;  %1897 = vmatmul.mubr.f32.gmra.mrb[114].mxu0 %v631_v11  ;;  %v4423_v23 = vadd.f32 %v1580_v19, %v1132_v17  ;;  %v652_v11 = vld [vmem:[#allocation5 + $0x7d8] sm:$0xff] }
 0x188   : > { %1902 = vmatprep.mubr.f32.mxu0 %v636_v16  ;;  %v4425_v27 = vadd.f32 %v1582_v21, %v1134_v20  ;;  %v1137_v28 = vpop.f32.mrb[10].mxu1  ;;  %v651_v20 = vld [vmem:[#allocation5 + $0x7d0] sm:$0xff]  ;;  %v654_v21 = vld [vmem:[#allocation5 + $0x7e8] sm:$0xff] }
 0x189   : > { %1947 = vst [vmem:[%s4393_s7 + $0x40] sm:$0xff] %v4423_v23  ;;  %v1138_v30 = vadd.f32 %v1137_v28, %v749_v26  ;;  %v1139_v31 = vpop.f32.mrb[11].mxu1  ;;  %1454 = vmatmul.mubr.f32.gmra.mrb[116].mxu1 %v633_v22  ;;  %v769_v22 = vpop.permute.xlu1 %768 }
 0x18a   : > { %v1586_v32 = vpop.f32.mrb[10].mxu0  ;;  %1948 = vst [vmem:[%s4393_s7 + $0x48] sm:$0xff] %v4425_v27  ;;  %v1140_v33 = vadd.f32 %v1139_v31, %v749_v26  ;;  %1459 = vmatprep.mubr.f32.mxu1 %v638_v25  ;;  %v656_v26 = vld [vmem:[#allocation5 + $0x7f8] sm:$0xff] }
 0x18b   : > { %v1588_v34 = vpop.f32.mrb[11].mxu0  ;;  %1903 = vmatmul.mubr.f32.gmra.mrb[116].mxu0 %v635_v24  ;;  %v4431_v37 = vadd.f32 %v1586_v32, %v1138_v30 }
 0x18c   : > { %1908 = vmatprep.mubr.f32.mxu0 %v640_v29  ;;  %v4433_v42 = vadd.f32 %v1588_v34, %v1140_v33  ;;  %v1143_v43 = vpop.f32.mrb[12].mxu1  ;;  %v653_v33 = vld [vmem:[#allocation5 + $0x7e0] sm:$0xff] }
 0x18d   : > { %1949 = vst [vmem:[%s4393_s7 + $0x50] sm:$0xff] %v4431_v37  ;;  %v1144_v45 = vadd.f32 %v1143_v43, %v754_v41  ;;  %v1145_v46 = vpop.f32.mrb[13].mxu1  ;;  %1460 = vmatmul.mubr.f32.gmra.mrb[118].mxu1 %v637_v35  ;;  %v655_v35 = vld [vmem:[#allocation5 + $0x7f0] sm:$0xff] }
 0x18e   : > { %v1592_v47 = vpop.f32.mrb[12].mxu0  ;;  %1950 = vst [vmem:[%s4393_s7 + $0x58] sm:$0xff] %v4433_v42  ;;  %v1146_v48 = vadd.f32 %v1145_v46, %v754_v41  ;;  %1465 = vmatprep.mubr.f32.mxu1 %v642_v40 }
 0x18f   : > { %v1594_v50 = vpop.f32.mrb[13].mxu0  ;;  %1909 = vmatmul.mubr.f32.gmra.mrb[118].mxu0 %v639_v38  ;;  %v4439_v53 = vadd.f32 %v1592_v47, %v1144_v45  ;;  %v774_v38 = vpop.permute.xlu0 %773 }
 0x190   : > { %1914 = vmatprep.mubr.f32.mxu0 %v644_v44  ;;  %v4441_v57 = vadd.f32 %v1594_v50, %v1146_v48  ;;  %v1149_v58 = vpop.f32.mrb[14].mxu1  ;;  %v779_v50 = vpop.permute.xlu1 %778 }
 0x191   : > { %1951 = vst [vmem:[%s4393_s7 + $0x60] sm:$0xff] %v4439_v53  ;;  %v1150_v60 = vadd.f32 %v1149_v58, %v759_v56  ;;  %v1151_v62 = vpop.f32.mrb[15].mxu1  ;;  %1466 = vmatmul.mubr.f32.gmra.mrb[120].mxu1 %v641_v51 }
 0x192   : > { %v1598_v63 = vpop.f32.mrb[14].mxu0  ;;  %1952 = vst [vmem:[%s4393_s7 + $0x68] sm:$0xff] %v4441_v57  ;;  %v1152_v0 = vadd.f32 %v1151_v62, %v759_v56  ;;  %1471 = vmatprep.mubr.f32.mxu1 %v646_v55 }
 0x193   : > { %v1600_v2 = vpop.f32.mrb[15].mxu0  ;;  %1915 = vmatmul.mubr.f32.gmra.mrb[120].mxu0 %v643_v54  ;;  %v4447_v4 = vadd.f32 %v1598_v63, %v1150_v60  ;;  %v784_v63 = vpop.permute.xlu0 %783 }
 0x194   : > { %1920 = vmatprep.mubr.f32.mxu0 %v648_v59  ;;  %v4449_v8 = vadd.f32 %v1600_v2, %v1152_v0  ;;  %v1155_v9 = vpop.f32.mrb[16].mxu1 }
 0x195   : > { %1953 = vst [vmem:[%s4393_s7 + $0x70] sm:$0xff] %v4447_v4  ;;  %v1156_v12 = vadd.f32 %v1155_v9, %v764_v7  ;;  %v1157_v13 = vpop.f32.mrb[17].mxu1  ;;  %1472 = vmatmul.mubr.f32.gmra.mrb[122].mxu1 %v645_v3 }
 0x196   : > { %v1604_v15 = vpop.f32.mrb[16].mxu0  ;;  %1954 = vst [vmem:[%s4393_s7 + $0x78] sm:$0xff] %v4449_v8  ;;  %v1158_v16 = vadd.f32 %v1157_v13, %v764_v7  ;;  %1477 = vmatprep.mubr.f32.mxu1 %v650_v6 }
 0x197   : > { %v1606_v17 = vpop.f32.mrb[17].mxu0  ;;  %1921 = vmatmul.mubr.f32.gmra.mrb[122].mxu0 %v647_v5  ;;  %v4455_v19 = vadd.f32 %v1604_v15, %v1156_v12  ;;  %v789_v12 = vpop.permute.xlu1 %788 }
 0x198   : > { %1926 = vmatprep.mubr.f32.mxu0 %v652_v11  ;;  %v4457_v24 = vadd.f32 %v1606_v17, %v1158_v16  ;;  %v1161_v25 = vpop.f32.mrb[18].mxu1 }
 0x199   : > { %1955 = vst [vmem:[%s4393_s7 + $0x80] sm:$0xff] %v4455_v19  ;;  %v1162_v28 = vadd.f32 %v1161_v25, %v769_v22  ;;  %v1163_v29 = vpop.f32.mrb[19].mxu1  ;;  %1478 = vmatmul.mubr.f32.gmra.mrb[124].mxu1 %v649_v18  ;;  %v794_v25 = vpop.permute.xlu0 %793 }
 0x19a   : > { %v1610_v30 = vpop.f32.mrb[18].mxu0  ;;  %1956 = vst [vmem:[%s4393_s7 + $0x88] sm:$0xff] %v4457_v24  ;;  %v1164_v31 = vadd.f32 %v1163_v29, %v769_v22  ;;  %1483 = vmatprep.mubr.f32.mxu1 %v654_v21 }
 0x19b   : > { %v1612_v32 = vpop.f32.mrb[19].mxu0  ;;  %1927 = vmatmul.mubr.f32.gmra.mrb[124].mxu0 %v651_v20  ;;  %v4463_v34 = vadd.f32 %v1610_v30, %v1162_v28 }
 0x19c   : > { %1932 = vmatprep.mubr.f32.mxu0 %v656_v26  ;;  %v4465_v40 = vadd.f32 %v1612_v32, %v1164_v31  ;;  %v1167_v41 = vpop.f32.mrb[20].mxu1 }
 0x19d   : > { %1957 = vst [vmem:[%s4393_s7 + $0x90] sm:$0xff] %v4463_v34  ;;  %v1168_v43 = vadd.f32 %v1167_v41, %v774_v38  ;;  %v1169_v44 = vpop.f32.mrb[21].mxu1  ;;  %1484 = vmatmul.mubr.f32.gmra.mrb[126].mxu1 %v653_v33 }
 0x19e   : > { %v1616_v45 = vpop.f32.mrb[20].mxu0  ;;  %1958 = vst [vmem:[%s4393_s7 + $0x98] sm:$0xff] %v4465_v40  ;;  %v1170_v46 = vadd.f32 %v1169_v44, %v774_v38  ;;  %v799_v38 = vpop.permute.xlu1 %798 }
 0x19f   : > { %v1618_v47 = vpop.f32.mrb[21].mxu0  ;;  %1933 = vmatmul.mubr.f32.gmra.mrb[126].mxu0 %v655_v35  ;;  %v4471_v48 = vadd.f32 %v1616_v45, %v1168_v43 }
 0x1a0   : > { %v4473_v51 = vadd.f32 %v1618_v47, %v1170_v46  ;;  %v1173_v54 = vpop.f32.mrb[22].mxu1 }
 0x1a1   : > { %1959 = vst [vmem:[%s4393_s7 + $0xa0] sm:$0xff] %v4471_v48  ;;  %v1174_v55 = vadd.f32 %v1173_v54, %v779_v50  ;;  %v1175_v56 = vpop.f32.mrb[23].mxu1 }
 0x1a2   : > { %v1622_v58 = vpop.f32.mrb[22].mxu0  ;;  %1960 = vst [vmem:[%s4393_s7 + $0xa8] sm:$0xff] %v4473_v51  ;;  %v1176_v59 = vadd.f32 %v1175_v56, %v779_v50 }
 0x1a3   : > { %v1624_v60 = vpop.f32.mrb[23].mxu0  ;;  %v4479_v62 = vadd.f32 %v1622_v58, %v1174_v55  ;;  %v804_v55 = vpop.permute.xlu0 %803 }
 0x1a4   : > { %v4481_v0 = vadd.f32 %v1624_v60, %v1176_v59  ;;  %v1179_v2 = vpop.f32.mrb[24].mxu1 }
 0x1a5   : > { %1961 = vst [vmem:[%s4393_s7 + $0xb0] sm:$0xff] %v4479_v62  ;;  %v1180_v3 = vadd.f32 %v1179_v2, %v784_v63  ;;  %v1181_v5 = vpop.f32.mrb[25].mxu1 }
 0x1a6   : > { %v1628_v6 = vpop.f32.mrb[24].mxu0  ;;  %1962 = vst [vmem:[%s4393_s7 + $0xb8] sm:$0xff] %v4481_v0  ;;  %v1182_v7 = vadd.f32 %v1181_v5, %v784_v63 }
 0x1a7   : > { %v1630_v9 = vpop.f32.mrb[25].mxu0  ;;  %v4487_v11 = vadd.f32 %v1628_v6, %v1180_v3  ;;  %v809_v6 = vpop.permute.xlu1 %808 }
 0x1a8   : > { %v4489_v13 = vadd.f32 %v1630_v9, %v1182_v7  ;;  %v1185_v15 = vpop.f32.mrb[26].mxu1 }
 0x1a9   : > { %1963 = vst [vmem:[%s4393_s7 + $0xc0] sm:$0xff] %v4487_v11  ;;  %v1186_v16 = vadd.f32 %v1185_v15, %v789_v12  ;;  %v1187_v17 = vpop.f32.mrb[27].mxu1 }
 0x1aa   : > { %v1634_v18 = vpop.f32.mrb[26].mxu0  ;;  %1964 = vst [vmem:[%s4393_s7 + $0xc8] sm:$0xff] %v4489_v13  ;;  %v1188_v20 = vadd.f32 %v1187_v17, %v789_v12 }
 0x1ab   : > { %v1636_v21 = vpop.f32.mrb[27].mxu0  ;;  %v4495_v22 = vadd.f32 %v1634_v18, %v1186_v16 }
 0x1ac   : > { %v4497_v26 = vadd.f32 %v1636_v21, %v1188_v20  ;;  %v1191_v28 = vpop.f32.mrb[28].mxu1  ;;  %v814_v21 = vpop.permute.xlu0 %813 }
 0x1ad   : > { %1965 = vst [vmem:[%s4393_s7 + $0xd0] sm:$0xff] %v4495_v22  ;;  %v1192_v29 = vadd.f32 %v1191_v28, %v794_v25  ;;  %v1193_v30 = vpop.f32.mrb[29].mxu1 }
 0x1ae   : > { %v1640_v31 = vpop.f32.mrb[28].mxu0  ;;  %1966 = vst [vmem:[%s4393_s7 + $0xd8] sm:$0xff] %v4497_v26  ;;  %v1194_v32 = vadd.f32 %v1193_v30, %v794_v25 }
 0x1af   : > { %v1642_v33 = vpop.f32.mrb[29].mxu0  ;;  %v4503_v35 = vadd.f32 %v1640_v31, %v1192_v29 }
 0x1b0   : > { %v4505_v41 = vadd.f32 %v1642_v33, %v1194_v32  ;;  %v1197_v43 = vpop.f32.mrb[30].mxu1 }
 0x1b1   : > { %1967 = vst [vmem:[%s4393_s7 + $0xe0] sm:$0xff] %v4503_v35  ;;  %v1198_v44 = vadd.f32 %v1197_v43, %v799_v38  ;;  %v1199_v45 = vpop.f32.mrb[31].mxu1  ;;  %v819_v43 = vpop.permute.xlu1 %818 }
 0x1b2   : > { %v1646_v46 = vpop.f32.mrb[30].mxu0  ;;  %1968 = vst [vmem:[%s4393_s7 + $0xe8] sm:$0xff] %v4505_v41  ;;  %v1200_v47 = vadd.f32 %v1199_v45, %v799_v38 }
 0x1b3   : > { %v1648_v50 = vpop.f32.mrb[31].mxu0  ;;  %v4511_v54 = vadd.f32 %v1646_v46, %v1198_v44 }
 0x1b4   : > { %v4513_v56 = vadd.f32 %v1648_v50, %v1200_v47  ;;  %v1203_v58 = vpop.f32.mrb[32].mxu1 }
 0x1b5   : > { %1969 = vst [vmem:[%s4393_s7 + $0xf0] sm:$0xff] %v4511_v54  ;;  %v1204_v59 = vadd.f32 %v1203_v58, %v804_v55  ;;  %v1205_v60 = vpop.f32.mrb[33].mxu1 }
 0x1b6   : > { %v1652_v63 = vpop.f32.mrb[32].mxu0  ;;  %1970 = vst [vmem:[%s4393_s7 + $0xf8] sm:$0xff] %v4513_v56  ;;  %v1206_v2 = vadd.f32 %v1205_v60, %v804_v55  ;;  %v824_v60 = vpop.permute.xlu0 %823 }
 0x1b7   : > { %v1654_v3 = vpop.f32.mrb[33].mxu0  ;;  %v4519_v5 = vadd.f32 %v1652_v63, %v1204_v59 }
 0x1b8   : > { %v4521_v7 = vadd.f32 %v1654_v3, %v1206_v2  ;;  %v1209_v9 = vpop.f32.mrb[34].mxu1 }
 0x1b9   : > { %1971 = vst [vmem:[%s4393_s7 + $0x100] sm:$0xff] %v4519_v5  ;;  %v1210_v12 = vadd.f32 %v1209_v9, %v809_v6  ;;  %v1211_v15 = vpop.f32.mrb[35].mxu1 }
 0x1ba   : > { %v1658_v16 = vpop.f32.mrb[34].mxu0  ;;  %1972 = vst [vmem:[%s4393_s7 + $0x108] sm:$0xff] %v4521_v7  ;;  %v1212_v17 = vadd.f32 %v1211_v15, %v809_v6 }
 0x1bb   : > { %v1660_v18 = vpop.f32.mrb[35].mxu0  ;;  %v4527_v20 = vadd.f32 %v1658_v16, %v1210_v12 }
 0x1bc   : > { %v4529_v25 = vadd.f32 %v1660_v18, %v1212_v17  ;;  %v1215_v28 = vpop.f32.mrb[36].mxu1  ;;  %v829_v17 = vpop.permute.xlu1 %828 }
 0x1bd   : > { %1973 = vst [vmem:[%s4393_s7 + $0x110] sm:$0xff] %v4527_v20  ;;  %v1216_v29 = vadd.f32 %v1215_v28, %v814_v21  ;;  %v1217_v30 = vpop.f32.mrb[37].mxu1 }
 0x1be   : > { %v1664_v31 = vpop.f32.mrb[36].mxu0  ;;  %1974 = vst [vmem:[%s4393_s7 + $0x118] sm:$0xff] %v4529_v25  ;;  %v1218_v32 = vadd.f32 %v1217_v30, %v814_v21 }
 0x1bf   : > { %v1666_v33 = vpop.f32.mrb[37].mxu0  ;;  %v4535_v38 = vadd.f32 %v1664_v31, %v1216_v29 }
 0x1c0   : > { %v4537_v44 = vadd.f32 %v1666_v33, %v1218_v32  ;;  %v1221_v45 = vpop.f32.mrb[38].mxu1 }
 0x1c1   : > { %1975 = vst [vmem:[%s4393_s7 + $0x120] sm:$0xff] %v4535_v38  ;;  %v1222_v46 = vadd.f32 %v1221_v45, %v819_v43  ;;  %v1223_v47 = vpop.f32.mrb[39].mxu1 }
 0x1c2   : > { %v1670_v50 = vpop.f32.mrb[38].mxu0  ;;  %1976 = vst [vmem:[%s4393_s7 + $0x128] sm:$0xff] %v4537_v44  ;;  %v1224_v55 = vadd.f32 %v1223_v47, %v819_v43  ;;  %v834_v43 = vpop.permute.xlu0 %833 }
 0x1c3   : > { %v1672_v58 = vpop.f32.mrb[39].mxu0  ;;  %v4543_v59 = vadd.f32 %v1670_v50, %v1222_v46 }
 0x1c4   : > { %v4545_v63 = vadd.f32 %v1672_v58, %v1224_v55  ;;  %v1227_v2 = vpop.f32.mrb[40].mxu1 }
 0x1c5   : > { %1977 = vst [vmem:[%s4393_s7 + $0x130] sm:$0xff] %v4543_v59  ;;  %v1228_v3 = vadd.f32 %v1227_v2, %v824_v60  ;;  %v1229_v6 = vpop.f32.mrb[41].mxu1 }
 0x1c6   : > { %v1676_v9 = vpop.f32.mrb[40].mxu0  ;;  %1978 = vst [vmem:[%s4393_s7 + $0x138] sm:$0xff] %v4545_v63  ;;  %v1230_v12 = vadd.f32 %v1229_v6, %v824_v60 }
 0x1c7   : > { %v1678_v15 = vpop.f32.mrb[41].mxu0  ;;  %v4551_v16 = vadd.f32 %v1676_v9, %v1228_v3  ;;  %v839_v3 = vpop.permute.xlu1 %838 }
 0x1c8   : > { %v4553_v18 = vadd.f32 %v1678_v15, %v1230_v12  ;;  %v1233_v21 = vpop.f32.mrb[42].mxu1 }
 0x1c9   : > { %7065 = vst [vmem:[#allocation11_spill] sm:$0xff] %v4551_v16  ;;  %1979 = vst [vmem:[%s4393_s7 + $0x140] sm:$0xff] %v4551_v16  ;;  %v1234_v28 = vadd.f32 %v1233_v21, %v829_v17  ;;  %v1235_v29 = vpop.f32.mrb[43].mxu1 }
 0x1ca   : > { %7066 = vst [vmem:[#allocation12_spill] sm:$0xff] %v4553_v18  ;;  %v1682_v30 = vpop.f32.mrb[42].mxu0  ;;  %1980 = vst [vmem:[%s4393_s7 + $0x148] sm:$0xff] %v4553_v18  ;;  %v1236_v31 = vadd.f32 %v1235_v29, %v829_v17 }
 0x1cb   : > { %v1684_v32 = vpop.f32.mrb[43].mxu0  ;;  %v4559_v33 = vadd.f32 %v1682_v30, %v1234_v28  ;;  %v844_v30 = vpop.permute.xlu0 %843 }
 0x1cc   : > { %v4561_v45 = vadd.f32 %v1684_v32, %v1236_v31  ;;  %v1239_v46 = vpop.f32.mrb[44].mxu1 }
 0x1cd   : > { %1981 = vst [vmem:[%s4393_s7 + $0x150] sm:$0xff] %v4559_v33  ;;  %v1240_v47 = vadd.f32 %v1239_v46, %v834_v43  ;;  %v1241_v50 = vpop.f32.mrb[45].mxu1 }
 0x1ce   : > { %v1688_v55 = vpop.f32.mrb[44].mxu0  ;;  %1982 = vst [vmem:[%s4393_s7 + $0x158] sm:$0xff] %v4561_v45  ;;  %v1242_v58 = vadd.f32 %v1241_v50, %v834_v43 }
 0x1cf   : > { %v1690_v60 = vpop.f32.mrb[45].mxu0  ;;  %v4567_v2 = vadd.f32 %v1688_v55, %v1240_v47 }
 0x1d0   : > { %v4569_v6 = vadd.f32 %v1690_v60, %v1242_v58  ;;  %v1245_v9 = vpop.f32.mrb[46].mxu1  ;;  %v849_v60 = vpop.permute.xlu1 %848 }
 0x1d1   : > { %7067 = vst [vmem:[#allocation13_spill] sm:$0xff] %v4567_v2  ;;  %1983 = vst [vmem:[%s4393_s7 + $0x160] sm:$0xff] %v4567_v2  ;;  %v1246_v12 = vadd.f32 %v1245_v9, %v839_v3  ;;  %v1247_v15 = vpop.f32.mrb[47].mxu1 }
 0x1d2   : > { %7068 = vst [vmem:[#allocation14_spill] sm:$0xff] %v4569_v6  ;;  %v1694_v17 = vpop.f32.mrb[46].mxu0  ;;  %1984 = vst [vmem:[%s4393_s7 + $0x168] sm:$0xff] %v4569_v6  ;;  %v1248_v21 = vadd.f32 %v1247_v15, %v839_v3 }
 0x1d3   : > { %v1696_v28 = vpop.f32.mrb[47].mxu0  ;;  %v4575_v29 = vadd.f32 %v1694_v17, %v1246_v12 }
 0x1d4   : > { %v4577_v31 = vadd.f32 %v1696_v28, %v1248_v21  ;;  %v1251_v32 = vpop.f32.mrb[48].mxu1 }
 0x1d5   : > { %7069 = vst [vmem:[#allocation15_spill] sm:$0xff] %v4575_v29  ;;  %1985 = vst [vmem:[%s4393_s7 + $0x170] sm:$0xff] %v4575_v29  ;;  %v1252_v43 = vadd.f32 %v1251_v32, %v844_v30  ;;  %v1253_v46 = vpop.f32.mrb[49].mxu1  ;;  %v854_v32 = vpop.permute.xlu0 %853 }
 0x1d6   : > { %7070 = vst [vmem:[#allocation16_spill] sm:$0xff] %v4577_v31  ;;  %v1700_v47 = vpop.f32.mrb[48].mxu0  ;;  %1986 = vst [vmem:[%s4393_s7 + $0x178] sm:$0xff] %v4577_v31  ;;  %v1254_v50 = vadd.f32 %v1253_v46, %v844_v30 }
 0x1d7   : > { %v1702_v55 = vpop.f32.mrb[49].mxu0  ;;  %v4583_v58 = vadd.f32 %v1700_v47, %v1252_v43 }
 0x1d8   : > { %v4585_v3 = vadd.f32 %v1702_v55, %v1254_v50  ;;  %v1257_v9 = vpop.f32.mrb[50].mxu1 }
 0x1d9   : > { %7071 = vst [vmem:[#allocation17_spill] sm:$0xff] %v4583_v58  ;;  %1987 = vst [vmem:[%s4393_s7 + $0x180] sm:$0xff] %v4583_v58  ;;  %v1258_v12 = vadd.f32 %v1257_v9, %v849_v60  ;;  %v1259_v15 = vpop.f32.mrb[51].mxu1 }
 0x1da   : > { %7072 = vst [vmem:[#allocation18_spill] sm:$0xff] %v4585_v3  ;;  %v1706_v17 = vpop.f32.mrb[50].mxu0  ;;  %1988 = vst [vmem:[%s4393_s7 + $0x188] sm:$0xff] %v4585_v3  ;;  %v1260_v21 = vadd.f32 %v1259_v15, %v849_v60  ;;  %v859_v15 = vpop.permute.xlu1 %858 }
 0x1db   : > { %v1708_v28 = vpop.f32.mrb[51].mxu0  ;;  %v4591_v30 = vadd.f32 %v1706_v17, %v1258_v12 }
 0x1dc   : > { %v4593_v43 = vadd.f32 %v1708_v28, %v1260_v21  ;;  %v1263_v46 = vpop.f32.mrb[52].mxu1 }
 0x1dd   : > { %7073 = vst [vmem:[#allocation19_spill] sm:$0xff] %v4591_v30  ;;  %1989 = vst [vmem:[%s4393_s7 + $0x190] sm:$0xff] %v4591_v30  ;;  %v1264_v47 = vadd.f32 %v1263_v46, %v854_v32  ;;  %v1265_v50 = vpop.f32.mrb[53].mxu1 }
 0x1de   : > { %7074 = vst [vmem:[#allocation20_spill] sm:$0xff] %v4593_v43  ;;  %v1712_v55 = vpop.f32.mrb[52].mxu0  ;;  %1990 = vst [vmem:[%s4393_s7 + $0x198] sm:$0xff] %v4593_v43  ;;  %v1266_v9 = vadd.f32 %v1265_v50, %v854_v32  ;;  %v864_v50 = vpop.permute.xlu0 %863 }
 0x1df   : > { %v1714_v58 = vpop.f32.mrb[53].mxu0  ;;  %v4599_v60 = vadd.f32 %v1712_v55, %v1264_v47 }
 0x1e0   : > { %v4601_v12 = vadd.f32 %v1714_v58, %v1266_v9  ;;  %v1269_v17 = vpop.f32.mrb[54].mxu1 }
 0x1e1   : > { %7075 = vst [vmem:[#allocation21_spill] sm:$0xff] %v4599_v60  ;;  %1991 = vst [vmem:[%s4393_s7 + $0x1a0] sm:$0xff] %v4599_v60  ;;  %v1270_v21 = vadd.f32 %v1269_v17, %v859_v15  ;;  %v1271_v28 = vpop.f32.mrb[55].mxu1 }
 0x1e2   : > { %7076 = vst [vmem:[#allocation22_spill] sm:$0xff] %v4601_v12  ;;  %v1718_v3 = vpop.f32.mrb[54].mxu0  ;;  %1992 = vst [vmem:[%s4393_s7 + $0x1a8] sm:$0xff] %v4601_v12  ;;  %v1272_v46 = vadd.f32 %v1271_v28, %v859_v15  ;;  %v869_v28 = vpop.permute.xlu1 %868 }
 0x1e3   : > { %v1720_v30 = vpop.f32.mrb[55].mxu0  ;;  %v4607_v32 = vadd.f32 %v1718_v3, %v1270_v21 }
 0x1e4   : > { %v4609_v47 = vadd.f32 %v1720_v30, %v1272_v46  ;;  %v1275_v55 = vpop.f32.mrb[56].mxu1 }
 0x1e5   : > { %7077 = vst [vmem:[#allocation23_spill] sm:$0xff] %v4607_v32  ;;  %1993 = vst [vmem:[%s4393_s7 + $0x1b0] sm:$0xff] %v4607_v32  ;;  %v1276_v58 = vadd.f32 %v1275_v55, %v864_v50  ;;  %v1277_v9 = vpop.f32.mrb[57].mxu1 }
 0x1e6   : > { %7078 = vst [vmem:[#allocation24_spill] sm:$0xff] %v4609_v47  ;;  %v1724_v60 = vpop.f32.mrb[56].mxu0  ;;  %1994 = vst [vmem:[%s4393_s7 + $0x1b8] sm:$0xff] %v4609_v47  ;;  %v1278_v17 = vadd.f32 %v1277_v9, %v864_v50  ;;  %v874_v9 = vpop.permute.xlu0 %873 }
 0x1e7   : > { %v1726_v43 = vpop.f32.mrb[57].mxu0  ;;  %v4615_v15 = vadd.f32 %v1724_v60, %v1276_v58 }
 0x1e8   : > { %v4617_v3 = vadd.f32 %v1726_v43, %v1278_v17  ;;  %v1281_v21 = vpop.f32.mrb[58].mxu1 }
 0x1e9   : > { %7079 = vst [vmem:[#allocation25_spill] sm:$0xff] %v4615_v15  ;;  %1995 = vst [vmem:[%s4393_s7 + $0x1c0] sm:$0xff] %v4615_v15  ;;  %v1282_v30 = vadd.f32 %v1281_v21, %v869_v28  ;;  %v1283_v46 = vpop.f32.mrb[59].mxu1 }
 0x1ea   : > { %7080 = vst [vmem:[#allocation26_spill] sm:$0xff] %v4617_v3  ;;  %v1730_v12 = vpop.f32.mrb[58].mxu0  ;;  %1996 = vst [vmem:[%s4393_s7 + $0x1c8] sm:$0xff] %v4617_v3  ;;  %v1284_v55 = vadd.f32 %v1283_v46, %v869_v28  ;;  %v879_v46 = vpop.permute.xlu1 %878 }
 0x1eb   : > { %v1732_v32 = vpop.f32.mrb[59].mxu0  ;;  %v4623_v50 = vadd.f32 %v1730_v12, %v1282_v30 }
 0x1ec   : > { %v4625_v60 = vadd.f32 %v1732_v32, %v1284_v55  ;;  %v1287_v58 = vpop.f32.mrb[60].mxu1 }
 0x1ed   : > { %7081 = vst [vmem:[#allocation27_spill] sm:$0xff] %v4623_v50  ;;  %1997 = vst [vmem:[%s4393_s7 + $0x1d0] sm:$0xff] %v4623_v50  ;;  %v1288_v43 = vadd.f32 %v1287_v58, %v874_v9  ;;  %v1289_v17 = vpop.f32.mrb[61].mxu1 }
 0x1ee   : > { %7082 = vst [vmem:[#allocation28_spill] sm:$0xff] %v4625_v60  ;;  %v1736_v15 = vpop.f32.mrb[60].mxu0  ;;  %1998 = vst [vmem:[%s4393_s7 + $0x1d8] sm:$0xff] %v4625_v60  ;;  %v1290_v21 = vadd.f32 %v1289_v17, %v874_v9 }
 0x1ef   : > { %v1738_v47 = vpop.f32.mrb[61].mxu0  ;;  %v4631_v28 = vadd.f32 %v1736_v15, %v1288_v43  ;;  %v884_v15 = vpop.permute.xlu0 %883 }
 0x1f0   : > { %v4633_v12 = vadd.f32 %v1738_v47, %v1290_v21  ;;  %v1293_v30 = vpop.f32.mrb[62].mxu1 }
 0x1f1   : > { %7083 = vst [vmem:[#allocation29_spill] sm:$0xff] %v4631_v28  ;;  %1999 = vst [vmem:[%s4393_s7 + $0x1e0] sm:$0xff] %v4631_v28  ;;  %v1294_v32 = vadd.f32 %v1293_v30, %v879_v46  ;;  %v1295_v55 = vpop.f32.mrb[63].mxu1 }
 0x1f2   : > { %7084 = vst [vmem:[#allocation30_spill] sm:$0xff] %v4633_v12  ;;  %v1742_v58 = vpop.f32.mrb[62].mxu0  ;;  %2000 = vst [vmem:[%s4393_s7 + $0x1e8] sm:$0xff] %v4633_v12  ;;  %v1296_v3 = vadd.f32 %v1295_v55, %v879_v46 }
 0x1f3   : > { %v1744_v60 = vpop.f32.mrb[63].mxu0  ;;  %v4639_v9 = vadd.f32 %v1742_v58, %v1294_v32  ;;  %v889_v32 = vpop.permute.xlu1 %888 }
 0x1f4   : > { %v4641_v43 = vadd.f32 %v1744_v60, %v1296_v3  ;;  %v1299_v47 = vpop.f32.mrb[64].mxu1 }
 0x1f5   : > { %7085 = vst [vmem:[#allocation31_spill] sm:$0xff] %v4639_v9  ;;  %2001 = vst [vmem:[%s4393_s7 + $0x1f0] sm:$0xff] %v4639_v9  ;;  %v1300_v17 = vadd.f32 %v1299_v47, %v884_v15  ;;  %v1301_v21 = vpop.f32.mrb[65].mxu1 }
 0x1f6   : > { %7086 = vst [vmem:[#allocation32_spill] sm:$0xff] %v4641_v43  ;;  %v1748_v30 = vpop.f32.mrb[64].mxu0  ;;  %2002 = vst [vmem:[%s4393_s7 + $0x1f8] sm:$0xff] %v4641_v43  ;;  %v1302_v28 = vadd.f32 %v1301_v21, %v884_v15  ;;  %v894_v21 = vpop.permute.xlu0 %893 }
 0x1f7   : > { %v1750_v50 = vpop.f32.mrb[65].mxu0  ;;  %v4648_v46 = vadd.f32 %v1748_v30, %v1300_v17 }
 0x1f8   : > { %v4650_v55 = vadd.f32 %v1750_v50, %v1302_v28  ;;  %v1305_v3 = vpop.f32.mrb[66].mxu1 }
 0x1f9   : > { %7087 = vst [vmem:[#allocation33_spill] sm:$0xff] %v4648_v46  ;;  %2003 = vst [vmem:[%s4393_s7 + $0x200] sm:$0xff] %v4648_v46  ;;  %v1306_v60 = vadd.f32 %v1305_v3, %v889_v32  ;;  %v1307_v58 = vpop.f32.mrb[67].mxu1 }
 0x1fa   : > { %7088 = vst [vmem:[#allocation34_spill] sm:$0xff] %v4650_v55  ;;  %v1754_v47 = vpop.f32.mrb[66].mxu0  ;;  %2004 = vst [vmem:[%s4393_s7 + $0x208] sm:$0xff] %v4650_v55  ;;  %v1308_v12 = vadd.f32 %v1307_v58, %v889_v32  ;;  %v899_v58 = vpop.permute.xlu1 %898 }
 0x1fb   : > { %v1756_v43 = vpop.f32.mrb[67].mxu0  ;;  %v4656_v15 = vadd.f32 %v1754_v47, %v1306_v60 }
 0x1fc   : > { %v4658_v17 = vadd.f32 %v1756_v43, %v1308_v12  ;;  %v1311_v30 = vpop.f32.mrb[68].mxu1 }
 0x1fd   : > { %7089 = vst [vmem:[#allocation35_spill] sm:$0xff] %v4656_v15  ;;  %2005 = vst [vmem:[%s4393_s7 + $0x210] sm:$0xff] %v4656_v15  ;;  %v1312_v50 = vadd.f32 %v1311_v30, %v894_v21  ;;  %v1313_v28 = vpop.f32.mrb[69].mxu1 }
 0x1fe   : > { %7090 = vst [vmem:[#allocation36_spill] sm:$0xff] %v4658_v17  ;;  %v1760_v46 = vpop.f32.mrb[68].mxu0  ;;  %2006 = vst [vmem:[%s4393_s7 + $0x218] sm:$0xff] %v4658_v17  ;;  %v1314_v3 = vadd.f32 %v1313_v28, %v894_v21  ;;  %v904_v28 = vpop.permute.xlu0 %903 }
 0x1ff   : > { %v1762_v9 = vpop.f32.mrb[69].mxu0  ;;  %v4664_v32 = vadd.f32 %v1760_v46, %v1312_v50 }
 0x200   : > { %v4666_v60 = vadd.f32 %v1762_v9, %v1314_v3  ;;  %v1317_v47 = vpop.f32.mrb[70].mxu1 }
 0x201   : > { %7091 = vst [vmem:[#allocation37_spill] sm:$0xff] %v4664_v32  ;;  %2007 = vst [vmem:[%s4393_s7 + $0x220] sm:$0xff] %v4664_v32  ;;  %v1318_v12 = vadd.f32 %v1317_v47, %v899_v58  ;;  %v1319_v43 = vpop.f32.mrb[71].mxu1 }
 0x202   : > { %7092 = vst [vmem:[#allocation38_spill] sm:$0xff] %v4666_v60  ;;  %v1766_v55 = vpop.f32.mrb[70].mxu0  ;;  %2008 = vst [vmem:[%s4393_s7 + $0x228] sm:$0xff] %v4666_v60  ;;  %v1320_v30 = vadd.f32 %v1319_v43, %v899_v58  ;;  %v909_v43 = vpop.permute.xlu1 %908 }
 0x203   : > { %v1768_v15 = vpop.f32.mrb[71].mxu0  ;;  %v4672_v21 = vadd.f32 %v1766_v55, %v1318_v12 }
 0x204   : > { %v4674_v46 = vadd.f32 %v1768_v15, %v1320_v30  ;;  %v1323_v50 = vpop.f32.mrb[72].mxu1 }
 0x205   : > { %7093 = vst [vmem:[#allocation39_spill] sm:$0xff] %v4672_v21  ;;  %2009 = vst [vmem:[%s4393_s7 + $0x230] sm:$0xff] %v4672_v21  ;;  %v1324_v9 = vadd.f32 %v1323_v50, %v904_v28  ;;  %v1325_v3 = vpop.f32.mrb[73].mxu1 }
 0x206   : > { %7094 = vst [vmem:[#allocation40_spill] sm:$0xff] %v4674_v46  ;;  %v1772_v32 = vpop.f32.mrb[72].mxu0  ;;  %2010 = vst [vmem:[%s4393_s7 + $0x238] sm:$0xff] %v4674_v46  ;;  %v1326_v47 = vadd.f32 %v1325_v3, %v904_v28  ;;  %v914_v3 = vpop.permute.xlu0 %913 }
 0x207   : > { %v1774_v17 = vpop.f32.mrb[73].mxu0  ;;  %v4680_v58 = vadd.f32 %v1772_v32, %v1324_v9 }
 0x208   : > { %v4682_v55 = vadd.f32 %v1774_v17, %v1326_v47  ;;  %v1329_v12 = vpop.f32.mrb[74].mxu1 }
 0x209   : > { %7095 = vst [vmem:[#allocation41_spill] sm:$0xff] %v4680_v58  ;;  %2011 = vst [vmem:[%s4393_s7 + $0x240] sm:$0xff] %v4680_v58  ;;  %v1330_v15 = vadd.f32 %v1329_v12, %v909_v43  ;;  %v1331_v30 = vpop.f32.mrb[75].mxu1 }
 0x20a   : > { %7096 = vst [vmem:[#allocation42_spill] sm:$0xff] %v4682_v55  ;;  %v1778_v60 = vpop.f32.mrb[74].mxu0  ;;  %2012 = vst [vmem:[%s4393_s7 + $0x248] sm:$0xff] %v4682_v55  ;;  %v1332_v50 = vadd.f32 %v1331_v30, %v909_v43  ;;  %v919_v30 = vpop.permute.xlu1 %918 }
 0x20b   : > { %v1780_v21 = vpop.f32.mrb[75].mxu0  ;;  %v4688_v28 = vadd.f32 %v1778_v60, %v1330_v15 }
 0x20c   : > { %v4690_v32 = vadd.f32 %v1780_v21, %v1332_v50  ;;  %v1335_v9 = vpop.f32.mrb[76].mxu1 }
 0x20d   : > { %7097 = vst [vmem:[#allocation43_spill] sm:$0xff] %v4688_v28  ;;  %2013 = vst [vmem:[%s4393_s7 + $0x250] sm:$0xff] %v4688_v28  ;;  %v1336_v17 = vadd.f32 %v1335_v9, %v914_v3  ;;  %v1337_v47 = vpop.f32.mrb[77].mxu1 }
 0x20e   : > { %7098 = vst [vmem:[#allocation44_spill] sm:$0xff] %v4690_v32  ;;  %v1784_v58 = vpop.f32.mrb[76].mxu0  ;;  %2014 = vst [vmem:[%s4393_s7 + $0x258] sm:$0xff] %v4690_v32  ;;  %v1338_v12 = vadd.f32 %v1337_v47, %v914_v3  ;;  %v924_v47 = vpop.permute.xlu0 %923 }
 0x20f   : > { %v1786_v46 = vpop.f32.mrb[77].mxu0  ;;  %v4696_v43 = vadd.f32 %v1784_v58, %v1336_v17 }
 0x210   : > { %v4698_v60 = vadd.f32 %v1786_v46, %v1338_v12  ;;  %v1341_v15 = vpop.f32.mrb[78].mxu1 }
 0x211   : > { %7099 = vst [vmem:[#allocation45_spill] sm:$0xff] %v4696_v43  ;;  %2015 = vst [vmem:[%s4393_s7 + $0x260] sm:$0xff] %v4696_v43  ;;  %v1342_v21 = vadd.f32 %v1341_v15, %v919_v30  ;;  %v1343_v50 = vpop.f32.mrb[79].mxu1 }
 0x212   : > { %7100 = vst [vmem:[#allocation46_spill] sm:$0xff] %v4698_v60  ;;  %v1790_v55 = vpop.f32.mrb[78].mxu0  ;;  %2016 = vst [vmem:[%s4393_s7 + $0x268] sm:$0xff] %v4698_v60  ;;  %v1344_v9 = vadd.f32 %v1343_v50, %v919_v30  ;;  %v929_v50 = vpop.permute.xlu1 %928 }
 0x213   : > { %v1792_v28 = vpop.f32.mrb[79].mxu0  ;;  %v4704_v3 = vadd.f32 %v1790_v55, %v1342_v21 }
 0x214   : > { %v4706_v58 = vadd.f32 %v1792_v28, %v1344_v9  ;;  %v1347_v17 = vpop.f32.mrb[80].mxu1 }
 0x215   : > { %7101 = vst [vmem:[#allocation47_spill] sm:$0xff] %v4704_v3  ;;  %2017 = vst [vmem:[%s4393_s7 + $0x270] sm:$0xff] %v4704_v3  ;;  %v1348_v46 = vadd.f32 %v1347_v17, %v924_v47  ;;  %v1349_v12 = vpop.f32.mrb[81].mxu1 }
 0x216   : > { %7102 = vst [vmem:[#allocation48_spill] sm:$0xff] %v4706_v58  ;;  %v1796_v43 = vpop.f32.mrb[80].mxu0  ;;  %2018 = vst [vmem:[%s4393_s7 + $0x278] sm:$0xff] %v4706_v58  ;;  %v1350_v15 = vadd.f32 %v1349_v12, %v924_v47  ;;  %v934_v12 = vpop.permute.xlu0 %933 }
 0x217   : > { %v1798_v32 = vpop.f32.mrb[81].mxu0  ;;  %v4712_v30 = vadd.f32 %v1796_v43, %v1348_v46 }
 0x218   : > { %v4714_v55 = vadd.f32 %v1798_v32, %v1350_v15  ;;  %v1353_v21 = vpop.f32.mrb[82].mxu1 }
 0x219   : > { %7103 = vst [vmem:[#allocation49_spill] sm:$0xff] %v4712_v30  ;;  %2019 = vst [vmem:[%s4393_s7 + $0x280] sm:$0xff] %v4712_v30  ;;  %v1354_v28 = vadd.f32 %v1353_v21, %v929_v50  ;;  %v1355_v9 = vpop.f32.mrb[83].mxu1 }
 0x21a   : > { %7104 = vst [vmem:[#allocation50_spill] sm:$0xff] %v4714_v55  ;;  %v1802_v60 = vpop.f32.mrb[82].mxu0  ;;  %2020 = vst [vmem:[%s4393_s7 + $0x288] sm:$0xff] %v4714_v55  ;;  %v1356_v17 = vadd.f32 %v1355_v9, %v929_v50  ;;  %v939_v9 = vpop.permute.xlu1 %938 }
 0x21b   : > { %v1804_v3 = vpop.f32.mrb[83].mxu0  ;;  %v4720_v47 = vadd.f32 %v1802_v60, %v1354_v28 }
 0x21c   : > { %v4722_v43 = vadd.f32 %v1804_v3, %v1356_v17  ;;  %v1359_v46 = vpop.f32.mrb[84].mxu1 }
 0x21d   : > { %7105 = vst [vmem:[#allocation51_spill] sm:$0xff] %v4720_v47  ;;  %2021 = vst [vmem:[%s4393_s7 + $0x290] sm:$0xff] %v4720_v47  ;;  %v1360_v32 = vadd.f32 %v1359_v46, %v934_v12  ;;  %v1361_v15 = vpop.f32.mrb[85].mxu1 }
 0x21e   : > { %7106 = vst [vmem:[#allocation52_spill] sm:$0xff] %v4722_v43  ;;  %v1808_v30 = vpop.f32.mrb[84].mxu0  ;;  %2022 = vst [vmem:[%s4393_s7 + $0x298] sm:$0xff] %v4722_v43  ;;  %v1362_v21 = vadd.f32 %v1361_v15, %v934_v12  ;;  %v944_v15 = vpop.permute.xlu0 %943 }
 0x21f   : > { %v1810_v58 = vpop.f32.mrb[85].mxu0  ;;  %v4728_v50 = vadd.f32 %v1808_v30, %v1360_v32 }
 0x220   : > { %v4730_v60 = vadd.f32 %v1810_v58, %v1362_v21  ;;  %v1365_v28 = vpop.f32.mrb[86].mxu1 }
 0x221   : > { %7107 = vst [vmem:[#allocation53_spill] sm:$0xff] %v4728_v50  ;;  %2023 = vst [vmem:[%s4393_s7 + $0x2a0] sm:$0xff] %v4728_v50  ;;  %v1366_v3 = vadd.f32 %v1365_v28, %v939_v9  ;;  %v1367_v17 = vpop.f32.mrb[87].mxu1 }
 0x222   : > { %7108 = vst [vmem:[#allocation54_spill] sm:$0xff] %v4730_v60  ;;  %v1814_v55 = vpop.f32.mrb[86].mxu0  ;;  %2024 = vst [vmem:[%s4393_s7 + $0x2a8] sm:$0xff] %v4730_v60  ;;  %v1368_v46 = vadd.f32 %v1367_v17, %v939_v9  ;;  %v949_v17 = vpop.permute.xlu1 %948 }
 0x223   : > { %v1816_v47 = vpop.f32.mrb[87].mxu0  ;;  %v4736_v12 = vadd.f32 %v1814_v55, %v1366_v3 }
 0x224   : > { %v4738_v30 = vadd.f32 %v1816_v47, %v1368_v46  ;;  %v1371_v32 = vpop.f32.mrb[88].mxu1 }
 0x225   : > { %7109 = vst [vmem:[#allocation55_spill] sm:$0xff] %v4736_v12  ;;  %2025 = vst [vmem:[%s4393_s7 + $0x2b0] sm:$0xff] %v4736_v12  ;;  %v1372_v58 = vadd.f32 %v1371_v32, %v944_v15  ;;  %v1373_v21 = vpop.f32.mrb[89].mxu1 }
 0x226   : > { %7110 = vst [vmem:[#allocation56_spill] sm:$0xff] %v4738_v30  ;;  %v1820_v50 = vpop.f32.mrb[88].mxu0  ;;  %2026 = vst [vmem:[%s4393_s7 + $0x2b8] sm:$0xff] %v4738_v30  ;;  %v1374_v28 = vadd.f32 %v1373_v21, %v944_v15  ;;  %v954_v21 = vpop.permute.xlu0 %953 }
 0x227   : > { %v1822_v43 = vpop.f32.mrb[89].mxu0  ;;  %v4744_v9 = vadd.f32 %v1820_v50, %v1372_v58 }
 0x228   : > { %v4746_v55 = vadd.f32 %v1822_v43, %v1374_v28  ;;  %v1377_v3 = vpop.f32.mrb[90].mxu1 }
 0x229   : > { %7111 = vst [vmem:[#allocation57_spill] sm:$0xff] %v4744_v9  ;;  %2027 = vst [vmem:[%s4393_s7 + $0x2c0] sm:$0xff] %v4744_v9  ;;  %v1378_v47 = vadd.f32 %v1377_v3, %v949_v17  ;;  %v1379_v46 = vpop.f32.mrb[91].mxu1 }
 0x22a   : > { %7112 = vst [vmem:[#allocation58_spill] sm:$0xff] %v4746_v55  ;;  %v1826_v60 = vpop.f32.mrb[90].mxu0  ;;  %2028 = vst [vmem:[%s4393_s7 + $0x2c8] sm:$0xff] %v4746_v55  ;;  %v1380_v32 = vadd.f32 %v1379_v46, %v949_v17  ;;  %v959_v46 = vpop.permute.xlu1 %958 }
 0x22b   : > { %v1828_v12 = vpop.f32.mrb[91].mxu0  ;;  %v4752_v15 = vadd.f32 %v1826_v60, %v1378_v47 }
 0x22c   : > { %v4754_v50 = vadd.f32 %v1828_v12, %v1380_v32  ;;  %v1383_v58 = vpop.f32.mrb[92].mxu1 }
 0x22d   : > { %7113 = vst [vmem:[#allocation59_spill] sm:$0xff] %v4752_v15  ;;  %2029 = vst [vmem:[%s4393_s7 + $0x2d0] sm:$0xff] %v4752_v15  ;;  %v1384_v43 = vadd.f32 %v1383_v58, %v954_v21  ;;  %v1385_v28 = vpop.f32.mrb[93].mxu1 }
 0x22e   : > { %7114 = vst [vmem:[#allocation60_spill] sm:$0xff] %v4754_v50  ;;  %v1832_v9 = vpop.f32.mrb[92].mxu0  ;;  %2030 = vst [vmem:[%s4393_s7 + $0x2d8] sm:$0xff] %v4754_v50  ;;  %v1386_v3 = vadd.f32 %v1385_v28, %v954_v21  ;;  %v964_v28 = vpop.permute.xlu0 %963 }
 0x22f   : > { %v1834_v30 = vpop.f32.mrb[93].mxu0  ;;  %v4760_v17 = vadd.f32 %v1832_v9, %v1384_v43 }
 0x230   : > { %v4762_v60 = vadd.f32 %v1834_v30, %v1386_v3  ;;  %v1389_v47 = vpop.f32.mrb[94].mxu1 }
 0x231   : > { %7115 = vst [vmem:[#allocation61_spill] sm:$0xff] %v4760_v17  ;;  %2031 = vst [vmem:[%s4393_s7 + $0x2e0] sm:$0xff] %v4760_v17  ;;  %v1390_v12 = vadd.f32 %v1389_v47, %v959_v46  ;;  %v1391_v32 = vpop.f32.mrb[95].mxu1 }
 0x232   : > { %7116 = vst [vmem:[#allocation62_spill] sm:$0xff] %v4762_v60  ;;  %v1838_v55 = vpop.f32.mrb[94].mxu0  ;;  %2032 = vst [vmem:[%s4393_s7 + $0x2e8] sm:$0xff] %v4762_v60  ;;  %v1392_v58 = vadd.f32 %v1391_v32, %v959_v46  ;;  %v969_v32 = vpop.permute.xlu1 %968 }
 0x233   : > { %v1840_v15 = vpop.f32.mrb[95].mxu0  ;;  %v4768_v21 = vadd.f32 %v1838_v55, %v1390_v12 }
 0x234   : > { %v4770_v9 = vadd.f32 %v1840_v15, %v1392_v58  ;;  %v1395_v43 = vpop.f32.mrb[96].mxu1 }
 0x235   : > { %7117 = vst [vmem:[#allocation63_spill] sm:$0xff] %v4768_v21  ;;  %2033 = vst [vmem:[%s4393_s7 + $0x2f0] sm:$0xff] %v4768_v21  ;;  %v1396_v30 = vadd.f32 %v1395_v43, %v964_v28  ;;  %v1397_v3 = vpop.f32.mrb[97].mxu1 }
 0x236   : > { %7118 = vst [vmem:[#allocation64_spill] sm:$0xff] %v4770_v9  ;;  %v1844_v17 = vpop.f32.mrb[96].mxu0  ;;  %2034 = vst [vmem:[%s4393_s7 + $0x2f8] sm:$0xff] %v4770_v9  ;;  %v1398_v47 = vadd.f32 %v1397_v3, %v964_v28  ;;  %v974_v3 = vpop.permute.xlu0 %973 }
 0x237   : > { %v1846_v50 = vpop.f32.mrb[97].mxu0  ;;  %v4776_v46 = vadd.f32 %v1844_v17, %v1396_v30 }
 0x238   : > { %v4778_v55 = vadd.f32 %v1846_v50, %v1398_v47  ;;  %v1401_v12 = vpop.f32.mrb[98].mxu1 }
 0x239   : > { %7119 = vst [vmem:[#allocation65_spill] sm:$0xff] %v4776_v46  ;;  %2035 = vst [vmem:[%s4393_s7 + $0x300] sm:$0xff] %v4776_v46  ;;  %v1402_v15 = vadd.f32 %v1401_v12, %v969_v32  ;;  %v1403_v58 = vpop.f32.mrb[99].mxu1 }
 0x23a   : > { %7120 = vst [vmem:[#allocation66_spill] sm:$0xff] %v4778_v55  ;;  %v1850_v60 = vpop.f32.mrb[98].mxu0  ;;  %2036 = vst [vmem:[%s4393_s7 + $0x308] sm:$0xff] %v4778_v55  ;;  %v1404_v43 = vadd.f32 %v1403_v58, %v969_v32  ;;  %v979_v58 = vpop.permute.xlu1 %978 }
 0x23b   : > { %v1852_v21 = vpop.f32.mrb[99].mxu0  ;;  %v4784_v28 = vadd.f32 %v1850_v60, %v1402_v15 }
 0x23c   : > { %v4786_v17 = vadd.f32 %v1852_v21, %v1404_v43  ;;  %v1407_v30 = vpop.f32.mrb[100].mxu1 }
 0x23d   : > { %7121 = vst [vmem:[#allocation67_spill] sm:$0xff] %v4784_v28  ;;  %2037 = vst [vmem:[%s4393_s7 + $0x310] sm:$0xff] %v4784_v28  ;;  %v1408_v50 = vadd.f32 %v1407_v30, %v974_v3  ;;  %v1409_v47 = vpop.f32.mrb[101].mxu1 }
 0x23e   : > { %7122 = vst [vmem:[#allocation68_spill] sm:$0xff] %v4786_v17  ;;  %v1856_v46 = vpop.f32.mrb[100].mxu0  ;;  %2038 = vst [vmem:[%s4393_s7 + $0x318] sm:$0xff] %v4786_v17  ;;  %v1410_v12 = vadd.f32 %v1409_v47, %v974_v3  ;;  %v984_v47 = vpop.permute.xlu0 %983 }
 0x23f   : > { %v1858_v9 = vpop.f32.mrb[101].mxu0  ;;  %v4792_v32 = vadd.f32 %v1856_v46, %v1408_v50 }
 0x240   : > { %v4794_v60 = vadd.f32 %v1858_v9, %v1410_v12  ;;  %v1413_v15 = vpop.f32.mrb[102].mxu1 }
 0x241   : > { %7123 = vst [vmem:[#allocation69_spill] sm:$0xff] %v4792_v32  ;;  %2039 = vst [vmem:[%s4393_s7 + $0x320] sm:$0xff] %v4792_v32  ;;  %v1414_v21 = vadd.f32 %v1413_v15, %v979_v58  ;;  %v1415_v43 = vpop.f32.mrb[103].mxu1 }
 0x242   : > { %7124 = vst [vmem:[#allocation70_spill] sm:$0xff] %v4794_v60  ;;  %v1862_v55 = vpop.f32.mrb[102].mxu0  ;;  %2040 = vst [vmem:[%s4393_s7 + $0x328] sm:$0xff] %v4794_v60  ;;  %v1416_v30 = vadd.f32 %v1415_v43, %v979_v58  ;;  %v989_v43 = vpop.permute.xlu1 %988 }
 0x243   : > { %v1864_v28 = vpop.f32.mrb[103].mxu0  ;;  %v4800_v3 = vadd.f32 %v1862_v55, %v1414_v21 }
 0x244   : > { %v4802_v46 = vadd.f32 %v1864_v28, %v1416_v30  ;;  %v1419_v50 = vpop.f32.mrb[104].mxu1 }
 0x245   : > { %7125 = vst [vmem:[#allocation71_spill] sm:$0xff] %v4800_v3  ;;  %2041 = vst [vmem:[%s4393_s7 + $0x330] sm:$0xff] %v4800_v3  ;;  %v1420_v9 = vadd.f32 %v1419_v50, %v984_v47  ;;  %v1421_v12 = vpop.f32.mrb[105].mxu1 }
 0x246   : > { %7126 = vst [vmem:[#allocation72_spill] sm:$0xff] %v4802_v46  ;;  %v1868_v32 = vpop.f32.mrb[104].mxu0  ;;  %2042 = vst [vmem:[%s4393_s7 + $0x338] sm:$0xff] %v4802_v46  ;;  %v1422_v15 = vadd.f32 %v1421_v12, %v984_v47  ;;  %v994_v12 = vpop.permute.xlu0 %993 }
 0x247   : > { %v1870_v17 = vpop.f32.mrb[105].mxu0  ;;  %v4808_v58 = vadd.f32 %v1868_v32, %v1420_v9 }
 0x248   : > { %v4810_v55 = vadd.f32 %v1870_v17, %v1422_v15  ;;  %v1425_v21 = vpop.f32.mrb[106].mxu1 }
 0x249   : > { %7127 = vst [vmem:[#allocation73_spill] sm:$0xff] %v4808_v58  ;;  %2043 = vst [vmem:[%s4393_s7 + $0x340] sm:$0xff] %v4808_v58  ;;  %v1426_v28 = vadd.f32 %v1425_v21, %v989_v43  ;;  %v1427_v30 = vpop.f32.mrb[107].mxu1 }
 0x24a   : > { %7128 = vst [vmem:[#allocation74_spill] sm:$0xff] %v4810_v55  ;;  %v1874_v60 = vpop.f32.mrb[106].mxu0  ;;  %2044 = vst [vmem:[%s4393_s7 + $0x348] sm:$0xff] %v4810_v55  ;;  %v1428_v50 = vadd.f32 %v1427_v30, %v989_v43  ;;  %v999_v30 = vpop.permute.xlu1 %998 }
 0x24b   : > { %v1876_v3 = vpop.f32.mrb[107].mxu0  ;;  %v4816_v47 = vadd.f32 %v1874_v60, %v1426_v28 }
 0x24c   : > { %v4818_v32 = vadd.f32 %v1876_v3, %v1428_v50  ;;  %v1431_v9 = vpop.f32.mrb[108].mxu1 }
 0x24d   : > { %7129 = vst [vmem:[#allocation75_spill] sm:$0xff] %v4816_v47  ;;  %2045 = vst [vmem:[%s4393_s7 + $0x350] sm:$0xff] %v4816_v47  ;;  %v1432_v17 = vadd.f32 %v1431_v9, %v994_v12  ;;  %v1433_v15 = vpop.f32.mrb[109].mxu1 }
 0x24e   : > { %7130 = vst [vmem:[#allocation76_spill] sm:$0xff] %v4818_v32  ;;  %v1880_v58 = vpop.f32.mrb[108].mxu0  ;;  %2046 = vst [vmem:[%s4393_s7 + $0x358] sm:$0xff] %v4818_v32  ;;  %v1434_v21 = vadd.f32 %v1433_v15, %v994_v12  ;;  %v1004_v15 = vpop.permute.xlu0 %1003 }
 0x24f   : > { %v1882_v46 = vpop.f32.mrb[109].mxu0  ;;  %v4824_v43 = vadd.f32 %v1880_v58, %v1432_v17 }
 0x250   : > { %v4826_v60 = vadd.f32 %v1882_v46, %v1434_v21  ;;  %v1437_v28 = vpop.f32.mrb[110].mxu1 }
 0x251   : > { %7131 = vst [vmem:[#allocation77_spill] sm:$0xff] %v4824_v43  ;;  %2047 = vst [vmem:[%s4393_s7 + $0x360] sm:$0xff] %v4824_v43  ;;  %v1438_v3 = vadd.f32 %v1437_v28, %v999_v30  ;;  %v1439_v50 = vpop.f32.mrb[111].mxu1 }
 0x252   : > { %7132 = vst [vmem:[#allocation78_spill] sm:$0xff] %v4826_v60  ;;  %v1886_v55 = vpop.f32.mrb[110].mxu0  ;;  %2048 = vst [vmem:[%s4393_s7 + $0x368] sm:$0xff] %v4826_v60  ;;  %v1440_v9 = vadd.f32 %v1439_v50, %v999_v30  ;;  %v1009_v50 = vpop.permute.xlu1 %1008 }
 0x253   : > { %v1888_v47 = vpop.f32.mrb[111].mxu0  ;;  %v4832_v12 = vadd.f32 %v1886_v55, %v1438_v3 }
 0x254   : > { %v4834_v58 = vadd.f32 %v1888_v47, %v1440_v9  ;;  %v1443_v17 = vpop.f32.mrb[112].mxu1 }
 0x255   : > { %7133 = vst [vmem:[#allocation79_spill] sm:$0xff] %v4832_v12  ;;  %2049 = vst [vmem:[%s4393_s7 + $0x370] sm:$0xff] %v4832_v12  ;;  %v1444_v46 = vadd.f32 %v1443_v17, %v1004_v15  ;;  %v1445_v21 = vpop.f32.mrb[113].mxu1 }
 0x256   : > { %7134 = vst [vmem:[#allocation80_spill] sm:$0xff] %v4834_v58  ;;  %v1892_v43 = vpop.f32.mrb[112].mxu0  ;;  %2050 = vst [vmem:[%s4393_s7 + $0x378] sm:$0xff] %v4834_v58  ;;  %v1446_v28 = vadd.f32 %v1445_v21, %v1004_v15  ;;  %v1014_v21 = vpop.permute.xlu0 %1013 }
 0x257   : > { %v1894_v32 = vpop.f32.mrb[113].mxu0  ;;  %v4840_v30 = vadd.f32 %v1892_v43, %v1444_v46 }
 0x258   : > { %v4842_v55 = vadd.f32 %v1894_v32, %v1446_v28  ;;  %v1449_v3 = vpop.f32.mrb[114].mxu1 }
 0x259   : > { %7135 = vst [vmem:[#allocation81_spill] sm:$0xff] %v4840_v30  ;;  %2051 = vst [vmem:[%s4393_s7 + $0x380] sm:$0xff] %v4840_v30  ;;  %v1450_v47 = vadd.f32 %v1449_v3, %v1009_v50  ;;  %v1451_v9 = vpop.f32.mrb[115].mxu1 }
 0x25a   : > { %7136 = vst [vmem:[#allocation82_spill] sm:$0xff] %v4842_v55  ;;  %v1898_v60 = vpop.f32.mrb[114].mxu0  ;;  %2052 = vst [vmem:[%s4393_s7 + $0x388] sm:$0xff] %v4842_v55  ;;  %v1452_v17 = vadd.f32 %v1451_v9, %v1009_v50  ;;  %v1019_v9 = vpop.permute.xlu1 %1018 }
 0x25b   : > { %v1900_v12 = vpop.f32.mrb[115].mxu0  ;;  %v4848_v15 = vadd.f32 %v1898_v60, %v1450_v47 }
 0x25c   : > { %v4850_v43 = vadd.f32 %v1900_v12, %v1452_v17  ;;  %v1455_v46 = vpop.f32.mrb[116].mxu1 }
 0x25d   : > { %7137 = vst [vmem:[#allocation83_spill] sm:$0xff] %v4848_v15  ;;  %2053 = vst [vmem:[%s4393_s7 + $0x390] sm:$0xff] %v4848_v15  ;;  %v1456_v32 = vadd.f32 %v1455_v46, %v1014_v21  ;;  %v1457_v28 = vpop.f32.mrb[117].mxu1 }
 0x25e   : > { %7138 = vst [vmem:[#allocation84_spill] sm:$0xff] %v4850_v43  ;;  %v1904_v30 = vpop.f32.mrb[116].mxu0  ;;  %2054 = vst [vmem:[%s4393_s7 + $0x398] sm:$0xff] %v4850_v43  ;;  %v1458_v3 = vadd.f32 %v1457_v28, %v1014_v21  ;;  %v1024_v28 = vpop.permute.xlu0 %1023 }
 0x25f   : > { %v1906_v58 = vpop.f32.mrb[117].mxu0  ;;  %v4856_v50 = vadd.f32 %v1904_v30, %v1456_v32 }
 0x260   : > { %v4858_v60 = vadd.f32 %v1906_v58, %v1458_v3  ;;  %v1461_v47 = vpop.f32.mrb[118].mxu1 }
 0x261   : > { %7139 = vst [vmem:[#allocation85_spill] sm:$0xff] %v4856_v50  ;;  %2055 = vst [vmem:[%s4393_s7 + $0x3a0] sm:$0xff] %v4856_v50  ;;  %v1462_v12 = vadd.f32 %v1461_v47, %v1019_v9  ;;  %v1463_v17 = vpop.f32.mrb[119].mxu1 }
 0x262   : > { %7140 = vst [vmem:[#allocation86_spill] sm:$0xff] %v4858_v60  ;;  %v1910_v55 = vpop.f32.mrb[118].mxu0  ;;  %2056 = vst [vmem:[%s4393_s7 + $0x3a8] sm:$0xff] %v4858_v60  ;;  %v1464_v46 = vadd.f32 %v1463_v17, %v1019_v9  ;;  %v1029_v17 = vpop.permute.xlu1 %1028 }
 0x263   : > { %v1912_v15 = vpop.f32.mrb[119].mxu0  ;;  %v4864_v21 = vadd.f32 %v1910_v55, %v1462_v12 }
 0x264   : > { %v4866_v30 = vadd.f32 %v1912_v15, %v1464_v46  ;;  %v1467_v32 = vpop.f32.mrb[120].mxu1 }
 0x265   : > { %7141 = vst [vmem:[#allocation87_spill] sm:$0xff] %v4864_v21  ;;  %2057 = vst [vmem:[%s4393_s7 + $0x3b0] sm:$0xff] %v4864_v21  ;;  %v1468_v58 = vadd.f32 %v1467_v32, %v1024_v28  ;;  %v1469_v3 = vpop.f32.mrb[121].mxu1 }
 0x266   : > { %7142 = vst [vmem:[#allocation88_spill] sm:$0xff] %v4866_v30  ;;  %v1916_v50 = vpop.f32.mrb[120].mxu0  ;;  %2058 = vst [vmem:[%s4393_s7 + $0x3b8] sm:$0xff] %v4866_v30  ;;  %v1470_v47 = vadd.f32 %v1469_v3, %v1024_v28  ;;  %v1034_v3 = vpop.permute.xlu0 %1033 }
 0x267   : > { %v1918_v43 = vpop.f32.mrb[121].mxu0  ;;  %v4872_v9 = vadd.f32 %v1916_v50, %v1468_v58 }
 0x268   : > { %v4874_v55 = vadd.f32 %v1918_v43, %v1470_v47  ;;  %v1473_v12 = vpop.f32.mrb[122].mxu1 }
 0x269   : > { %7143 = vst [vmem:[#allocation89_spill] sm:$0xff] %v4872_v9  ;;  %2059 = vst [vmem:[%s4393_s7 + $0x3c0] sm:$0xff] %v4872_v9  ;;  %v1474_v15 = vadd.f32 %v1473_v12, %v1029_v17  ;;  %v1475_v46 = vpop.f32.mrb[123].mxu1 }
 0x26a   : > { %7144 = vst [vmem:[#allocation90_spill] sm:$0xff] %v4874_v55  ;;  %v1922_v60 = vpop.f32.mrb[122].mxu0  ;;  %2060 = vst [vmem:[%s4393_s7 + $0x3c8] sm:$0xff] %v4874_v55  ;;  %v1476_v32 = vadd.f32 %v1475_v46, %v1029_v17 }
 0x26b   : > { %v1924_v21 = vpop.f32.mrb[123].mxu0  ;;  %v4880_v28 = vadd.f32 %v1922_v60, %v1474_v15  ;;  %v1039_v60 = vpop.permute.xlu1 %1038 }
 0x26c   : > { %v4882_v50 = vadd.f32 %v1924_v21, %v1476_v32  ;;  %v1479_v58 = vpop.f32.mrb[124].mxu1 }
 0x26d   : > { %7145 = vst [vmem:[#allocation91_spill] sm:$0xff] %v4880_v28  ;;  %2061 = vst [vmem:[%s4393_s7 + $0x3d0] sm:$0xff] %v4880_v28  ;;  %v1480_v43 = vadd.f32 %v1479_v58, %v1034_v3  ;;  %v1481_v47 = vpop.f32.mrb[125].mxu1 }
 0x26e   : > { %7146 = vst [vmem:[#allocation92_spill] sm:$0xff] %v4882_v50  ;;  %v1928_v9 = vpop.f32.mrb[124].mxu0  ;;  %2062 = vst [vmem:[%s4393_s7 + $0x3d8] sm:$0xff] %v4882_v50  ;;  %v1482_v12 = vadd.f32 %v1481_v47, %v1034_v3 }
 0x26f   : > { %v1930_v17 = vpop.f32.mrb[125].mxu0  ;;  %v4888_v46 = vadd.f32 %v1928_v9, %v1480_v43  ;;  %v3865_v9 = vmov (%p2067_p4), 0.0  }
 0x270   : > { %v4890_v15 = vadd.f32 %v1930_v17, %v1482_v12  ;;  %v1485_v21 = vpop.f32.mrb[126].mxu1  ;;  %2072 = sbr.rel (!%p2067_p4) target bundleno = 691 (0x2b3), region = 44  ;;  %2074 = vst.msk [vmem:[%s6886_s4] sm:$0xff] (%p2067_p4), %vm2073_vm0, %v3865_v9  ;;  %2075 = vst.msk [vmem:[%s6886_s4 + $0x8] sm:$0xff] (%p2067_p4), %vm2073_vm0, %v3865_v9 }
 0x271   : > { %2063 = vst [vmem:[%s4393_s7 + $0x3e0] sm:$0xff] %v4888_v46  ;;  %v1486_v32 = vadd.f32 %v1485_v21, %v1039_v60  ;;  %v1487_v55 = vpop.f32.mrb[127].mxu1  ;;  %2076 = vst.msk [vmem:[%s6886_s4 + $0x10] sm:$0xff] (%p2067_p4), %vm2073_vm0, %v3865_v9 }
 0x272   : > { %7147 = vst [vmem:[#allocation93_spill] sm:$0xff] %v4890_v15  ;;  %v1934_v28 = vpop.f32.mrb[126].mxu0  ;;  %2064 = vst [vmem:[%s4393_s7 + $0x3e8] sm:$0xff] %v4890_v15  ;;  %v1488_v58 = vadd.f32 %v1487_v55, %v1039_v60 }
 0x273   : > { %v1936_v30 = vpop.f32.mrb[127].mxu0  ;;  %v4896_v50 = vadd.f32 %v1934_v28, %v1486_v32  ;;  %2077 = vst.msk [vmem:[%s6886_s4 + $0x18] sm:$0xff] (%p2067_p4), %vm2073_vm0, %v3865_v9  ;;  %2078 = vst.msk [vmem:[%s6886_s4 + $0x20] sm:$0xff] (%p2067_p4), %vm2073_vm0, %v3865_v9 }
 0x274   : > { %v4898_v3 = vadd.f32 %v1936_v30, %v1488_v58  ;;  %2079 = vst.msk [vmem:[%s6886_s4 + $0x28] sm:$0xff] (%p2067_p4), %vm2073_vm0, %v3865_v9  ;;  %2080 = vst.msk [vmem:[%s6886_s4 + $0x30] sm:$0xff] (%p2067_p4), %vm2073_vm0, %v3865_v9 }
 0x275   : > { %2065 = vst [vmem:[%s4393_s7 + $0x3f0] sm:$0xff] %v4896_v50  ;;  %2081 = vst.msk [vmem:[%s6886_s4 + $0x38] sm:$0xff] (%p2067_p4), %vm2073_vm0, %v3865_v9 }
 0x276   : > { %7148 = vst [vmem:[#allocation94_spill] sm:$0xff] %v4898_v3  ;;  %2066 = vst [vmem:[%s4393_s7 + $0x3f8] sm:$0xff] %v4898_v3 }
 0x277   : > { %2082 = vst.msk [vmem:[%s6886_s4 + $0x40] sm:$0xff] %vm2073_vm0, %v3865_v9  ;;  %2083 = vst.msk [vmem:[%s6886_s4 + $0x48] sm:$0xff] %vm2073_vm0, %v3865_v9 }
 0x278   : > { %2084 = vst.msk [vmem:[%s6886_s4 + $0x50] sm:$0xff] %vm2073_vm0, %v3865_v9  ;;  %2085 = vst.msk [vmem:[%s6886_s4 + $0x58] sm:$0xff] %vm2073_vm0, %v3865_v9 }
 0x279   : > { %2086 = vst.msk [vmem:[%s6886_s4 + $0x60] sm:$0xff] %vm2073_vm0, %v3865_v9  ;;  %2087 = vst.msk [vmem:[%s6886_s4 + $0x68] sm:$0xff] %vm2073_vm0, %v3865_v9 }
 0x27a   : > { %2088 = vst.msk [vmem:[%s6886_s4 + $0x70] sm:$0xff] %vm2073_vm0, %v3865_v9  ;;  %2089 = vst.msk [vmem:[%s6886_s4 + $0x78] sm:$0xff] %vm2073_vm0, %v3865_v9 }
 0x27b   : > { %2090 = vst.msk [vmem:[%s6886_s4 + $0x80] sm:$0xff] %vm2073_vm0, %v3865_v9  ;;  %2091 = vst.msk [vmem:[%s6886_s4 + $0x88] sm:$0xff] %vm2073_vm0, %v3865_v9 }
 0x27c   : > { %2092 = vst.msk [vmem:[%s6886_s4 + $0x90] sm:$0xff] %vm2073_vm0, %v3865_v9  ;;  %2093 = vst.msk [vmem:[%s6886_s4 + $0x98] sm:$0xff] %vm2073_vm0, %v3865_v9 }
 0x27d   : > { %2094 = vst.msk [vmem:[%s6886_s4 + $0xa0] sm:$0xff] %vm2073_vm0, %v3865_v9  ;;  %2095 = vst.msk [vmem:[%s6886_s4 + $0xa8] sm:$0xff] %vm2073_vm0, %v3865_v9 }
 0x27e   : > { %2096 = vst.msk [vmem:[%s6886_s4 + $0xb0] sm:$0xff] %vm2073_vm0, %v3865_v9  ;;  %2097 = vst.msk [vmem:[%s6886_s4 + $0xb8] sm:$0xff] %vm2073_vm0, %v3865_v9 }
 0x27f   : > { %2098 = vst.msk [vmem:[%s6886_s4 + $0xc0] sm:$0xff] %vm2073_vm0, %v3865_v9  ;;  %2099 = vst.msk [vmem:[%s6886_s4 + $0xc8] sm:$0xff] %vm2073_vm0, %v3865_v9 }
 0x280   : > { %2100 = vst.msk [vmem:[%s6886_s4 + $0xd0] sm:$0xff] %vm2073_vm0, %v3865_v9  ;;  %2101 = vst.msk [vmem:[%s6886_s4 + $0xd8] sm:$0xff] %vm2073_vm0, %v3865_v9 }
 0x281   : > { %2102 = vst.msk [vmem:[%s6886_s4 + $0xe0] sm:$0xff] %vm2073_vm0, %v3865_v9  ;;  %2103 = vst.msk [vmem:[%s6886_s4 + $0xe8] sm:$0xff] %vm2073_vm0, %v3865_v9 }
 0x282   : > { %2104 = vst.msk [vmem:[%s6886_s4 + $0xf0] sm:$0xff] %vm2073_vm0, %v3865_v9  ;;  %2105 = vst.msk [vmem:[%s6886_s4 + $0xf8] sm:$0xff] %vm2073_vm0, %v3865_v9 }
 0x283   : > { %2106 = vst.msk [vmem:[%s6886_s4 + $0x100] sm:$0xff] %vm2073_vm0, %v3865_v9  ;;  %2107 = vst.msk [vmem:[%s6886_s4 + $0x108] sm:$0xff] %vm2073_vm0, %v3865_v9 }
 0x284   : > { %2108 = vst.msk [vmem:[%s6886_s4 + $0x110] sm:$0xff] %vm2073_vm0, %v3865_v9  ;;  %2109 = vst.msk [vmem:[%s6886_s4 + $0x118] sm:$0xff] %vm2073_vm0, %v3865_v9 }
 0x285   : > { %2110 = vst.msk [vmem:[%s6886_s4 + $0x120] sm:$0xff] %vm2073_vm0, %v3865_v9  ;;  %2111 = vst.msk [vmem:[%s6886_s4 + $0x128] sm:$0xff] %vm2073_vm0, %v3865_v9 }
 0x286   : > { %2112 = vst.msk [vmem:[%s6886_s4 + $0x130] sm:$0xff] %vm2073_vm0, %v3865_v9  ;;  %2113 = vst.msk [vmem:[%s6886_s4 + $0x138] sm:$0xff] %vm2073_vm0, %v3865_v9 }
 0x287   : > { %2114 = vst.msk [vmem:[%s6886_s4 + $0x140] sm:$0xff] %vm2073_vm0, %v3865_v9  ;;  %2115 = vst.msk [vmem:[%s6886_s4 + $0x148] sm:$0xff] %vm2073_vm0, %v3865_v9 }
 0x288   : > { %2116 = vst.msk [vmem:[%s6886_s4 + $0x150] sm:$0xff] %vm2073_vm0, %v3865_v9  ;;  %2117 = vst.msk [vmem:[%s6886_s4 + $0x158] sm:$0xff] %vm2073_vm0, %v3865_v9 }
 0x289   : > { %2118 = vst.msk [vmem:[%s6886_s4 + $0x160] sm:$0xff] %vm2073_vm0, %v3865_v9  ;;  %2119 = vst.msk [vmem:[%s6886_s4 + $0x168] sm:$0xff] %vm2073_vm0, %v3865_v9 }
 0x28a   : > { %2120 = vst.msk [vmem:[%s6886_s4 + $0x170] sm:$0xff] %vm2073_vm0, %v3865_v9  ;;  %2121 = vst.msk [vmem:[%s6886_s4 + $0x178] sm:$0xff] %vm2073_vm0, %v3865_v9 }
 0x28b   : > { %2122 = vst.msk [vmem:[%s6886_s4 + $0x180] sm:$0xff] %vm2073_vm0, %v3865_v9  ;;  %2123 = vst.msk [vmem:[%s6886_s4 + $0x188] sm:$0xff] %vm2073_vm0, %v3865_v9 }
 0x28c   : > { %2124 = vst.msk [vmem:[%s6886_s4 + $0x190] sm:$0xff] %vm2073_vm0, %v3865_v9  ;;  %2125 = vst.msk [vmem:[%s6886_s4 + $0x198] sm:$0xff] %vm2073_vm0, %v3865_v9 }
 0x28d   : > { %2126 = vst.msk [vmem:[%s6886_s4 + $0x1a0] sm:$0xff] %vm2073_vm0, %v3865_v9  ;;  %2127 = vst.msk [vmem:[%s6886_s4 + $0x1a8] sm:$0xff] %vm2073_vm0, %v3865_v9 }
 0x28e   : > { %2128 = vst.msk [vmem:[%s6886_s4 + $0x1b0] sm:$0xff] %vm2073_vm0, %v3865_v9  ;;  %2129 = vst.msk [vmem:[%s6886_s4 + $0x1b8] sm:$0xff] %vm2073_vm0, %v3865_v9 }
 0x28f   : > { %2130 = vst.msk [vmem:[%s6886_s4 + $0x1c0] sm:$0xff] %vm2073_vm0, %v3865_v9  ;;  %2131 = vst.msk [vmem:[%s6886_s4 + $0x1c8] sm:$0xff] %vm2073_vm0, %v3865_v9 }
 0x290   : > { %2132 = vst.msk [vmem:[%s6886_s4 + $0x1d0] sm:$0xff] %vm2073_vm0, %v3865_v9  ;;  %2133 = vst.msk [vmem:[%s6886_s4 + $0x1d8] sm:$0xff] %vm2073_vm0, %v3865_v9 }
 0x291   : > { %2134 = vst.msk [vmem:[%s6886_s4 + $0x1e0] sm:$0xff] %vm2073_vm0, %v3865_v9  ;;  %2135 = vst.msk [vmem:[%s6886_s4 + $0x1e8] sm:$0xff] %vm2073_vm0, %v3865_v9 }
 0x292   : > { %2136 = vst.msk [vmem:[%s6886_s4 + $0x1f0] sm:$0xff] %vm2073_vm0, %v3865_v9  ;;  %2137 = vst.msk [vmem:[%s6886_s4 + $0x1f8] sm:$0xff] %vm2073_vm0, %v3865_v9 }
 0x293   : > { %2138 = vst.msk [vmem:[%s6887_s5] sm:$0xff] %vm2073_vm0, %v3865_v9  ;;  %2139 = vst.msk [vmem:[%s6887_s5 + $0x8] sm:$0xff] %vm2073_vm0, %v3865_v9 }
 0x294   : > { %2140 = vst.msk [vmem:[%s6887_s5 + $0x10] sm:$0xff] %vm2073_vm0, %v3865_v9  ;;  %2141 = vst.msk [vmem:[%s6887_s5 + $0x18] sm:$0xff] %vm2073_vm0, %v3865_v9 }
 0x295   : > { %2142 = vst.msk [vmem:[%s6887_s5 + $0x20] sm:$0xff] %vm2073_vm0, %v3865_v9  ;;  %2143 = vst.msk [vmem:[%s6887_s5 + $0x28] sm:$0xff] %vm2073_vm0, %v3865_v9 }
 0x296   : > { %2144 = vst.msk [vmem:[%s6887_s5 + $0x30] sm:$0xff] %vm2073_vm0, %v3865_v9  ;;  %2145 = vst.msk [vmem:[%s6887_s5 + $0x38] sm:$0xff] %vm2073_vm0, %v3865_v9 }
 0x297   : > { %2146 = vst.msk [vmem:[%s6887_s5 + $0x40] sm:$0xff] %vm2073_vm0, %v3865_v9  ;;  %2147 = vst.msk [vmem:[%s6887_s5 + $0x48] sm:$0xff] %vm2073_vm0, %v3865_v9 }
 0x298   : > { %2148 = vst.msk [vmem:[%s6887_s5 + $0x50] sm:$0xff] %vm2073_vm0, %v3865_v9  ;;  %2149 = vst.msk [vmem:[%s6887_s5 + $0x58] sm:$0xff] %vm2073_vm0, %v3865_v9 }
 0x299   : > { %2150 = vst.msk [vmem:[%s6887_s5 + $0x60] sm:$0xff] %vm2073_vm0, %v3865_v9  ;;  %2151 = vst.msk [vmem:[%s6887_s5 + $0x68] sm:$0xff] %vm2073_vm0, %v3865_v9 }
 0x29a   : > { %2152 = vst.msk [vmem:[%s6887_s5 + $0x70] sm:$0xff] %vm2073_vm0, %v3865_v9  ;;  %2153 = vst.msk [vmem:[%s6887_s5 + $0x78] sm:$0xff] %vm2073_vm0, %v3865_v9 }
 0x29b   : > { %2154 = vst.msk [vmem:[%s6887_s5 + $0x80] sm:$0xff] %vm2073_vm0, %v3865_v9  ;;  %2155 = vst.msk [vmem:[%s6887_s5 + $0x88] sm:$0xff] %vm2073_vm0, %v3865_v9 }
 0x29c   : > { %2156 = vst.msk [vmem:[%s6887_s5 + $0x90] sm:$0xff] %vm2073_vm0, %v3865_v9  ;;  %2157 = vst.msk [vmem:[%s6887_s5 + $0x98] sm:$0xff] %vm2073_vm0, %v3865_v9 }
 0x29d   : > { %2158 = vst.msk [vmem:[%s6887_s5 + $0xa0] sm:$0xff] %vm2073_vm0, %v3865_v9  ;;  %2159 = vst.msk [vmem:[%s6887_s5 + $0xa8] sm:$0xff] %vm2073_vm0, %v3865_v9 }
 0x29e   : > { %2160 = vst.msk [vmem:[%s6887_s5 + $0xb0] sm:$0xff] %vm2073_vm0, %v3865_v9  ;;  %2161 = vst.msk [vmem:[%s6887_s5 + $0xb8] sm:$0xff] %vm2073_vm0, %v3865_v9 }
 0x29f   : > { %2162 = vst.msk [vmem:[%s6887_s5 + $0xc0] sm:$0xff] %vm2073_vm0, %v3865_v9  ;;  %2163 = vst.msk [vmem:[%s6887_s5 + $0xc8] sm:$0xff] %vm2073_vm0, %v3865_v9 }
 0x2a0   : > { %2164 = vst.msk [vmem:[%s6887_s5 + $0xd0] sm:$0xff] %vm2073_vm0, %v3865_v9  ;;  %2165 = vst.msk [vmem:[%s6887_s5 + $0xd8] sm:$0xff] %vm2073_vm0, %v3865_v9 }
 0x2a1   : > { %2166 = vst.msk [vmem:[%s6887_s5 + $0xe0] sm:$0xff] %vm2073_vm0, %v3865_v9  ;;  %2167 = vst.msk [vmem:[%s6887_s5 + $0xe8] sm:$0xff] %vm2073_vm0, %v3865_v9 }
 0x2a2   : > { %2168 = vst.msk [vmem:[%s6887_s5 + $0xf0] sm:$0xff] %vm2073_vm0, %v3865_v9  ;;  %2169 = vst.msk [vmem:[%s6887_s5 + $0xf8] sm:$0xff] %vm2073_vm0, %v3865_v9 }
 0x2a3   : > { %2170 = vst.msk [vmem:[%s6887_s5 + $0x100] sm:$0xff] %vm2073_vm0, %v3865_v9  ;;  %2171 = vst.msk [vmem:[%s6887_s5 + $0x108] sm:$0xff] %vm2073_vm0, %v3865_v9 }
 0x2a4   : > { %2172 = vst.msk [vmem:[%s6887_s5 + $0x110] sm:$0xff] %vm2073_vm0, %v3865_v9  ;;  %2173 = vst.msk [vmem:[%s6887_s5 + $0x118] sm:$0xff] %vm2073_vm0, %v3865_v9 }
 0x2a5   : > { %2174 = vst.msk [vmem:[%s6887_s5 + $0x120] sm:$0xff] %vm2073_vm0, %v3865_v9  ;;  %2175 = vst.msk [vmem:[%s6887_s5 + $0x128] sm:$0xff] %vm2073_vm0, %v3865_v9 }
 0x2a6   : > { %2176 = vst.msk [vmem:[%s6887_s5 + $0x130] sm:$0xff] %vm2073_vm0, %v3865_v9  ;;  %2177 = vst.msk [vmem:[%s6887_s5 + $0x138] sm:$0xff] %vm2073_vm0, %v3865_v9 }
 0x2a7   : > { %2178 = vst.msk [vmem:[%s6887_s5 + $0x140] sm:$0xff] %vm2073_vm0, %v3865_v9  ;;  %2179 = vst.msk [vmem:[%s6887_s5 + $0x148] sm:$0xff] %vm2073_vm0, %v3865_v9 }
 0x2a8   : > { %2180 = vst.msk [vmem:[%s6887_s5 + $0x150] sm:$0xff] %vm2073_vm0, %v3865_v9  ;;  %2181 = vst.msk [vmem:[%s6887_s5 + $0x158] sm:$0xff] %vm2073_vm0, %v3865_v9 }
 0x2a9   : > { %2182 = vst.msk [vmem:[%s6887_s5 + $0x160] sm:$0xff] %vm2073_vm0, %v3865_v9  ;;  %2183 = vst.msk [vmem:[%s6887_s5 + $0x168] sm:$0xff] %vm2073_vm0, %v3865_v9 }
 0x2aa   : > { %2184 = vst.msk [vmem:[%s6887_s5 + $0x170] sm:$0xff] %vm2073_vm0, %v3865_v9  ;;  %2185 = vst.msk [vmem:[%s6887_s5 + $0x178] sm:$0xff] %vm2073_vm0, %v3865_v9 }
 0x2ab   : > { %2186 = vst.msk [vmem:[%s6887_s5 + $0x180] sm:$0xff] %vm2073_vm0, %v3865_v9  ;;  %2187 = vst.msk [vmem:[%s6887_s5 + $0x188] sm:$0xff] %vm2073_vm0, %v3865_v9 }
 0x2ac   : > { %2188 = vst.msk [vmem:[%s6887_s5 + $0x190] sm:$0xff] %vm2073_vm0, %v3865_v9  ;;  %2189 = vst.msk [vmem:[%s6887_s5 + $0x198] sm:$0xff] %vm2073_vm0, %v3865_v9 }
 0x2ad   : > { %2190 = vst.msk [vmem:[%s6887_s5 + $0x1a0] sm:$0xff] %vm2073_vm0, %v3865_v9  ;;  %2191 = vst.msk [vmem:[%s6887_s5 + $0x1a8] sm:$0xff] %vm2073_vm0, %v3865_v9 }
 0x2ae   : > { %2192 = vst.msk [vmem:[%s6887_s5 + $0x1b0] sm:$0xff] %vm2073_vm0, %v3865_v9  ;;  %2193 = vst.msk [vmem:[%s6887_s5 + $0x1b8] sm:$0xff] %vm2073_vm0, %v3865_v9 }
 0x2af   : > { %2194 = vst.msk [vmem:[%s6887_s5 + $0x1c0] sm:$0xff] %vm2073_vm0, %v3865_v9  ;;  %2195 = vst.msk [vmem:[%s6887_s5 + $0x1c8] sm:$0xff] %vm2073_vm0, %v3865_v9 }
 0x2b0   : > { %2196 = vst.msk [vmem:[%s6887_s5 + $0x1d0] sm:$0xff] %vm2073_vm0, %v3865_v9  ;;  %2197 = vst.msk [vmem:[%s6887_s5 + $0x1d8] sm:$0xff] %vm2073_vm0, %v3865_v9 }
 0x2b1   : > { %2198 = vst.msk [vmem:[%s6887_s5 + $0x1e0] sm:$0xff] %vm2073_vm0, %v3865_v9  ;;  %2199 = vst.msk [vmem:[%s6887_s5 + $0x1e8] sm:$0xff] %vm2073_vm0, %v3865_v9 }
 0x2b2   : > { %2200 = vst.msk [vmem:[%s6887_s5 + $0x1f0] sm:$0xff] %vm2073_vm0, %v3865_v9  ;;  %2201 = vst.msk [vmem:[%s6887_s5 + $0x1f8] sm:$0xff] %vm2073_vm0, %v3865_v9 }
 0x2b3 PF: > { %v2272_v30 = vadd.f32 %v4409_v1, %v4407_v61  ;;  %v2266_v55 = vadd.f32 %v4389_v39, %v4387_v36  ;;  %v2275_v28 = vadd.f32 %v4417_v14, %v4415_v10  ;;  %v2269_v43 = vadd.f32 %v4401_v52, %v4399_v49  ;;  %s3244_s27 = sshll.u32 %s3848_s21, 14  ;;  %s3115_s26 = sshll.u32 %s4393_s7, 4  ;;  %s6391_s26 = int_to_ptr.vmem [resolvable:$true] %s3115_s26 }
 0x2b4   : > { %v2281_v47 = vadd.f32 %v4433_v42, %v4431_v37  ;;  %v2278_v12 = vadd.f32 %v4425_v27, %v4423_v23  ;;  %v2287_v17 = vadd.f32 %v4449_v8, %v4447_v4  ;;  %v2284_v60 = vadd.f32 %v4441_v57, %v4439_v53  ;;  %s6381_s14 = scalar_lea.hbm %s6885_s3, %s3244_s27  ;;  %s3100_s12 = scalar_lea.sflag [#allocation4], %s4051_s17 }
 0x2b5   : > { %2273 = vadd.xlane.f32.xlu1 %v2272_v30  ;;  %2267 = vadd.xlane.f32.xlu0 %v2266_v55  ;;  %v2293_v21 = vadd.f32 %v4465_v40, %v4463_v34  ;;  %v2290_v32 = vadd.f32 %v4457_v24, %v4455_v19  ;;  %v2299_v58 = vadd.f32 %v4481_v0, %v4479_v62  ;;  %vm2522_vm1 = vcmask 7168   ;;  %s3770_s24 = scalar_lea.vmem %s6391_s26, 16384  ;;  %s3866_s27 = smov [#allocation7]  }
 0x2b6   : > { %v2296_v9 = vadd.f32 %v4473_v51, %v4471_v48  ;;  %v2305_v30 = vadd.f32 %v4497_v26, %v4495_v22  ;;  %v2302_v55 = vadd.f32 %v4489_v13, %v4487_v11  ;;  %p3771_p6 = scmp.ne.s32.totalorder %s6391_s26, %s3770_s24  ;;  %s3774_s28 = sshll.u32 %s3866_s27, 4  ;;  %s3775_s28 = int_to_ptr.vmem [resolvable:$false] %s3774_s28 }
 0x2b7   : > { %s3776_s30 = scalar_lea.vmem %s3775_s28, 32768  ;;  %p3777_p11 = scmp.lt.s32.totalorder %s6391_s26, %s3775_s28 }
 0x2b8   : > { %p3772_p8 = pnand %p3771_p6, %p3995_p10  ;;  %p3778_p0 = scmp.lt.s32.totalorder %s3776_s30, %s3770_s24 }
 0x2b9   : > { %2276 = vadd.xlane.f32.xlu1 %v2275_v28  ;;  %2270 = vadd.xlane.f32.xlu0 %v2269_v43  ;;  %v2311_v28 = vadd.f32 %v4513_v56, %v4511_v54  ;;  %v2308_v43 = vadd.f32 %v4505_v41, %v4503_v35 }
 0x2ba   : > { %p3773_p12 = pneg %p3772_p8  ;;  %p3779_p5 = por %p3778_p0, %p3777_p11 }
 0x2bc   : > { %p3780_p9 = pnand %p3779_p5, %p3773_p12 }
 0x2bd   : > { %2282 = vadd.xlane.f32.xlu1 %v2281_v47  ;;  %2279 = vadd.xlane.f32.xlu0 %v2278_v12  ;;  %v2317_v47 = vadd.f32 %v4529_v25, %v4527_v20  ;;  %v2314_v12 = vadd.f32 %v4521_v7, %v4519_v5 }
 0x2c1   : > { %2288 = vadd.xlane.f32.xlu1 %v2287_v17  ;;  %2285 = vadd.xlane.f32.xlu0 %v2284_v60  ;;  %v2323_v17 = vadd.f32 %v4545_v63, %v4543_v59  ;;  %v2320_v60 = vadd.f32 %v4537_v44, %v4535_v38 }
 0x2c5   : > { %2294 = vadd.xlane.f32.xlu1 %v2293_v21  ;;  %2291 = vadd.xlane.f32.xlu0 %v2290_v32  ;;  %v2329_v21 = vadd.f32 %v4561_v45, %v4559_v33  ;;  %v2326_v32 = vadd.f32 %v4553_v18, %v4551_v16  ;;  %v7156_v18 = vld [vmem:[#allocation22_spill] sm:$0xff] }
 0x2c9   : > { %2300 = vadd.xlane.f32.xlu1 %v2299_v58  ;;  %2297 = vadd.xlane.f32.xlu0 %v2296_v9  ;;  %v2335_v58 = vadd.f32 %v4577_v31, %v4575_v29  ;;  %v2332_v9 = vadd.f32 %v4569_v6, %v4567_v2  ;;  %v7157_v31 = vld [vmem:[#allocation27_spill] sm:$0xff]  ;;  %v7158_v6 = vld [vmem:[#allocation28_spill] sm:$0xff]  ;;  %v7160_v2 = vld [vmem:[#allocation26_spill] sm:$0xff] }
 0x2cd   : > { %2306 = vadd.xlane.f32.xlu1 %v2305_v30  ;;  %2303 = vadd.xlane.f32.xlu0 %v2302_v55  ;;  %v7149_v30 = vld [vmem:[#allocation19_spill] sm:$0xff]  ;;  %v7150_v55 = vld [vmem:[#allocation20_spill] sm:$0xff] }
 0x2d1   : > { %2312 = vadd.xlane.f32.xlu1 %v2311_v28  ;;  %2309 = vadd.xlane.f32.xlu0 %v2308_v43  ;;  %v2341_v28 = vadd.f32 %v7150_v55, %v7149_v30  ;;  %v7151_v43 = vld [vmem:[#allocation17_spill] sm:$0xff]  ;;  %v7161_v55 = vld [vmem:[#allocation31_spill] sm:$0xff] }
 0x2d5   : > { %2318 = vadd.xlane.f32.xlu1 %v2317_v47  ;;  %2315 = vadd.xlane.f32.xlu0 %v2314_v12  ;;  %v7152_v47 = vld [vmem:[#allocation18_spill] sm:$0xff] }
 0x2d6   : > { %v2338_v12 = vadd.f32 %v7152_v47, %v7151_v43  ;;  %v7162_v47 = vld [vmem:[#allocation32_spill] sm:$0xff]  ;;  %v7164_v43 = vld [vmem:[#allocation30_spill] sm:$0xff] }
 0x2d9   : > { %2324 = vadd.xlane.f32.xlu1 %v2323_v17  ;;  %2321 = vadd.xlane.f32.xlu0 %v2320_v60  ;;  %v7153_v17 = vld [vmem:[#allocation23_spill] sm:$0xff]  ;;  %v7154_v60 = vld [vmem:[#allocation24_spill] sm:$0xff] }
 0x2dd   : > { %2330 = vadd.xlane.f32.xlu1 %v2329_v21  ;;  %2327 = vadd.xlane.f32.xlu0 %v2326_v32  ;;  %v2347_v21 = vadd.f32 %v7154_v60, %v7153_v17  ;;  %v7155_v32 = vld [vmem:[#allocation21_spill] sm:$0xff]  ;;  %v7165_v60 = vld [vmem:[#allocation35_spill] sm:$0xff] }
 0x2de   : > { %v2344_v16 = vadd.f32 %v7156_v18, %v7155_v32  ;;  %v7166_v18 = vld [vmem:[#allocation36_spill] sm:$0xff]  ;;  %v7168_v32 = vld [vmem:[#allocation34_spill] sm:$0xff] }
 0x2e1   : > { %2336 = vadd.xlane.f32.xlu1 %v2335_v58  ;;  %2333 = vadd.xlane.f32.xlu0 %v2332_v9  ;;  %v2353_v58 = vadd.f32 %v7158_v6, %v7157_v31  ;;  %v7159_v9 = vld [vmem:[#allocation25_spill] sm:$0xff]  ;;  %v7169_v6 = vld [vmem:[#allocation39_spill] sm:$0xff] }
 0x2e2   : > { %v2350_v29 = vadd.f32 %v7160_v2, %v7159_v9  ;;  %v7170_v2 = vld [vmem:[#allocation40_spill] sm:$0xff]  ;;  %v7172_v9 = vld [vmem:[#allocation38_spill] sm:$0xff] }
 0x2e5   : > { %2342 = vadd.xlane.f32.xlu1 %v2341_v28  ;;  %2339 = vadd.xlane.f32.xlu0 %v2338_v12  ;;  %v2359_v28 = vadd.f32 %v7162_v47, %v7161_v55  ;;  %v7163_v12 = vld [vmem:[#allocation29_spill] sm:$0xff]  ;;  %v7173_v47 = vld [vmem:[#allocation43_spill] sm:$0xff] }
 0x2e6   : > { %v2356_v30 = vadd.f32 %v7164_v43, %v7163_v12  ;;  %v7174_v43 = vld [vmem:[#allocation44_spill] sm:$0xff]  ;;  %v7176_v12 = vld [vmem:[#allocation42_spill] sm:$0xff] }
 0x2e9   : > { %2348 = vadd.xlane.f32.xlu1 %v2347_v21  ;;  %2345 = vadd.xlane.f32.xlu0 %v2344_v16  ;;  %v2365_v21 = vadd.f32 %v7166_v18, %v7165_v60  ;;  %v7167_v16 = vld [vmem:[#allocation33_spill] sm:$0xff]  ;;  %v7177_v18 = vld [vmem:[#allocation47_spill] sm:$0xff] }
 0x2ea   : > { %v2362_v17 = vadd.f32 %v7168_v32, %v7167_v16  ;;  %v7178_v32 = vld [vmem:[#allocation48_spill] sm:$0xff]  ;;  %v7180_v16 = vld [vmem:[#allocation46_spill] sm:$0xff] }
 0x2ed   : > { %2354 = vadd.xlane.f32.xlu1 %v2353_v58  ;;  %2351 = vadd.xlane.f32.xlu0 %v2350_v29  ;;  %v2371_v58 = vadd.f32 %v7170_v2, %v7169_v6  ;;  %v7171_v29 = vld [vmem:[#allocation37_spill] sm:$0xff]  ;;  %v7181_v2 = vld [vmem:[#allocation51_spill] sm:$0xff] }
 0x2ee   : > { %v2368_v31 = vadd.f32 %v7172_v9, %v7171_v29  ;;  %v7182_v9 = vld [vmem:[#allocation52_spill] sm:$0xff]  ;;  %v7184_v29 = vld [vmem:[#allocation50_spill] sm:$0xff] }
 0x2f1   : > { %2360 = vadd.xlane.f32.xlu1 %v2359_v28  ;;  %2357 = vadd.xlane.f32.xlu0 %v2356_v30  ;;  %v2377_v28 = vadd.f32 %v7174_v43, %v7173_v47  ;;  %v7175_v30 = vld [vmem:[#allocation41_spill] sm:$0xff]  ;;  %v7185_v43 = vld [vmem:[#allocation55_spill] sm:$0xff] }
 0x2f2   : > { %v2374_v55 = vadd.f32 %v7176_v12, %v7175_v30  ;;  %v7186_v12 = vld [vmem:[#allocation56_spill] sm:$0xff]  ;;  %v7188_v30 = vld [vmem:[#allocation54_spill] sm:$0xff] }
 0x2f5   : > { %2366 = vadd.xlane.f32.xlu1 %v2365_v21  ;;  %2363 = vadd.xlane.f32.xlu0 %v2362_v17  ;;  %v2383_v21 = vadd.f32 %v7178_v32, %v7177_v18  ;;  %v7179_v17 = vld [vmem:[#allocation45_spill] sm:$0xff]  ;;  %v7189_v32 = vld [vmem:[#allocation59_spill] sm:$0xff] }
 0x2f6   : > { %v2380_v60 = vadd.f32 %v7180_v16, %v7179_v17  ;;  %v7190_v16 = vld [vmem:[#allocation60_spill] sm:$0xff]  ;;  %v7192_v17 = vld [vmem:[#allocation58_spill] sm:$0xff] }
 0x2f9   : > { %2372 = vadd.xlane.f32.xlu1 %v2371_v58  ;;  %2369 = vadd.xlane.f32.xlu0 %v2368_v31  ;;  %v2389_v58 = vadd.f32 %v7182_v9, %v7181_v2  ;;  %v7183_v31 = vld [vmem:[#allocation49_spill] sm:$0xff]  ;;  %v7193_v9 = vld [vmem:[#allocation63_spill] sm:$0xff] }
 0x2fa   : > { %v2386_v6 = vadd.f32 %v7184_v29, %v7183_v31  ;;  %v7194_v29 = vld [vmem:[#allocation64_spill] sm:$0xff]  ;;  %v7196_v31 = vld [vmem:[#allocation62_spill] sm:$0xff] }
 0x2fd   : > { %2378 = vadd.xlane.f32.xlu1 %v2377_v28  ;;  %2375 = vadd.xlane.f32.xlu0 %v2374_v55  ;;  %v2395_v28 = vadd.f32 %v7186_v12, %v7185_v43  ;;  %v7187_v55 = vld [vmem:[#allocation53_spill] sm:$0xff]  ;;  %v7197_v12 = vld [vmem:[#allocation67_spill] sm:$0xff] }
 0x2fe   : > { %v2392_v47 = vadd.f32 %v7188_v30, %v7187_v55  ;;  %v7198_v30 = vld [vmem:[#allocation68_spill] sm:$0xff]  ;;  %v7200_v55 = vld [vmem:[#allocation66_spill] sm:$0xff] }
 0x301   : > { %2384 = vadd.xlane.f32.xlu1 %v2383_v21  ;;  %2381 = vadd.xlane.f32.xlu0 %v2380_v60  ;;  %v2401_v21 = vadd.f32 %v7190_v16, %v7189_v32  ;;  %v7191_v60 = vld [vmem:[#allocation57_spill] sm:$0xff]  ;;  %v7201_v16 = vld [vmem:[#allocation71_spill] sm:$0xff] }
 0x302   : > { %v2398_v18 = vadd.f32 %v7192_v17, %v7191_v60  ;;  %v7202_v17 = vld [vmem:[#allocation72_spill] sm:$0xff]  ;;  %v7204_v60 = vld [vmem:[#allocation70_spill] sm:$0xff] }
 0x305   : > { %2390 = vadd.xlane.f32.xlu1 %v2389_v58  ;;  %2387 = vadd.xlane.f32.xlu0 %v2386_v6  ;;  %v2407_v58 = vadd.f32 %v7194_v29, %v7193_v9  ;;  %v7195_v6 = vld [vmem:[#allocation61_spill] sm:$0xff]  ;;  %v7205_v29 = vld [vmem:[#allocation75_spill] sm:$0xff] }
 0x306   : > { %v2404_v2 = vadd.f32 %v7196_v31, %v7195_v6  ;;  %v7206_v31 = vld [vmem:[#allocation76_spill] sm:$0xff]  ;;  %v7208_v6 = vld [vmem:[#allocation74_spill] sm:$0xff] }
 0x309   : > { %2396 = vadd.xlane.f32.xlu1 %v2395_v28  ;;  %2393 = vadd.xlane.f32.xlu0 %v2392_v47  ;;  %v2413_v28 = vadd.f32 %v7198_v30, %v7197_v12  ;;  %v7199_v47 = vld [vmem:[#allocation65_spill] sm:$0xff]  ;;  %v7209_v30 = vld [vmem:[#allocation79_spill] sm:$0xff] }
 0x30a   : > { %v2410_v43 = vadd.f32 %v7200_v55, %v7199_v47  ;;  %v7210_v55 = vld [vmem:[#allocation80_spill] sm:$0xff]  ;;  %v7212_v47 = vld [vmem:[#allocation78_spill] sm:$0xff] }
 0x30d   : > { %2402 = vadd.xlane.f32.xlu1 %v2401_v21  ;;  %2399 = vadd.xlane.f32.xlu0 %v2398_v18  ;;  %v2419_v21 = vadd.f32 %v7202_v17, %v7201_v16  ;;  %v7203_v18 = vld [vmem:[#allocation69_spill] sm:$0xff]  ;;  %v7213_v17 = vld [vmem:[#allocation83_spill] sm:$0xff] }
 0x30e   : > { %v2416_v32 = vadd.f32 %v7204_v60, %v7203_v18  ;;  %v7214_v60 = vld [vmem:[#allocation84_spill] sm:$0xff]  ;;  %v7216_v18 = vld [vmem:[#allocation82_spill] sm:$0xff] }
 0x311   : > { %2408 = vadd.xlane.f32.xlu1 %v2407_v58  ;;  %2405 = vadd.xlane.f32.xlu0 %v2404_v2  ;;  %v2425_v58 = vadd.f32 %v7206_v31, %v7205_v29  ;;  %v7207_v2 = vld [vmem:[#allocation73_spill] sm:$0xff]  ;;  %v7217_v31 = vld [vmem:[#allocation87_spill] sm:$0xff] }
 0x312   : > { %v2422_v9 = vadd.f32 %v7208_v6, %v7207_v2  ;;  %v7218_v6 = vld [vmem:[#allocation88_spill] sm:$0xff]  ;;  %v7220_v2 = vld [vmem:[#allocation86_spill] sm:$0xff] }
 0x315   : > { %2414 = vadd.xlane.f32.xlu1 %v2413_v28  ;;  %2411 = vadd.xlane.f32.xlu0 %v2410_v43  ;;  %v2431_v28 = vadd.f32 %v7210_v55, %v7209_v30  ;;  %v7211_v43 = vld [vmem:[#allocation77_spill] sm:$0xff]  ;;  %v7221_v55 = vld [vmem:[#allocation91_spill] sm:$0xff] }
 0x316   : > { %v2428_v12 = vadd.f32 %v7212_v47, %v7211_v43  ;;  %v7222_v47 = vld [vmem:[#allocation92_spill] sm:$0xff]  ;;  %v7224_v43 = vld [vmem:[#allocation90_spill] sm:$0xff] }
 0x319   : > { %2420 = vadd.xlane.f32.xlu1 %v2419_v21  ;;  %2417 = vadd.xlane.f32.xlu0 %v2416_v32  ;;  %v2437_v21 = vadd.f32 %v7214_v60, %v7213_v17  ;;  %v7215_v32 = vld [vmem:[#allocation81_spill] sm:$0xff]  ;;  %v2455_v60 = vadd.f32 %v4898_v3, %v4896_v50  ;;  %v2657_v3 = vmul.f32 %v4415_v10, %v4415_v10 }
 0x31a   : > { %v2434_v16 = vadd.f32 %v7216_v18, %v7215_v32  ;;  %v2662_v10 = vmul.f32 %v4433_v42, %v4433_v42 }
 0x31d   : > { %2426 = vadd.xlane.f32.xlu1 %v2425_v58  ;;  %2423 = vadd.xlane.f32.xlu0 %v2422_v9  ;;  %v2443_v58 = vadd.f32 %v7218_v6, %v7217_v31  ;;  %v7219_v9 = vld [vmem:[#allocation85_spill] sm:$0xff] }
 0x31e   : > { %v2440_v29 = vadd.f32 %v7220_v2, %v7219_v9 }
 0x321   : > { %2432 = vadd.xlane.f32.xlu1 %v2431_v28  ;;  %2429 = vadd.xlane.f32.xlu0 %v2428_v12  ;;  %v2449_v28 = vadd.f32 %v7222_v47, %v7221_v55  ;;  %v7223_v12 = vld [vmem:[#allocation89_spill] sm:$0xff] }
 0x322   : > { %v2446_v30 = vadd.f32 %v7224_v43, %v7223_v12  ;;  %v2652_v43 = vmul.f32 %v4389_v39, %v4389_v39  ;;  %v2661_v39 = vmul.f32 %v4431_v37, %v4431_v37  ;;  %v2663_v37 = vmul.f32 %v4439_v53, %v4439_v53 }
 0x323   : > { %v2667_v53 = vmul.f32 %v4455_v19, %v4455_v19 }
 0x324   : > { %v2794_v42 = vadd.f32 %v2662_v10, %v2661_v39  ;;  %v2675_v10 = vmul.f32 %v4487_v11, %v4487_v11  ;;  %v2682_v11 = vmul.f32 %v4513_v56, %v4513_v56 }
 0x325   : > { %2438 = vadd.xlane.f32.xlu1 %v2437_v21  ;;  %2435 = vadd.xlane.f32.xlu0 %v2434_v16  ;;  %v2452_v16 = vadd.f32 %v4890_v15, %v4888_v46  ;;  %v2653_v21 = vmul.f32 %v4399_v49, %v4399_v49  ;;  %v2658_v15 = vmul.f32 %v4417_v14, %v4417_v14 }
 0x326   : > { %v2655_v49 = vmul.f32 %v4407_v61, %v4407_v61  ;;  %v2659_v61 = vmul.f32 %v4423_v23, %v4423_v23 }
 0x329   : > { %2444 = vadd.xlane.f32.xlu1 %v2443_v58  ;;  %2441 = vadd.xlane.f32.xlu0 %v2440_v29  ;;  %v2654_v29 = vmul.f32 %v4401_v52, %v4401_v52  ;;  %v2651_v58 = vmul.f32 %v4387_v36, %v4387_v36  ;;  %v2656_v52 = vmul.f32 %v4409_v1, %v4409_v1 }
 0x32a   : > { %v2788_v36 = vadd.f32 %v2658_v15, %v2657_v3  ;;  %v2666_v1 = vmul.f32 %v4449_v8, %v4449_v8  ;;  %v2664_v3 = vmul.f32 %v4441_v57, %v4441_v57  ;;  %v2204_v57 = vld [vmem:[%s6886_s4 + $0x10] sm:$0xff] }
 0x32b   : > { %v2785_v14 = vadd.f32 %v2656_v52, %v2655_v49 }
 0x32c   : > { %v2797_v8 = vadd.f32 %v2664_v3, %v2663_v37 }
 0x32d   : > { %2450 = vadd.xlane.f32.xlu1 %v2449_v28  ;;  %2447 = vadd.xlane.f32.xlu0 %v2446_v30  ;;  %v2782_v30 = vadd.f32 %v2654_v29, %v2653_v21  ;;  %v2779_v28 = vadd.f32 %v2652_v43, %v2651_v58  ;;  %v2665_v43 = vmul.f32 %v4447_v4, %v4447_v4 }
 0x32e   : > { %v2670_v4 = vmul.f32 %v4465_v40, %v4465_v40  ;;  %v2673_v40 = vmul.f32 %v4479_v62, %v4479_v62  ;;  %v2674_v29 = vmul.f32 %v4481_v0, %v4481_v0  ;;  %v2672_v58 = vmul.f32 %v4473_v51, %v4473_v51  ;;  %v2205_v62 = vld [vmem:[%s6886_s4 + $0x18] sm:$0xff]  ;;  %v2203_v0 = vld [vmem:[%s6886_s4 + $0x8] sm:$0xff] }
 0x32f   : > { %v2800_v23 = vadd.f32 %v2666_v1, %v2665_v43  ;;  %v2678_v51 = vmul.f32 %v4497_v26, %v4497_v26  ;;  %v2207_v43 = vld [vmem:[%s6886_s4 + $0x28] sm:$0xff]  ;;  %v2206_v1 = vld [vmem:[%s6886_s4 + $0x20] sm:$0xff] }
 0x331   : > { %2456 = vadd.xlane.f32.xlu1 %v2455_v60  ;;  %2453 = vadd.xlane.f32.xlu0 %v2452_v16  ;;  %v2660_v60 = vmul.f32 %v4425_v27, %v4425_v27  ;;  %v2669_v27 = vmul.f32 %v4463_v34, %v4463_v34  ;;  %v2668_v16 = vmul.f32 %v4457_v24, %v4457_v24  ;;  %v2202_v34 = vld [vmem:[%s6886_s4] sm:$0xff] }
 0x332   : > { %v2671_v24 = vmul.f32 %v4471_v48, %v4471_v48  ;;  %v2677_v48 = vmul.f32 %v4495_v22, %v4495_v22  ;;  %v2676_v22 = vmul.f32 %v4489_v13, %v4489_v13 }
 0x333   : > { %v2791_v15 = vadd.f32 %v2660_v60, %v2659_v61  ;;  %v2806_v21 = vadd.f32 %v2670_v4, %v2669_v27  ;;  %v2803_v19 = vadd.f32 %v2668_v16, %v2667_v53  ;;  %v2209_v4 = vld [vmem:[%s6886_s4 + $0x38] sm:$0xff]  ;;  %v2685_v53 = vmul.f32 %v4527_v20, %v4527_v20 }
 0x334   : > { %v2809_v39 = vadd.f32 %v2672_v58, %v2671_v24  ;;  %v2818_v37 = vadd.f32 %v2678_v51, %v2677_v48  ;;  %v2815_v13 = vadd.f32 %v2676_v22, %v2675_v10  ;;  %v2684_v16 = vmul.f32 %v4521_v7, %v4521_v7  ;;  %v2211_v7 = vld [vmem:[%s6886_s4 + $0x48] sm:$0xff]  ;;  %v7225_v48 = vld [vmem:[#allocation11_spill] sm:$0xff] }
 0x335   : > { %2783 = vadd.xlane.f32.xlu1 %v2782_v30  ;;  %2780 = vadd.xlane.f32.xlu0 %v2779_v28  ;;  %v2689_v24 = vmul.f32 %v4543_v59, %v4543_v59  ;;  %v2690_v58 = vmul.f32 %v4545_v63, %v4545_v63  ;;  %v2688_v59 = vmul.f32 %v4537_v44, %v4537_v44  ;;  %v7226_v51 = vld [vmem:[#allocation12_spill] sm:$0xff] }
 0x336   : > { %v2693_v63 = vmul.f32 %v4559_v33, %v4559_v33  ;;  %v2691_v44 = vmul.f32 %v7225_v48, %v7225_v48  ;;  %v7238_v48 = vld [vmem:[#allocation22_spill] sm:$0xff] }
 0x337   : > { %v2836_v33 = vadd.f32 %v2690_v58, %v2689_v24 }
 0x339   : > { %2789 = vadd.xlane.f32.xlu1 %v2788_v36  ;;  %2786 = vadd.xlane.f32.xlu0 %v2785_v14  ;;  %v2812_v36 = vadd.f32 %v2674_v29, %v2673_v40  ;;  %v2210_v40 = vld [vmem:[%s6886_s4 + $0x40] sm:$0xff] }
 0x33d   : > { %2795 = vadd.xlane.f32.xlu1 %v2794_v42  ;;  %2792 = vadd.xlane.f32.xlu0 %v2791_v15  ;;  %v2681_v42 = vmul.f32 %v4511_v54, %v4511_v54  ;;  %v2679_v15 = vmul.f32 %v4503_v35, %v4503_v35  ;;  %v2680_v54 = vmul.f32 %v4505_v41, %v4505_v41 }
 0x33e   : > { %v2686_v35 = vmul.f32 %v4529_v25, %v4529_v25  ;;  %v2683_v41 = vmul.f32 %v4519_v5, %v4519_v5 }
 0x33f   : > { %v2824_v20 = vadd.f32 %v2682_v11, %v2681_v42  ;;  %v2821_v25 = vadd.f32 %v2680_v54, %v2679_v15  ;;  %v7228_v11 = vld [vmem:[#allocation16_spill] sm:$0xff]  ;;  %v7229_v15 = vld [vmem:[#allocation13_spill] sm:$0xff] }
 0x340   : > { %v2830_v29 = vadd.f32 %v2686_v35, %v2685_v53  ;;  %v2695_v54 = vmul.f32 %v7229_v15, %v7229_v15  ;;  %v2217_v53 = vld [vmem:[%s6886_s4 + $0x78] sm:$0xff]  ;;  %v2216_v35 = vld [vmem:[%s6886_s4 + $0x70] sm:$0xff] }
 0x341   : > { %2801 = vadd.xlane.f32.xlu1 %v2800_v23  ;;  %2798 = vadd.xlane.f32.xlu0 %v2797_v8  ;;  %v2208_v8 = vld [vmem:[%s6886_s4 + $0x30] sm:$0xff] }
 0x342   : > { %v2274_v49 = vpop.xlane.xlu1 %2273  ;;  %v2268_v30 = vpop.xlane.xlu0 %2267 }
 0x343   : > { %v2460_v28 = vadd.f32 %v2274_v49, %v2204_v57  ;;  %v2458_v52 = vadd.f32 %v2268_v30, %v2202_v34  ;;  %v2687_v49 = vmul.f32 %v4535_v38, %v4535_v38  ;;  %v2694_v38 = vmul.f32 %v4561_v45, %v4561_v45 }
 0x345   : > { %2525 = vst.msk [vmem:[%s6886_s4 + $0x10] sm:$0xff] %vm2522_vm1, %v2460_v28  ;;  %2523 = vst.msk [vmem:[%s6886_s4] sm:$0xff] %vm2522_vm1, %v2458_v52  ;;  %2807 = vadd.xlane.f32.xlu1 %v2806_v21  ;;  %2804 = vadd.xlane.f32.xlu0 %v2803_v19  ;;  %v2827_v19 = vadd.f32 %v2684_v16, %v2683_v41  ;;  %v2833_v45 = vadd.f32 %v2688_v59, %v2687_v49  ;;  %v7231_v41 = vld [vmem:[#allocation19_spill] sm:$0xff]  ;;  %v2219_v49 = vld [vmem:[%s6886_s4 + $0x88] sm:$0xff] }
 0x346   : > { %v2277_v26 = vpop.xlane.xlu1 %2276  ;;  %v2271_v14 = vpop.xlane.xlu0 %2270  ;;  %v2701_v16 = vmul.f32 %v7231_v41, %v7231_v41  ;;  %v2218_v59 = vld [vmem:[%s6886_s4 + $0x80] sm:$0xff]  ;;  %v7244_v41 = vld [vmem:[#allocation32_spill] sm:$0xff] }
 0x347   : > { %v2461_v61 = vadd.f32 %v2277_v26, %v2205_v62  ;;  %v2459_v60 = vadd.f32 %v2271_v14, %v2203_v0  ;;  %v2213_v0 = vld [vmem:[%s6886_s4 + $0x58] sm:$0xff] }
 0x349   : > { %2526 = vst.msk [vmem:[%s6886_s4 + $0x18] sm:$0xff] %vm2522_vm1, %v2461_v61  ;;  %2524 = vst.msk [vmem:[%s6886_s4 + $0x8] sm:$0xff] %vm2522_vm1, %v2459_v60  ;;  %2813 = vadd.xlane.f32.xlu1 %v2812_v36  ;;  %2810 = vadd.xlane.f32.xlu0 %v2809_v39  ;;  %v2212_v36 = vld [vmem:[%s6886_s4 + $0x50] sm:$0xff]  ;;  %v2692_v39 = vmul.f32 %v7226_v51, %v7226_v51  ;;  %v2215_v61 = vld [vmem:[%s6886_s4 + $0x68] sm:$0xff] }
 0x34a   : > { %v2283_v56 = vpop.xlane.xlu1 %2282  ;;  %v2280_v3 = vpop.xlane.xlu0 %2279  ;;  %v2214_v60 = vld [vmem:[%s6886_s4 + $0x60] sm:$0xff] }
 0x34b   : > { %v2463_v23 = vadd.f32 %v2283_v56, %v2207_v43  ;;  %v2462_v27 = vadd.f32 %v2280_v3, %v2206_v1  ;;  %v2842_v43 = vadd.f32 %v2694_v38, %v2693_v63  ;;  %v2839_v1 = vadd.f32 %v2692_v39, %v2691_v44  ;;  %v7230_v56 = vld [vmem:[#allocation14_spill] sm:$0xff]  ;;  %v7237_v63 = vld [vmem:[#allocation21_spill] sm:$0xff] }
 0x34c   : > { %v2696_v3 = vmul.f32 %v7230_v56, %v7230_v56  ;;  %v2703_v38 = vmul.f32 %v7237_v63, %v7237_v63  ;;  %v2704_v44 = vmul.f32 %v7238_v48, %v7238_v48 }
 0x34d   : > { %2528 = vst.msk [vmem:[%s6886_s4 + $0x28] sm:$0xff] %vm2522_vm1, %v2463_v23  ;;  %2527 = vst.msk [vmem:[%s6886_s4 + $0x20] sm:$0xff] %vm2522_vm1, %v2462_v27  ;;  %2819 = vadd.xlane.f32.xlu1 %v2818_v37  ;;  %2816 = vadd.xlane.f32.xlu0 %v2815_v13  ;;  %v7227_v37 = vld [vmem:[#allocation15_spill] sm:$0xff]  ;;  %v2698_v13 = vmul.f32 %v7228_v11, %v7228_v11 }
 0x34e   : > { %v2289_v57 = vpop.xlane.xlu1 %2288  ;;  %v2286_v34 = vpop.xlane.xlu0 %2285  ;;  %v2697_v42 = vmul.f32 %v7227_v37, %v7227_v37  ;;  %v7242_v37 = vld [vmem:[#allocation26_spill] sm:$0xff] }
 0x34f   : > { %v2465_v5 = vadd.f32 %v2289_v57, %v2209_v4  ;;  %v2464_v21 = vadd.f32 %v2286_v34, %v2208_v8  ;;  %v7233_v57 = vld [vmem:[#allocation17_spill] sm:$0xff] }
 0x350   : > { %v2699_v34 = vmul.f32 %v7233_v57, %v7233_v57  ;;  %v7246_v57 = vld [vmem:[#allocation30_spill] sm:$0xff] }
 0x351   : > { %2530 = vst.msk [vmem:[%s6886_s4 + $0x38] sm:$0xff] %vm2522_vm1, %v2465_v5  ;;  %2529 = vst.msk [vmem:[%s6886_s4 + $0x30] sm:$0xff] %vm2522_vm1, %v2464_v21  ;;  %2825 = vadd.xlane.f32.xlu1 %v2824_v20  ;;  %2822 = vadd.xlane.f32.xlu0 %v2821_v25  ;;  %v7232_v20 = vld [vmem:[#allocation20_spill] sm:$0xff]  ;;  %v7234_v5 = vld [vmem:[#allocation18_spill] sm:$0xff] }
 0x352   : > { %v2295_v30 = vpop.xlane.xlu1 %2294  ;;  %v2292_v28 = vpop.xlane.xlu0 %2291  ;;  %v2702_v25 = vmul.f32 %v7232_v20, %v7232_v20  ;;  %v2700_v21 = vmul.f32 %v7234_v5, %v7234_v5  ;;  %v7245_v20 = vld [vmem:[#allocation29_spill] sm:$0xff] }
 0x353   : > { %v2467_v52 = vadd.f32 %v2295_v30, %v2211_v7  ;;  %v2466_v62 = vadd.f32 %v2292_v28, %v2210_v40  ;;  %v2848_v7 = vadd.f32 %v2698_v13, %v2697_v42  ;;  %v2845_v40 = vadd.f32 %v2696_v3, %v2695_v54 }
 0x354   : > { %v2854_v30 = vadd.f32 %v2702_v25, %v2701_v16  ;;  %v2851_v28 = vadd.f32 %v2700_v21, %v2699_v34  ;;  %v2708_v42 = vmul.f32 %v7242_v37, %v7242_v37  ;;  %v2857_v13 = vadd.f32 %v2704_v44, %v2703_v38 }
 0x355   : > { %2532 = vst.msk [vmem:[%s6886_s4 + $0x48] sm:$0xff] %vm2522_vm1, %v2467_v52  ;;  %2531 = vst.msk [vmem:[%s6886_s4 + $0x40] sm:$0xff] %vm2522_vm1, %v2466_v62  ;;  %2831 = vadd.xlane.f32.xlu1 %v2830_v29  ;;  %2828 = vadd.xlane.f32.xlu0 %v2827_v19  ;;  %v7235_v52 = vld [vmem:[#allocation23_spill] sm:$0xff]  ;;  %v2714_v16 = vmul.f32 %v7244_v41, %v7244_v41  ;;  %v2711_v25 = vmul.f32 %v7245_v20, %v7245_v20 }
 0x356   : > { %v2301_v10 = vpop.xlane.xlu1 %2300  ;;  %v2298_v22 = vpop.xlane.xlu0 %2297  ;;  %v2705_v62 = vmul.f32 %v7235_v52, %v7235_v52  ;;  %v2712_v34 = vmul.f32 %v7246_v57, %v7246_v57  ;;  %v7250_v52 = vld [vmem:[#allocation34_spill] sm:$0xff] }
 0x357   : > { %v2469_v26 = vadd.f32 %v2301_v10, %v2213_v0  ;;  %v2468_v14 = vadd.f32 %v2298_v22, %v2212_v36  ;;  %v7236_v0 = vld [vmem:[#allocation24_spill] sm:$0xff]  ;;  %v2221_v10 = vld [vmem:[%s6886_s4 + $0x98] sm:$0xff]  ;;  %v2220_v22 = vld [vmem:[%s6886_s4 + $0x90] sm:$0xff] }
 0x358   : > { %v2706_v36 = vmul.f32 %v7236_v0, %v7236_v0 }
 0x359   : > { %2534 = vst.msk [vmem:[%s6886_s4 + $0x58] sm:$0xff] %vm2522_vm1, %v2469_v26  ;;  %2533 = vst.msk [vmem:[%s6886_s4 + $0x50] sm:$0xff] %vm2522_vm1, %v2468_v14  ;;  %2837 = vadd.xlane.f32.xlu1 %v2836_v33  ;;  %2834 = vadd.xlane.f32.xlu0 %v2833_v45  ;;  %v7239_v26 = vld [vmem:[#allocation27_spill] sm:$0xff] }
 0x35a   : > { %v2307_v23 = vpop.xlane.xlu1 %2306  ;;  %v2304_v27 = vpop.xlane.xlu0 %2303  ;;  %v2709_v14 = vmul.f32 %v7239_v26, %v7239_v26  ;;  %v2860_v11 = vadd.f32 %v2706_v36, %v2705_v62  ;;  %v2716_v62 = vmul.f32 %v7250_v52, %v7250_v52  ;;  %v2869_v36 = vadd.f32 %v2712_v34, %v2711_v25  ;;  %v7252_v26 = vld [vmem:[#allocation40_spill] sm:$0xff] }
 0x35b   : > { %v2471_v4 = vadd.f32 %v2307_v23, %v2215_v61  ;;  %v2470_v8 = vadd.f32 %v2304_v27, %v2214_v60  ;;  %v7240_v61 = vld [vmem:[#allocation28_spill] sm:$0xff]  ;;  %v2222_v27 = vld [vmem:[%s6886_s4 + $0xa0] sm:$0xff] }
 0x35c   : > { %v2710_v60 = vmul.f32 %v7240_v61, %v7240_v61  ;;  %v2223_v23 = vld [vmem:[%s6886_s4 + $0xa8] sm:$0xff]  ;;  %v7253_v61 = vld [vmem:[#allocation37_spill] sm:$0xff] }
 0x35d   : > { %2536 = vst.msk [vmem:[%s6886_s4 + $0x68] sm:$0xff] %vm2522_vm1, %v2471_v4  ;;  %2535 = vst.msk [vmem:[%s6886_s4 + $0x60] sm:$0xff] %vm2522_vm1, %v2470_v8  ;;  %2843 = vadd.xlane.f32.xlu1 %v2842_v43  ;;  %2840 = vadd.xlane.f32.xlu0 %v2839_v1  ;;  %v7241_v43 = vld [vmem:[#allocation25_spill] sm:$0xff] }
 0x35e   : > { %v2313_v29 = vpop.xlane.xlu1 %2312  ;;  %v2310_v19 = vpop.xlane.xlu0 %2309  ;;  %v2707_v1 = vmul.f32 %v7241_v43, %v7241_v43  ;;  %v2866_v4 = vadd.f32 %v2710_v60, %v2709_v14  ;;  %v2722_v14 = vmul.f32 %v7252_v26, %v7252_v26  ;;  %v2719_v60 = vmul.f32 %v7253_v61, %v7253_v61  ;;  %v7254_v43 = vld [vmem:[#allocation38_spill] sm:$0xff] }
 0x35f   : > { %v2473_v24 = vadd.f32 %v2313_v29, %v2217_v53  ;;  %v2472_v58 = vadd.f32 %v2310_v19, %v2216_v35  ;;  %v7243_v53 = vld [vmem:[#allocation31_spill] sm:$0xff]  ;;  %v2225_v29 = vld [vmem:[%s6886_s4 + $0xb8] sm:$0xff]  ;;  %v2224_v19 = vld [vmem:[%s6886_s4 + $0xb0] sm:$0xff] }
 0x360   : > { %v2863_v8 = vadd.f32 %v2708_v42, %v2707_v1  ;;  %v2713_v35 = vmul.f32 %v7243_v53, %v7243_v53  ;;  %v2720_v1 = vmul.f32 %v7254_v43, %v7254_v43  ;;  %v7258_v53 = vld [vmem:[#allocation42_spill] sm:$0xff] }
 0x361   : > { %2538 = vst.msk [vmem:[%s6886_s4 + $0x78] sm:$0xff] %vm2522_vm1, %v2473_v24  ;;  %2537 = vst.msk [vmem:[%s6886_s4 + $0x70] sm:$0xff] %vm2522_vm1, %v2472_v58  ;;  %2849 = vadd.xlane.f32.xlu1 %v2848_v7  ;;  %2846 = vadd.xlane.f32.xlu0 %v2845_v40  ;;  %v7247_v24 = vld [vmem:[#allocation35_spill] sm:$0xff] }
 0x362   : > { %v2319_v51 = vpop.xlane.xlu1 %2318  ;;  %v2316_v39 = vpop.xlane.xlu0 %2315  ;;  %v2717_v58 = vmul.f32 %v7247_v24, %v7247_v24  ;;  %v2872_v0 = vadd.f32 %v2714_v16, %v2713_v35  ;;  %v2724_v35 = vmul.f32 %v7258_v53, %v7258_v53  ;;  %v2881_v16 = vadd.f32 %v2720_v1, %v2719_v60  ;;  %v7260_v24 = vld [vmem:[#allocation48_spill] sm:$0xff] }
 0x363   : > { %v2475_v33 = vadd.f32 %v2319_v51, %v2219_v49  ;;  %v2474_v45 = vadd.f32 %v2316_v39, %v2218_v59  ;;  %v7248_v49 = vld [vmem:[#allocation36_spill] sm:$0xff]  ;;  %v2226_v39 = vld [vmem:[%s6886_s4 + $0xc0] sm:$0xff] }
 0x364   : > { %v2718_v59 = vmul.f32 %v7248_v49, %v7248_v49  ;;  %v2227_v51 = vld [vmem:[%s6886_s4 + $0xc8] sm:$0xff]  ;;  %v7261_v49 = vld [vmem:[#allocation45_spill] sm:$0xff] }
 0x365   : > { %2540 = vst.msk [vmem:[%s6886_s4 + $0x88] sm:$0xff] %vm2522_vm1, %v2475_v33  ;;  %2539 = vst.msk [vmem:[%s6886_s4 + $0x80] sm:$0xff] %vm2522_vm1, %v2474_v45  ;;  %2855 = vadd.xlane.f32.xlu1 %v2854_v30  ;;  %2852 = vadd.xlane.f32.xlu0 %v2851_v28  ;;  %v7249_v30 = vld [vmem:[#allocation33_spill] sm:$0xff] }
 0x366   : > { %v2325_v15 = vpop.xlane.xlu1 %2324  ;;  %v2322_v54 = vpop.xlane.xlu0 %2321  ;;  %v2715_v28 = vmul.f32 %v7249_v30, %v7249_v30  ;;  %v2878_v33 = vadd.f32 %v2718_v59, %v2717_v58  ;;  %v2730_v58 = vmul.f32 %v7260_v24, %v7260_v24  ;;  %v2727_v59 = vmul.f32 %v7261_v49, %v7261_v49  ;;  %v7262_v30 = vld [vmem:[#allocation46_spill] sm:$0xff] }
 0x367   : > { %v2477_v56 = vadd.f32 %v2325_v15, %v2221_v10  ;;  %v2476_v3 = vadd.f32 %v2322_v54, %v2220_v22  ;;  %v7251_v10 = vld [vmem:[#allocation39_spill] sm:$0xff]  ;;  %v2229_v15 = vld [vmem:[%s6886_s4 + $0xd8] sm:$0xff]  ;;  %v2228_v54 = vld [vmem:[%s6886_s4 + $0xd0] sm:$0xff] }
 0x368   : > { %v2875_v45 = vadd.f32 %v2716_v62, %v2715_v28  ;;  %v2721_v22 = vmul.f32 %v7251_v10, %v7251_v10  ;;  %v2728_v28 = vmul.f32 %v7262_v30, %v7262_v30  ;;  %v7266_v10 = vld [vmem:[#allocation50_spill] sm:$0xff] }
 0x369   : > { %2542 = vst.msk [vmem:[%s6886_s4 + $0x98] sm:$0xff] %vm2522_vm1, %v2477_v56  ;;  %2541 = vst.msk [vmem:[%s6886_s4 + $0x90] sm:$0xff] %vm2522_vm1, %v2476_v3  ;;  %2861 = vadd.xlane.f32.xlu1 %v2860_v11  ;;  %2858 = vadd.xlane.f32.xlu0 %v2857_v13  ;;  %v7255_v56 = vld [vmem:[#allocation43_spill] sm:$0xff] }
 0x36a   : > { %v2331_v5 = vpop.xlane.xlu1 %2330  ;;  %v2328_v21 = vpop.xlane.xlu0 %2327  ;;  %v2725_v3 = vmul.f32 %v7255_v56, %v7255_v56  ;;  %v2884_v41 = vadd.f32 %v2722_v14, %v2721_v22  ;;  %v2732_v22 = vmul.f32 %v7266_v10, %v7266_v10  ;;  %v2893_v14 = vadd.f32 %v2728_v28, %v2727_v59  ;;  %v7268_v56 = vld [vmem:[#allocation56_spill] sm:$0xff] }
 0x36b   : > { %v2479_v7 = vadd.f32 %v2331_v5, %v2223_v23  ;;  %v2478_v40 = vadd.f32 %v2328_v21, %v2222_v27  ;;  %v7256_v23 = vld [vmem:[#allocation44_spill] sm:$0xff]  ;;  %v2230_v21 = vld [vmem:[%s6886_s4 + $0xe0] sm:$0xff] }
 0x36c   : > { %v2726_v27 = vmul.f32 %v7256_v23, %v7256_v23  ;;  %v2231_v5 = vld [vmem:[%s6886_s4 + $0xe8] sm:$0xff]  ;;  %v7269_v23 = vld [vmem:[#allocation53_spill] sm:$0xff] }
 0x36d   : > { %2544 = vst.msk [vmem:[%s6886_s4 + $0xa8] sm:$0xff] %vm2522_vm1, %v2479_v7  ;;  %2543 = vst.msk [vmem:[%s6886_s4 + $0xa0] sm:$0xff] %vm2522_vm1, %v2478_v40  ;;  %2867 = vadd.xlane.f32.xlu1 %v2866_v4  ;;  %2864 = vadd.xlane.f32.xlu0 %v2863_v8  ;;  %v7257_v4 = vld [vmem:[#allocation41_spill] sm:$0xff] }
 0x36e   : > { %v2337_v63 = vpop.xlane.xlu1 %2336  ;;  %v2334_v38 = vpop.xlane.xlu0 %2333  ;;  %v2723_v8 = vmul.f32 %v7257_v4, %v7257_v4  ;;  %v2890_v7 = vadd.f32 %v2726_v27, %v2725_v3  ;;  %v2738_v3 = vmul.f32 %v7268_v56, %v7268_v56  ;;  %v2735_v27 = vmul.f32 %v7269_v23, %v7269_v23  ;;  %v7270_v4 = vld [vmem:[#allocation54_spill] sm:$0xff] }
 0x36f   : > { %v2481_v48 = vadd.f32 %v2337_v63, %v2225_v29  ;;  %v2480_v44 = vadd.f32 %v2334_v38, %v2224_v19  ;;  %v7259_v29 = vld [vmem:[#allocation47_spill] sm:$0xff]  ;;  %v2233_v63 = vld [vmem:[%s6886_s4 + $0xf8] sm:$0xff]  ;;  %v2232_v38 = vld [vmem:[%s6886_s4 + $0xf0] sm:$0xff] }
 0x370   : > { %v2887_v40 = vadd.f32 %v2724_v35, %v2723_v8  ;;  %v2729_v19 = vmul.f32 %v7259_v29, %v7259_v29  ;;  %v2736_v8 = vmul.f32 %v7270_v4, %v7270_v4  ;;  %v7274_v29 = vld [vmem:[#allocation58_spill] sm:$0xff] }
 0x371   : > { %2546 = vst.msk [vmem:[%s6886_s4 + $0xb8] sm:$0xff] %vm2522_vm1, %v2481_v48  ;;  %2545 = vst.msk [vmem:[%s6886_s4 + $0xb0] sm:$0xff] %vm2522_vm1, %v2480_v44  ;;  %2873 = vadd.xlane.f32.xlu1 %v2872_v0  ;;  %2870 = vadd.xlane.f32.xlu0 %v2869_v36  ;;  %v7263_v48 = vld [vmem:[#allocation51_spill] sm:$0xff] }
 0x372   : > { %v2343_v37 = vpop.xlane.xlu1 %2342  ;;  %v2340_v42 = vpop.xlane.xlu0 %2339  ;;  %v2733_v44 = vmul.f32 %v7263_v48, %v7263_v48  ;;  %v2896_v26 = vadd.f32 %v2730_v58, %v2729_v19  ;;  %v2740_v19 = vmul.f32 %v7274_v29, %v7274_v29  ;;  %v2905_v58 = vadd.f32 %v2736_v8, %v2735_v27  ;;  %v7276_v48 = vld [vmem:[#allocation64_spill] sm:$0xff] }
 0x373   : > { %v2483_v11 = vadd.f32 %v2343_v37, %v2227_v51  ;;  %v2482_v13 = vadd.f32 %v2340_v42, %v2226_v39  ;;  %v7264_v51 = vld [vmem:[#allocation52_spill] sm:$0xff]  ;;  %v2234_v42 = vld [vmem:[%s6886_s4 + $0x100] sm:$0xff] }
 0x374   : > { %v2734_v39 = vmul.f32 %v7264_v51, %v7264_v51  ;;  %v2235_v37 = vld [vmem:[%s6886_s4 + $0x108] sm:$0xff]  ;;  %v7277_v51 = vld [vmem:[#allocation61_spill] sm:$0xff] }
 0x375   : > { %2548 = vst.msk [vmem:[%s6886_s4 + $0xc8] sm:$0xff] %vm2522_vm1, %v2483_v11  ;;  %2547 = vst.msk [vmem:[%s6886_s4 + $0xc0] sm:$0xff] %vm2522_vm1, %v2482_v13  ;;  %2879 = vadd.xlane.f32.xlu1 %v2878_v33  ;;  %2876 = vadd.xlane.f32.xlu0 %v2875_v45  ;;  %v7265_v33 = vld [vmem:[#allocation49_spill] sm:$0xff] }
 0x376   : > { %v2349_v20 = vpop.xlane.xlu1 %2348  ;;  %v2346_v25 = vpop.xlane.xlu0 %2345  ;;  %v2731_v45 = vmul.f32 %v7265_v33, %v7265_v33  ;;  %v2902_v11 = vadd.f32 %v2734_v39, %v2733_v44  ;;  %v2746_v44 = vmul.f32 %v7276_v48, %v7276_v48  ;;  %v2743_v39 = vmul.f32 %v7277_v51, %v7277_v51  ;;  %v7278_v33 = vld [vmem:[#allocation62_spill] sm:$0xff] }
 0x377   : > { %v2485_v57 = vadd.f32 %v2349_v20, %v2229_v15  ;;  %v2484_v34 = vadd.f32 %v2346_v25, %v2228_v54  ;;  %v7267_v15 = vld [vmem:[#allocation55_spill] sm:$0xff]  ;;  %v2237_v20 = vld [vmem:[%s6886_s4 + $0x118] sm:$0xff]  ;;  %v2236_v25 = vld [vmem:[%s6886_s4 + $0x110] sm:$0xff] }
 0x378   : > { %v2899_v13 = vadd.f32 %v2732_v22, %v2731_v45  ;;  %v2737_v54 = vmul.f32 %v7267_v15, %v7267_v15  ;;  %v2744_v45 = vmul.f32 %v7278_v33, %v7278_v33  ;;  %v7282_v15 = vld [vmem:[#allocation66_spill] sm:$0xff] }
 0x379   : > { %2550 = vst.msk [vmem:[%s6886_s4 + $0xd8] sm:$0xff] %vm2522_vm1, %v2485_v57  ;;  %2549 = vst.msk [vmem:[%s6886_s4 + $0xd0] sm:$0xff] %vm2522_vm1, %v2484_v34  ;;  %2885 = vadd.xlane.f32.xlu1 %v2884_v41  ;;  %2882 = vadd.xlane.f32.xlu0 %v2881_v16  ;;  %v7271_v57 = vld [vmem:[#allocation59_spill] sm:$0xff] }
 0x37a   : > { %v2355_v52 = vpop.xlane.xlu1 %2354  ;;  %v2352_v62 = vpop.xlane.xlu0 %2351  ;;  %v2741_v34 = vmul.f32 %v7271_v57, %v7271_v57  ;;  %v2908_v24 = vadd.f32 %v2738_v3, %v2737_v54  ;;  %v2748_v54 = vmul.f32 %v7282_v15, %v7282_v15  ;;  %v2917_v3 = vadd.f32 %v2744_v45, %v2743_v39  ;;  %v7284_v57 = vld [vmem:[#allocation72_spill] sm:$0xff] }
 0x37b   : > { %v2487_v0 = vadd.f32 %v2355_v52, %v2231_v5  ;;  %v2486_v36 = vadd.f32 %v2352_v62, %v2230_v21  ;;  %v7272_v5 = vld [vmem:[#allocation60_spill] sm:$0xff]  ;;  %v2238_v62 = vld [vmem:[%s6886_s4 + $0x120] sm:$0xff] }
 0x37c   : > { %v2742_v21 = vmul.f32 %v7272_v5, %v7272_v5  ;;  %v2239_v52 = vld [vmem:[%s6886_s4 + $0x128] sm:$0xff]  ;;  %v7285_v5 = vld [vmem:[#allocation69_spill] sm:$0xff] }
 0x37d   : > { %2552 = vst.msk [vmem:[%s6886_s4 + $0xe8] sm:$0xff] %vm2522_vm1, %v2487_v0  ;;  %2551 = vst.msk [vmem:[%s6886_s4 + $0xe0] sm:$0xff] %vm2522_vm1, %v2486_v36  ;;  %2891 = vadd.xlane.f32.xlu1 %v2890_v7  ;;  %2888 = vadd.xlane.f32.xlu0 %v2887_v40  ;;  %v7273_v7 = vld [vmem:[#allocation57_spill] sm:$0xff] }
 0x37e   : > { %v2361_v61 = vpop.xlane.xlu1 %2360  ;;  %v2358_v60 = vpop.xlane.xlu0 %2357  ;;  %v2739_v40 = vmul.f32 %v7273_v7, %v7273_v7  ;;  %v2914_v0 = vadd.f32 %v2742_v21, %v2741_v34  ;;  %v2754_v34 = vmul.f32 %v7284_v57, %v7284_v57  ;;  %v2751_v21 = vmul.f32 %v7285_v5, %v7285_v5  ;;  %v7286_v7 = vld [vmem:[#allocation70_spill] sm:$0xff] }
 0x37f   : > { %v2489_v43 = vadd.f32 %v2361_v61, %v2233_v63  ;;  %v2488_v1 = vadd.f32 %v2358_v60, %v2232_v38  ;;  %v7275_v63 = vld [vmem:[#allocation63_spill] sm:$0xff]  ;;  %v2241_v61 = vld [vmem:[%s6886_s4 + $0x138] sm:$0xff]  ;;  %v2240_v60 = vld [vmem:[%s6886_s4 + $0x130] sm:$0xff] }
 0x380   : > { %v2911_v36 = vadd.f32 %v2740_v19, %v2739_v40  ;;  %v2745_v38 = vmul.f32 %v7275_v63, %v7275_v63  ;;  %v2752_v40 = vmul.f32 %v7286_v7, %v7286_v7  ;;  %v7290_v63 = vld [vmem:[#allocation74_spill] sm:$0xff]  ;;  %v2769_v7 = vmul.f32 %v7217_v31, %v7217_v31 }
 0x381   : > { %2554 = vst.msk [vmem:[%s6886_s4 + $0xf8] sm:$0xff] %vm2522_vm1, %v2489_v43  ;;  %2553 = vst.msk [vmem:[%s6886_s4 + $0xf0] sm:$0xff] %vm2522_vm1, %v2488_v1  ;;  %2897 = vadd.xlane.f32.xlu1 %v2896_v26  ;;  %2894 = vadd.xlane.f32.xlu0 %v2893_v14  ;;  %v7279_v43 = vld [vmem:[#allocation67_spill] sm:$0xff]  ;;  %v2768_v31 = vmul.f32 %v7220_v2, %v7220_v2  ;;  %v2771_v2 = vmul.f32 %v7223_v12, %v7223_v12 }
 0x382   : > { %v2367_v53 = vpop.xlane.xlu1 %2366  ;;  %v2364_v35 = vpop.xlane.xlu0 %2363  ;;  %v2749_v1 = vmul.f32 %v7279_v43, %v7279_v43  ;;  %v2920_v56 = vadd.f32 %v2746_v44, %v2745_v38  ;;  %v2756_v38 = vmul.f32 %v7290_v63, %v7290_v63  ;;  %v2929_v44 = vadd.f32 %v2752_v40, %v2751_v21  ;;  %v7292_v43 = vld [vmem:[#allocation80_spill] sm:$0xff] }
 0x383   : > { %v2491_v41 = vadd.f32 %v2367_v53, %v2235_v37  ;;  %v2490_v16 = vadd.f32 %v2364_v35, %v2234_v42  ;;  %v7280_v37 = vld [vmem:[#allocation68_spill] sm:$0xff]  ;;  %v2242_v35 = vld [vmem:[%s6886_s4 + $0x140] sm:$0xff]  ;;  %v2770_v40 = vmul.f32 %v7218_v6, %v7218_v6  ;;  %v2773_v6 = vmul.f32 %v7221_v55, %v7221_v55 }
 0x384   : > { %v2750_v42 = vmul.f32 %v7280_v37, %v7280_v37  ;;  %v2243_v53 = vld [vmem:[%s6886_s4 + $0x148] sm:$0xff]  ;;  %v7293_v37 = vld [vmem:[#allocation77_spill] sm:$0xff] }
 0x385   : > { %2556 = vst.msk [vmem:[%s6886_s4 + $0x108] sm:$0xff] %vm2522_vm1, %v2491_v41  ;;  %2555 = vst.msk [vmem:[%s6886_s4 + $0x100] sm:$0xff] %vm2522_vm1, %v2490_v16  ;;  %2903 = vadd.xlane.f32.xlu1 %v2902_v11  ;;  %2900 = vadd.xlane.f32.xlu0 %v2899_v13  ;;  %v7281_v11 = vld [vmem:[#allocation65_spill] sm:$0xff]  ;;  %v2956_v55 = vadd.f32 %v2770_v40, %v2769_v7  ;;  %v2255_v63 = vld [vmem:[%s6886_s4 + $0x1a8] sm:$0xff] }
 0x386   : > { %v2373_v49 = vpop.xlane.xlu1 %2372  ;;  %v2370_v59 = vpop.xlane.xlu0 %2369  ;;  %v2747_v13 = vmul.f32 %v7281_v11, %v7281_v11  ;;  %v2926_v41 = vadd.f32 %v2750_v42, %v2749_v1  ;;  %v2762_v1 = vmul.f32 %v7292_v43, %v7292_v43  ;;  %v2759_v42 = vmul.f32 %v7293_v37, %v7293_v37  ;;  %v7294_v11 = vld [vmem:[#allocation78_spill] sm:$0xff]  ;;  %v2256_v43 = vld [vmem:[%s6886_s4 + $0x1b0] sm:$0xff] }
 0x387   : > { %v2493_v30 = vadd.f32 %v2373_v49, %v2237_v20  ;;  %v2492_v28 = vadd.f32 %v2370_v59, %v2236_v25  ;;  %v7283_v20 = vld [vmem:[#allocation71_spill] sm:$0xff]  ;;  %v2245_v49 = vld [vmem:[%s6886_s4 + $0x158] sm:$0xff]  ;;  %v2244_v59 = vld [vmem:[%s6886_s4 + $0x150] sm:$0xff] }
 0x388   : > { %v2923_v16 = vadd.f32 %v2748_v54, %v2747_v13  ;;  %v2753_v25 = vmul.f32 %v7283_v20, %v7283_v20  ;;  %v2760_v13 = vmul.f32 %v7294_v11, %v7294_v11 }
 0x389   : > { %2558 = vst.msk [vmem:[%s6886_s4 + $0x118] sm:$0xff] %vm2522_vm1, %v2493_v30  ;;  %2557 = vst.msk [vmem:[%s6886_s4 + $0x110] sm:$0xff] %vm2522_vm1, %v2492_v28  ;;  %2909 = vadd.xlane.f32.xlu1 %v2908_v24  ;;  %2906 = vadd.xlane.f32.xlu0 %v2905_v58  ;;  %v7287_v30 = vld [vmem:[#allocation75_spill] sm:$0xff] }
 0x38a   : > { %v2379_v10 = vpop.xlane.xlu1 %2378  ;;  %v2376_v22 = vpop.xlane.xlu0 %2375  ;;  %v2757_v28 = vmul.f32 %v7287_v30, %v7287_v30  ;;  %v2932_v48 = vadd.f32 %v2754_v34, %v2753_v25  ;;  %v2250_v34 = vld [vmem:[%s6886_s4 + $0x180] sm:$0xff]  ;;  %v2252_v30 = vld [vmem:[%s6886_s4 + $0x190] sm:$0xff] }
 0x38b   : > { %v2495_v26 = vadd.f32 %v2379_v10, %v2239_v52  ;;  %v2494_v14 = vadd.f32 %v2376_v22, %v2238_v62  ;;  %v7288_v52 = vld [vmem:[#allocation76_spill] sm:$0xff]  ;;  %v2246_v22 = vld [vmem:[%s6886_s4 + $0x160] sm:$0xff] }
 0x38c   : > { %v2758_v62 = vmul.f32 %v7288_v52, %v7288_v52  ;;  %v2247_v10 = vld [vmem:[%s6886_s4 + $0x168] sm:$0xff] }
 0x38d   : > { %2560 = vst.msk [vmem:[%s6886_s4 + $0x128] sm:$0xff] %vm2522_vm1, %v2495_v26  ;;  %2559 = vst.msk [vmem:[%s6886_s4 + $0x120] sm:$0xff] %vm2522_vm1, %v2494_v14  ;;  %2915 = vadd.xlane.f32.xlu1 %v2914_v0  ;;  %2912 = vadd.xlane.f32.xlu0 %v2911_v36  ;;  %v7289_v0 = vld [vmem:[#allocation73_spill] sm:$0xff] }
 0x38e   : > { %v2385_v23 = vpop.xlane.xlu1 %2384  ;;  %v2382_v27 = vpop.xlane.xlu0 %2381  ;;  %v2755_v36 = vmul.f32 %v7289_v0, %v7289_v0  ;;  %v2938_v26 = vadd.f32 %v2758_v62, %v2757_v28  ;;  %v7296_v28 = vld [vmem:[#allocation90_spill] sm:$0xff] }
 0x38f   : > { %v2497_v4 = vadd.f32 %v2385_v23, %v2241_v61  ;;  %v2496_v8 = vadd.f32 %v2382_v27, %v2240_v60  ;;  %v7291_v61 = vld [vmem:[#allocation79_spill] sm:$0xff]  ;;  %v2249_v23 = vld [vmem:[%s6886_s4 + $0x178] sm:$0xff]  ;;  %v2248_v27 = vld [vmem:[%s6886_s4 + $0x170] sm:$0xff]  ;;  %v2772_v52 = vmul.f32 %v7296_v28, %v7296_v28 }
 0x390   : > { %v2935_v14 = vadd.f32 %v2756_v38, %v2755_v36  ;;  %v2761_v60 = vmul.f32 %v7291_v61, %v7291_v61  ;;  %v2254_v38 = vld [vmem:[%s6886_s4 + $0x1a0] sm:$0xff] }
 0x391   : > { %2562 = vst.msk [vmem:[%s6886_s4 + $0x138] sm:$0xff] %vm2522_vm1, %v2497_v4  ;;  %2561 = vst.msk [vmem:[%s6886_s4 + $0x130] sm:$0xff] %vm2522_vm1, %v2496_v8  ;;  %2921 = vadd.xlane.f32.xlu1 %v2920_v56  ;;  %2918 = vadd.xlane.f32.xlu0 %v2917_v3  ;;  %v2765_v4 = vmul.f32 %v7213_v17, %v7213_v17  ;;  %v7295_v8 = vld [vmem:[#allocation84_spill] sm:$0xff] }
 0x392   : > { %v2391_v29 = vpop.xlane.xlu1 %2390  ;;  %v2388_v19 = vpop.xlane.xlu0 %2387  ;;  %v2944_v17 = vadd.f32 %v2762_v1, %v2761_v60  ;;  %v2257_v60 = vld [vmem:[%s6886_s4 + $0x1b8] sm:$0xff] }
 0x393   : > { %v2499_v24 = vadd.f32 %v2391_v29, %v2243_v53  ;;  %v2498_v58 = vadd.f32 %v2388_v19, %v2242_v35  ;;  %v2766_v53 = vmul.f32 %v7295_v8, %v7295_v8  ;;  %v2763_v35 = vmul.f32 %v7215_v32, %v7215_v32  ;;  %v2260_v8 = vld [vmem:[%s6886_s4 + $0x1d0] sm:$0xff] }
 0x394   : > { %v2767_v29 = vmul.f32 %v7219_v9, %v7219_v9  ;;  %v2774_v9 = vmul.f32 %v7222_v47, %v7222_v47 }
 0x395   : > { %2564 = vst.msk [vmem:[%s6886_s4 + $0x148] sm:$0xff] %vm2522_vm1, %v2499_v24  ;;  %2563 = vst.msk [vmem:[%s6886_s4 + $0x140] sm:$0xff] %vm2522_vm1, %v2498_v58  ;;  %2927 = vadd.xlane.f32.xlu1 %v2926_v41  ;;  %2924 = vadd.xlane.f32.xlu0 %v2923_v16  ;;  %v2764_v41 = vmul.f32 %v7216_v18, %v7216_v18  ;;  %v2941_v16 = vadd.f32 %v2760_v13, %v2759_v42  ;;  %v2251_v18 = vld [vmem:[%s6886_s4 + $0x188] sm:$0xff] }
 0x396   : > { %v2397_v51 = vpop.xlane.xlu1 %2396  ;;  %v2394_v39 = vpop.xlane.xlu0 %2393  ;;  %v2950_v5 = vadd.f32 %v2766_v53, %v2765_v4  ;;  %v2953_v47 = vadd.f32 %v2768_v31, %v2767_v29  ;;  %v2261_v4 = vld [vmem:[%s6886_s4 + $0x1d8] sm:$0xff]  ;;  %v2588_v31 = vld [vmem:[%s6887_s5 + $0x8] sm:$0xff] }
 0x397   : > { %v2501_v33 = vadd.f32 %v2397_v51, %v2245_v49  ;;  %v2500_v45 = vadd.f32 %v2394_v39, %v2244_v59  ;;  %v2947_v21 = vadd.f32 %v2764_v41, %v2763_v35  ;;  %v2253_v59 = vld [vmem:[%s6886_s4 + $0x198] sm:$0xff]  ;;  %v2777_v51 = vmul.f32 %v4896_v50, %v4896_v50 }
 0x398   : > { %v7297_v39 = vld [vmem:[#allocation94_spill] sm:$0xff] }
 0x399   : > { %2566 = vst.msk [vmem:[%s6886_s4 + $0x158] sm:$0xff] %vm2522_vm1, %v2501_v33  ;;  %2565 = vst.msk [vmem:[%s6886_s4 + $0x150] sm:$0xff] %vm2522_vm1, %v2500_v45  ;;  %2933 = vadd.xlane.f32.xlu1 %v2932_v48  ;;  %2930 = vadd.xlane.f32.xlu0 %v2929_v44  ;;  %v2962_v48 = vadd.f32 %v2774_v9, %v2773_v6  ;;  %v2959_v44 = vadd.f32 %v2772_v52, %v2771_v2 }
 0x39a   : > { %v2403_v15 = vpop.xlane.xlu1 %2402  ;;  %v2400_v54 = vpop.xlane.xlu0 %2399  ;;  %v2778_v33 = vmul.f32 %v7297_v39, %v7297_v39  ;;  %v2775_v45 = vmul.f32 %v4888_v46, %v4888_v46 }
 0x39b   : > { %v2503_v56 = vadd.f32 %v2403_v15, %v2247_v10  ;;  %v2502_v3 = vadd.f32 %v2400_v54, %v2246_v22  ;;  %v7298_v10 = vld [vmem:[#allocation93_spill] sm:$0xff]  ;;  %v2259_v15 = vld [vmem:[%s6886_s4 + $0x1c8] sm:$0xff]  ;;  %v2258_v54 = vld [vmem:[%s6886_s4 + $0x1c0] sm:$0xff] }
 0x39c   : > { %v2776_v50 = vmul.f32 %v7298_v10, %v7298_v10  ;;  %v2968_v46 = vadd.f32 %v2778_v33, %v2777_v51 }
 0x39d   : > { %2568 = vst.msk [vmem:[%s6886_s4 + $0x168] sm:$0xff] %vm2522_vm1, %v2503_v56  ;;  %2567 = vst.msk [vmem:[%s6886_s4 + $0x160] sm:$0xff] %vm2522_vm1, %v2502_v3  ;;  %2939 = vadd.xlane.f32.xlu1 %v2938_v26  ;;  %2936 = vadd.xlane.f32.xlu0 %v2935_v14 }
 0x39e   : > { %v2409_v20 = vpop.xlane.xlu1 %2408  ;;  %v2406_v25 = vpop.xlane.xlu0 %2405  ;;  %v2965_v1 = vadd.f32 %v2776_v50, %v2775_v45 }
 0x39f   : > { %v2505_v32 = vadd.f32 %v2409_v20, %v2249_v23  ;;  %v2504_v57 = vadd.f32 %v2406_v25, %v2248_v27  ;;  %v2262_v20 = vld [vmem:[%s6886_s4 + $0x1e0] sm:$0xff] }
 0x3a1   : > { %2570 = vst.msk [vmem:[%s6886_s4 + $0x178] sm:$0xff] %vm2522_vm1, %v2505_v32  ;;  %2569 = vst.msk [vmem:[%s6886_s4 + $0x170] sm:$0xff] %vm2522_vm1, %v2504_v57  ;;  %2945 = vadd.xlane.f32.xlu1 %v2944_v17  ;;  %2942 = vadd.xlane.f32.xlu0 %v2941_v16  ;;  %v2263_v16 = vld [vmem:[%s6886_s4 + $0x1e8] sm:$0xff] }
 0x3a2   : > { %v2415_v19 = vpop.xlane.xlu1 %2414  ;;  %v2412_v24 = vpop.xlane.xlu0 %2411 }
 0x3a3   : > { %v2507_v58 = vadd.f32 %v2415_v19, %v2251_v18  ;;  %v2506_v49 = vadd.f32 %v2412_v24, %v2250_v34  ;;  %v2265_v34 = vld [vmem:[%s6886_s4 + $0x1f8] sm:$0xff]  ;;  %v2587_v19 = vld [vmem:[%s6887_s5] sm:$0xff] }
 0x3a5   : > { %2572 = vst.msk [vmem:[%s6886_s4 + $0x188] sm:$0xff] %vm2522_vm1, %v2507_v58  ;;  %2571 = vst.msk [vmem:[%s6886_s4 + $0x180] sm:$0xff] %vm2522_vm1, %v2506_v49  ;;  %2951 = vadd.xlane.f32.xlu1 %v2950_v5  ;;  %2948 = vadd.xlane.f32.xlu0 %v2947_v21  ;;  %v2264_v5 = vld [vmem:[%s6886_s4 + $0x1f0] sm:$0xff] }
 0x3a6   : > { %v2421_v62 = vpop.xlane.xlu1 %2420  ;;  %v2418_v0 = vpop.xlane.xlu0 %2417 }
 0x3a7   : > { %v2509_v12 = vadd.f32 %v2421_v62, %v2253_v59  ;;  %v2508_v36 = vadd.f32 %v2418_v0, %v2252_v30 }
 0x3a9   : > { %2574 = vst.msk [vmem:[%s6886_s4 + $0x198] sm:$0xff] %vm2522_vm1, %v2509_v12  ;;  %2573 = vst.msk [vmem:[%s6886_s4 + $0x190] sm:$0xff] %vm2522_vm1, %v2508_v36  ;;  %2957 = vadd.xlane.f32.xlu1 %v2956_v55  ;;  %2954 = vadd.xlane.f32.xlu0 %v2953_v47 }
 0x3aa   : > { %v2427_v22 = vpop.xlane.xlu1 %2426  ;;  %v2424_v26 = vpop.xlane.xlu0 %2423 }
 0x3ab   : > { %v2511_v14 = vadd.f32 %v2427_v22, %v2255_v63  ;;  %v2510_v61 = vadd.f32 %v2424_v26, %v2254_v38 }
 0x3ad   : > { %2576 = vst.msk [vmem:[%s6886_s4 + $0x1a8] sm:$0xff] %vm2522_vm1, %v2511_v14  ;;  %2575 = vst.msk [vmem:[%s6886_s4 + $0x1a0] sm:$0xff] %vm2522_vm1, %v2510_v61  ;;  %2963 = vadd.xlane.f32.xlu1 %v2962_v48  ;;  %2960 = vadd.xlane.f32.xlu0 %v2959_v44 }
 0x3ae   : > { %v2433_v37 = vpop.xlane.xlu1 %2432  ;;  %v2430_v42 = vpop.xlane.xlu0 %2429 }
 0x3af   : > { %v2513_v11 = vadd.f32 %v2433_v37, %v2257_v60  ;;  %v2512_v13 = vadd.f32 %v2430_v42, %v2256_v43 }
 0x3b1   : > { %2578 = vst.msk [vmem:[%s6886_s4 + $0x1b8] sm:$0xff] %vm2522_vm1, %v2513_v11  ;;  %2577 = vst.msk [vmem:[%s6886_s4 + $0x1b0] sm:$0xff] %vm2522_vm1, %v2512_v13  ;;  %2969 = vadd.xlane.f32.xlu1 %v2968_v46  ;;  %2966 = vadd.xlane.f32.xlu0 %v2965_v1 }
 0x3b2   : > { %v2439_v56 = vpop.xlane.xlu1 %2438  ;;  %v2436_v3 = vpop.xlane.xlu0 %2435 }
 0x3b3   : > { %v2515_v23 = vadd.f32 %v2439_v56, %v2259_v15  ;;  %v2514_v27 = vadd.f32 %v2436_v3, %v2258_v54 }
 0x3b5   : > { %2580 = vst.msk [vmem:[%s6886_s4 + $0x1c8] sm:$0xff] %vm2522_vm1, %v2515_v23  ;;  %2579 = vst.msk [vmem:[%s6886_s4 + $0x1c0] sm:$0xff] %vm2522_vm1, %v2514_v27 }
 0x3b6   : > { %v2445_v53 = vpop.xlane.xlu1 %2444  ;;  %v2442_v35 = vpop.xlane.xlu0 %2441 }
 0x3b7   : > { %v2517_v41 = vadd.f32 %v2445_v53, %v2261_v4  ;;  %v2516_v17 = vadd.f32 %v2442_v35, %v2260_v8 }
 0x3b9   : > { %2582 = vst.msk [vmem:[%s6886_s4 + $0x1d8] sm:$0xff] %vm2522_vm1, %v2517_v41  ;;  %2581 = vst.msk [vmem:[%s6886_s4 + $0x1d0] sm:$0xff] %vm2522_vm1, %v2516_v17 }
 0x3ba   : > { %v2451_v25 = vpop.xlane.xlu1 %2450  ;;  %v2448_v32 = vpop.xlane.xlu0 %2447 }
 0x3bb   : > { %v2519_v57 = vadd.f32 %v2451_v25, %v2263_v16  ;;  %v2518_v18 = vadd.f32 %v2448_v32, %v2262_v20 }
 0x3bd   : > { %2584 = vst.msk [vmem:[%s6886_s4 + $0x1e8] sm:$0xff] %vm2522_vm1, %v2519_v57  ;;  %2583 = vst.msk [vmem:[%s6886_s4 + $0x1e0] sm:$0xff] %vm2522_vm1, %v2518_v18 }
 0x3be   : > { %v2457_v21 = vpop.xlane.xlu1 %2456  ;;  %v2454_v7 = vpop.xlane.xlu0 %2453 }
 0x3bf   : > { %v2521_v40 = vadd.f32 %v2457_v21, %v2265_v34  ;;  %v2520_v29 = vadd.f32 %v2454_v7, %v2264_v5 }
 0x3c1   : > { %2586 = vst.msk [vmem:[%s6886_s4 + $0x1f8] sm:$0xff] %vm2522_vm1, %v2521_v40  ;;  %2585 = vst.msk [vmem:[%s6886_s4 + $0x1f0] sm:$0xff] %vm2522_vm1, %v2520_v29 }
 0x3c2   : > { %v2784_v24 = vpop.xlane.xlu1 %2783  ;;  %v2781_v58 = vpop.xlane.xlu0 %2780 }
 0x3c3   : > { %v2972_v49 = vadd.f32 %v2784_v24, %v2588_v31  ;;  %v2971_v59 = vadd.f32 %v2781_v58, %v2587_v19 }
 0x3c4   : > { %3783 = shalt.err (!%p3780_p9)
}
 0x3c5   : > { %s3784_s25 = scalar_lea.hbm %s6381_s14, 16384  ;;  %s3788_s11 = scalar_lea.hbm %s6885_s3, 32768 }
 0x3c6   : > { %p3785_p1 = scmp.ne.s32.totalorder %s6381_s14, %s3784_s25  ;;  %p3789_p7 = scmp.lt.u32.totalorder %s6381_s14, %s6885_s3 }
 0x3c7   : > { %p3790_p13 = scmp.lt.u32.totalorder %s3788_s11, %s3784_s25  ;;  %p3792_p6 = scmp.lt.u32.totalorder %s3784_s25, %s6381_s14 }
 0x3c8   : > { %p3786_p2 = pnand %p3785_p1, %p3995_p10 }
 0x3c9   : > { %p3791_p4 = por %p3790_p13, %p3789_p7 }
 0x3ca   : > { %p3787_p3 = pneg %p3786_p2 }
 0x3cb   : > { %p3793_p8 = por %p3792_p6, %p3791_p4 }
 0x3cd   : > { %p3794_p12 = pnand %p3793_p8, %p3787_p3 }
 0x3cf   : > { %3797 = shalt.err (!%p3794_p12)
}
 0x3d0   : > { %s3867_s21 = smov 256   ;;  %s3868_s7 = smov 16   ;;  %v2590_v30 = vld [vmem:[%s6887_s5 + $0x18] sm:$0xff]  ;;  %v2589_v6 = vld [vmem:[%s6887_s5 + $0x10] sm:$0xff]  ;;  %3036 = vst.msk [vmem:[%s6887_s5 + $0x8] sm:$0xff] %vm2522_vm1, %v2972_v49  ;;  %3035 = vst.msk [vmem:[%s6887_s5] sm:$0xff] %vm2522_vm1, %v2971_v59  ;;  %v2790_v9 = vpop.xlane.xlu1 %2789  ;;  %v2787_v2 = vpop.xlane.xlu0 %2786 }
 0x3d1   : > { %3635 = dma.vmem_to_hbm [thread:$0]  (%p3995_p10), %s6391_s26, 16384, %s6381_s14, %s3100_s12, %s3867_s21, %s3867_s21, %s3868_s7   ;;  %v2974_v28 = vadd.f32 %v2790_v9, %v2590_v30  ;;  %v2973_v52 = vadd.f32 %v2787_v2, %v2589_v6 }
 0x3d2   : > { %v2592_v55 = vld [vmem:[%s6887_s5 + $0x28] sm:$0xff]  ;;  %v2591_v47 = vld [vmem:[%s6887_s5 + $0x20] sm:$0xff]  ;;  %v2594_v63 = vld [vmem:[%s6887_s5 + $0x38] sm:$0xff] }
 0x3d3   : > { %3038 = vst.msk [vmem:[%s6887_s5 + $0x18] sm:$0xff] %vm2522_vm1, %v2974_v28  ;;  %3037 = vst.msk [vmem:[%s6887_s5 + $0x10] sm:$0xff] %vm2522_vm1, %v2973_v52  ;;  %v2593_v38 = vld [vmem:[%s6887_s5 + $0x30] sm:$0xff]  ;;  %v2596_v33 = vld [vmem:[%s6887_s5 + $0x48] sm:$0xff] }
 0x3d4   : > { %v2796_v62 = vpop.xlane.xlu1 %2795  ;;  %v2793_v0 = vpop.xlane.xlu0 %2792  ;;  %v2595_v45 = vld [vmem:[%s6887_s5 + $0x40] sm:$0xff]  ;;  %v2598_v14 = vld [vmem:[%s6887_s5 + $0x58] sm:$0xff]  ;;  %v2597_v61 = vld [vmem:[%s6887_s5 + $0x50] sm:$0xff] }
 0x3d5   : > { %v2976_v12 = vadd.f32 %v2796_v62, %v2592_v55  ;;  %v2975_v36 = vadd.f32 %v2793_v0, %v2591_v47  ;;  %v2600_v37 = vld [vmem:[%s6887_s5 + $0x68] sm:$0xff]  ;;  %v2599_v42 = vld [vmem:[%s6887_s5 + $0x60] sm:$0xff]  ;;  %v2602_v56 = vld [vmem:[%s6887_s5 + $0x78] sm:$0xff] }
 0x3d6   : > { %v2601_v3 = vld [vmem:[%s6887_s5 + $0x70] sm:$0xff]  ;;  %v2604_v53 = vld [vmem:[%s6887_s5 + $0x88] sm:$0xff]  ;;  %v2603_v35 = vld [vmem:[%s6887_s5 + $0x80] sm:$0xff] }
 0x3d7   : > { %3040 = vst.msk [vmem:[%s6887_s5 + $0x28] sm:$0xff] %vm2522_vm1, %v2976_v12  ;;  %3039 = vst.msk [vmem:[%s6887_s5 + $0x20] sm:$0xff] %vm2522_vm1, %v2975_v36  ;;  %v2606_v25 = vld [vmem:[%s6887_s5 + $0x98] sm:$0xff]  ;;  %v2605_v32 = vld [vmem:[%s6887_s5 + $0x90] sm:$0xff] }
 0x3d8   : > { %v2802_v48 = vpop.xlane.xlu1 %2801  ;;  %v2799_v44 = vpop.xlane.xlu0 %2798  ;;  %v2608_v21 = vld [vmem:[%s6887_s5 + $0xa8] sm:$0xff]  ;;  %v2607_v7 = vld [vmem:[%s6887_s5 + $0xa0] sm:$0xff]  ;;  %v2610_v24 = vld [vmem:[%s6887_s5 + $0xb8] sm:$0xff] }
 0x3d9   : > { %v2978_v51 = vadd.f32 %v2802_v48, %v2594_v63  ;;  %v2977_v39 = vadd.f32 %v2799_v44, %v2593_v38  ;;  %v2609_v58 = vld [vmem:[%s6887_s5 + $0xb0] sm:$0xff]  ;;  %v2612_v9 = vld [vmem:[%s6887_s5 + $0xc8] sm:$0xff]  ;;  %v2611_v2 = vld [vmem:[%s6887_s5 + $0xc0] sm:$0xff] }
 0x3da   : > { %v2614_v62 = vld [vmem:[%s6887_s5 + $0xd8] sm:$0xff]  ;;  %v2613_v0 = vld [vmem:[%s6887_s5 + $0xd0] sm:$0xff]  ;;  %v2616_v48 = vld [vmem:[%s6887_s5 + $0xe8] sm:$0xff] }
 0x3db   : > { %3042 = vst.msk [vmem:[%s6887_s5 + $0x38] sm:$0xff] %vm2522_vm1, %v2978_v51  ;;  %3041 = vst.msk [vmem:[%s6887_s5 + $0x30] sm:$0xff] %vm2522_vm1, %v2977_v39  ;;  %v2615_v44 = vld [vmem:[%s6887_s5 + $0xe0] sm:$0xff] }
 0x3dc   : > { %v2808_v10 = vpop.xlane.xlu1 %2807  ;;  %v2805_v50 = vpop.xlane.xlu0 %2804 }
 0x3dd   : > { %v2980_v22 = vadd.f32 %v2808_v10, %v2596_v33  ;;  %v2979_v26 = vadd.f32 %v2805_v50, %v2595_v45  ;;  %v2618_v10 = vld [vmem:[%s6887_s5 + $0xf8] sm:$0xff]  ;;  %v2617_v50 = vld [vmem:[%s6887_s5 + $0xf0] sm:$0xff] }
 0x3df   : > { %3044 = vst.msk [vmem:[%s6887_s5 + $0x48] sm:$0xff] %vm2522_vm1, %v2980_v22  ;;  %3043 = vst.msk [vmem:[%s6887_s5 + $0x40] sm:$0xff] %vm2522_vm1, %v2979_v26 }
 0x3e0   : > { %v2814_v60 = vpop.xlane.xlu1 %2813  ;;  %v2811_v43 = vpop.xlane.xlu0 %2810 }
 0x3e1   : > { %v2982_v46 = vadd.f32 %v2814_v60, %v2598_v14  ;;  %v2981_v1 = vadd.f32 %v2811_v43, %v2597_v61  ;;  %v2620_v60 = vld [vmem:[%s6887_s5 + $0x108] sm:$0xff]  ;;  %v2619_v43 = vld [vmem:[%s6887_s5 + $0x100] sm:$0xff] }
 0x3e3   : > { %3046 = vst.msk [vmem:[%s6887_s5 + $0x58] sm:$0xff] %vm2522_vm1, %v2982_v46  ;;  %3045 = vst.msk [vmem:[%s6887_s5 + $0x50] sm:$0xff] %vm2522_vm1, %v2981_v1 }
 0x3e4   : > { %v2820_v11 = vpop.xlane.xlu1 %2819  ;;  %v2817_v13 = vpop.xlane.xlu0 %2816 }
 0x3e5   : > { %v2984_v15 = vadd.f32 %v2820_v11, %v2600_v37  ;;  %v2983_v54 = vadd.f32 %v2817_v13, %v2599_v42  ;;  %v2622_v11 = vld [vmem:[%s6887_s5 + $0x118] sm:$0xff]  ;;  %v2621_v13 = vld [vmem:[%s6887_s5 + $0x110] sm:$0xff] }
 0x3e7   : > { %3048 = vst.msk [vmem:[%s6887_s5 + $0x68] sm:$0xff] %vm2522_vm1, %v2984_v15  ;;  %3047 = vst.msk [vmem:[%s6887_s5 + $0x60] sm:$0xff] %vm2522_vm1, %v2983_v54 }
 0x3e8   : > { %v2826_v23 = vpop.xlane.xlu1 %2825  ;;  %v2823_v27 = vpop.xlane.xlu0 %2822 }
 0x3e9   : > { %v2986_v4 = vadd.f32 %v2826_v23, %v2602_v56  ;;  %v2985_v8 = vadd.f32 %v2823_v27, %v2601_v3  ;;  %v2624_v23 = vld [vmem:[%s6887_s5 + $0x128] sm:$0xff]  ;;  %v2623_v27 = vld [vmem:[%s6887_s5 + $0x120] sm:$0xff] }
 0x3eb   : > { %3050 = vst.msk [vmem:[%s6887_s5 + $0x78] sm:$0xff] %vm2522_vm1, %v2986_v4  ;;  %3049 = vst.msk [vmem:[%s6887_s5 + $0x70] sm:$0xff] %vm2522_vm1, %v2985_v8 }
 0x3ec   : > { %v2832_v41 = vpop.xlane.xlu1 %2831  ;;  %v2829_v17 = vpop.xlane.xlu0 %2828 }
 0x3ed   : > { %v2988_v16 = vadd.f32 %v2832_v41, %v2604_v53  ;;  %v2987_v20 = vadd.f32 %v2829_v17, %v2603_v35  ;;  %v2626_v41 = vld [vmem:[%s6887_s5 + $0x138] sm:$0xff]  ;;  %v2625_v17 = vld [vmem:[%s6887_s5 + $0x130] sm:$0xff] }
 0x3ef   : > { %3052 = vst.msk [vmem:[%s6887_s5 + $0x88] sm:$0xff] %vm2522_vm1, %v2988_v16  ;;  %3051 = vst.msk [vmem:[%s6887_s5 + $0x80] sm:$0xff] %vm2522_vm1, %v2987_v20 }
 0x3f0   : > { %v2838_v57 = vpop.xlane.xlu1 %2837  ;;  %v2835_v18 = vpop.xlane.xlu0 %2834 }
 0x3f1   : > { %v2990_v34 = vadd.f32 %v2838_v57, %v2606_v25  ;;  %v2989_v5 = vadd.f32 %v2835_v18, %v2605_v32  ;;  %v2628_v57 = vld [vmem:[%s6887_s5 + $0x148] sm:$0xff]  ;;  %v2627_v18 = vld [vmem:[%s6887_s5 + $0x140] sm:$0xff] }
 0x3f3   : > { %3054 = vst.msk [vmem:[%s6887_s5 + $0x98] sm:$0xff] %vm2522_vm1, %v2990_v34  ;;  %3053 = vst.msk [vmem:[%s6887_s5 + $0x90] sm:$0xff] %vm2522_vm1, %v2989_v5 }
 0x3f4   : > { %v2844_v40 = vpop.xlane.xlu1 %2843  ;;  %v2841_v29 = vpop.xlane.xlu0 %2840 }
 0x3f5   : > { %v2992_v31 = vadd.f32 %v2844_v40, %v2608_v21  ;;  %v2991_v19 = vadd.f32 %v2841_v29, %v2607_v7  ;;  %v2630_v40 = vld [vmem:[%s6887_s5 + $0x158] sm:$0xff]  ;;  %v2629_v29 = vld [vmem:[%s6887_s5 + $0x150] sm:$0xff] }
 0x3f7   : > { %3056 = vst.msk [vmem:[%s6887_s5 + $0xa8] sm:$0xff] %vm2522_vm1, %v2992_v31  ;;  %3055 = vst.msk [vmem:[%s6887_s5 + $0xa0] sm:$0xff] %vm2522_vm1, %v2991_v19 }
 0x3f8   : > { %v2850_v49 = vpop.xlane.xlu1 %2849  ;;  %v2847_v59 = vpop.xlane.xlu0 %2846 }
 0x3f9   : > { %v2994_v30 = vadd.f32 %v2850_v49, %v2610_v24  ;;  %v2993_v6 = vadd.f32 %v2847_v59, %v2609_v58  ;;  %v2632_v49 = vld [vmem:[%s6887_s5 + $0x168] sm:$0xff]  ;;  %v2631_v59 = vld [vmem:[%s6887_s5 + $0x160] sm:$0xff] }
 0x3fb   : > { %3058 = vst.msk [vmem:[%s6887_s5 + $0xb8] sm:$0xff] %vm2522_vm1, %v2994_v30  ;;  %3057 = vst.msk [vmem:[%s6887_s5 + $0xb0] sm:$0xff] %vm2522_vm1, %v2993_v6 }
 0x3fc   : > { %v2856_v28 = vpop.xlane.xlu1 %2855  ;;  %v2853_v52 = vpop.xlane.xlu0 %2852 }
 0x3fd   : > { %v2996_v55 = vadd.f32 %v2856_v28, %v2612_v9  ;;  %v2995_v47 = vadd.f32 %v2853_v52, %v2611_v2  ;;  %v2634_v28 = vld [vmem:[%s6887_s5 + $0x178] sm:$0xff]  ;;  %v2633_v52 = vld [vmem:[%s6887_s5 + $0x170] sm:$0xff] }
 0x3ff   : > { %3060 = vst.msk [vmem:[%s6887_s5 + $0xc8] sm:$0xff] %vm2522_vm1, %v2996_v55  ;;  %3059 = vst.msk [vmem:[%s6887_s5 + $0xc0] sm:$0xff] %vm2522_vm1, %v2995_v47 }
 0x400   : > { %v2862_v12 = vpop.xlane.xlu1 %2861  ;;  %v2859_v36 = vpop.xlane.xlu0 %2858 }
 0x401   : > { %v2998_v63 = vadd.f32 %v2862_v12, %v2614_v62  ;;  %v2997_v38 = vadd.f32 %v2859_v36, %v2613_v0  ;;  %v2636_v12 = vld [vmem:[%s6887_s5 + $0x188] sm:$0xff]  ;;  %v2635_v36 = vld [vmem:[%s6887_s5 + $0x180] sm:$0xff] }
 0x403   : > { %3062 = vst.msk [vmem:[%s6887_s5 + $0xd8] sm:$0xff] %vm2522_vm1, %v2998_v63  ;;  %3061 = vst.msk [vmem:[%s6887_s5 + $0xd0] sm:$0xff] %vm2522_vm1, %v2997_v38 }
 0x404   : > { %v2868_v51 = vpop.xlane.xlu1 %2867  ;;  %v2865_v39 = vpop.xlane.xlu0 %2864 }
 0x405   : > { %v3000_v33 = vadd.f32 %v2868_v51, %v2616_v48  ;;  %v2999_v45 = vadd.f32 %v2865_v39, %v2615_v44  ;;  %v2638_v51 = vld [vmem:[%s6887_s5 + $0x198] sm:$0xff]  ;;  %v2637_v39 = vld [vmem:[%s6887_s5 + $0x190] sm:$0xff] }
 0x407   : > { %3064 = vst.msk [vmem:[%s6887_s5 + $0xe8] sm:$0xff] %vm2522_vm1, %v3000_v33  ;;  %3063 = vst.msk [vmem:[%s6887_s5 + $0xe0] sm:$0xff] %vm2522_vm1, %v2999_v45 }
 0x408   : > { %v2874_v22 = vpop.xlane.xlu1 %2873  ;;  %v2871_v26 = vpop.xlane.xlu0 %2870 }
 0x409   : > { %v3002_v14 = vadd.f32 %v2874_v22, %v2618_v10  ;;  %v3001_v61 = vadd.f32 %v2871_v26, %v2617_v50  ;;  %v2640_v22 = vld [vmem:[%s6887_s5 + $0x1a8] sm:$0xff]  ;;  %v2639_v26 = vld [vmem:[%s6887_s5 + $0x1a0] sm:$0xff] }
 0x40b   : > { %3066 = vst.msk [vmem:[%s6887_s5 + $0xf8] sm:$0xff] %vm2522_vm1, %v3002_v14  ;;  %3065 = vst.msk [vmem:[%s6887_s5 + $0xf0] sm:$0xff] %vm2522_vm1, %v3001_v61 }
 0x40c   : > { %v2880_v46 = vpop.xlane.xlu1 %2879  ;;  %v2877_v1 = vpop.xlane.xlu0 %2876 }
 0x40d   : > { %v3004_v37 = vadd.f32 %v2880_v46, %v2620_v60  ;;  %v3003_v42 = vadd.f32 %v2877_v1, %v2619_v43  ;;  %v2642_v46 = vld [vmem:[%s6887_s5 + $0x1b8] sm:$0xff]  ;;  %v2641_v1 = vld [vmem:[%s6887_s5 + $0x1b0] sm:$0xff] }
 0x40f   : > { %3068 = vst.msk [vmem:[%s6887_s5 + $0x108] sm:$0xff] %vm2522_vm1, %v3004_v37  ;;  %3067 = vst.msk [vmem:[%s6887_s5 + $0x100] sm:$0xff] %vm2522_vm1, %v3003_v42 }
 0x410   : > { %v2886_v15 = vpop.xlane.xlu1 %2885  ;;  %v2883_v54 = vpop.xlane.xlu0 %2882 }
 0x411   : > { %v3006_v56 = vadd.f32 %v2886_v15, %v2622_v11  ;;  %v3005_v3 = vadd.f32 %v2883_v54, %v2621_v13  ;;  %v2644_v15 = vld [vmem:[%s6887_s5 + $0x1c8] sm:$0xff]  ;;  %v2643_v54 = vld [vmem:[%s6887_s5 + $0x1c0] sm:$0xff] }
 0x413   : > { %3070 = vst.msk [vmem:[%s6887_s5 + $0x118] sm:$0xff] %vm2522_vm1, %v3006_v56  ;;  %3069 = vst.msk [vmem:[%s6887_s5 + $0x110] sm:$0xff] %vm2522_vm1, %v3005_v3 }
 0x414   : > { %v2892_v4 = vpop.xlane.xlu1 %2891  ;;  %v2889_v8 = vpop.xlane.xlu0 %2888 }
 0x415   : > { %v3008_v53 = vadd.f32 %v2892_v4, %v2624_v23  ;;  %v3007_v35 = vadd.f32 %v2889_v8, %v2623_v27  ;;  %v2646_v4 = vld [vmem:[%s6887_s5 + $0x1d8] sm:$0xff]  ;;  %v2645_v8 = vld [vmem:[%s6887_s5 + $0x1d0] sm:$0xff] }
 0x417   : > { %3072 = vst.msk [vmem:[%s6887_s5 + $0x128] sm:$0xff] %vm2522_vm1, %v3008_v53  ;;  %3071 = vst.msk [vmem:[%s6887_s5 + $0x120] sm:$0xff] %vm2522_vm1, %v3007_v35 }
 0x418   : > { %v2898_v16 = vpop.xlane.xlu1 %2897  ;;  %v2895_v20 = vpop.xlane.xlu0 %2894 }
 0x419   : > { %v3010_v25 = vadd.f32 %v2898_v16, %v2626_v41  ;;  %v3009_v32 = vadd.f32 %v2895_v20, %v2625_v17  ;;  %v2648_v16 = vld [vmem:[%s6887_s5 + $0x1e8] sm:$0xff]  ;;  %v2647_v20 = vld [vmem:[%s6887_s5 + $0x1e0] sm:$0xff] }
 0x41b   : > { %3074 = vst.msk [vmem:[%s6887_s5 + $0x138] sm:$0xff] %vm2522_vm1, %v3010_v25  ;;  %3073 = vst.msk [vmem:[%s6887_s5 + $0x130] sm:$0xff] %vm2522_vm1, %v3009_v32 }
 0x41c   : > { %v2904_v34 = vpop.xlane.xlu1 %2903  ;;  %v2901_v5 = vpop.xlane.xlu0 %2900 }
 0x41d   : > { %v3012_v21 = vadd.f32 %v2904_v34, %v2628_v57  ;;  %v3011_v7 = vadd.f32 %v2901_v5, %v2627_v18  ;;  %v2650_v34 = vld [vmem:[%s6887_s5 + $0x1f8] sm:$0xff]  ;;  %v2649_v5 = vld [vmem:[%s6887_s5 + $0x1f0] sm:$0xff] }
 0x41f   : > { %3076 = vst.msk [vmem:[%s6887_s5 + $0x148] sm:$0xff] %vm2522_vm1, %v3012_v21  ;;  %3075 = vst.msk [vmem:[%s6887_s5 + $0x140] sm:$0xff] %vm2522_vm1, %v3011_v7 }
 0x420   : > { %v2910_v31 = vpop.xlane.xlu1 %2909  ;;  %v2907_v19 = vpop.xlane.xlu0 %2906 }
 0x421   : > { %v3014_v24 = vadd.f32 %v2910_v31, %v2630_v40  ;;  %v3013_v58 = vadd.f32 %v2907_v19, %v2629_v29 }
 0x423   : > { %3078 = vst.msk [vmem:[%s6887_s5 + $0x158] sm:$0xff] %vm2522_vm1, %v3014_v24  ;;  %3077 = vst.msk [vmem:[%s6887_s5 + $0x150] sm:$0xff] %vm2522_vm1, %v3013_v58 }
 0x424   : > { %v2916_v30 = vpop.xlane.xlu1 %2915  ;;  %v2913_v6 = vpop.xlane.xlu0 %2912 }
 0x425   : > { %v3016_v9 = vadd.f32 %v2916_v30, %v2632_v49  ;;  %v3015_v2 = vadd.f32 %v2913_v6, %v2631_v59 }
 0x427   : > { %3080 = vst.msk [vmem:[%s6887_s5 + $0x168] sm:$0xff] %vm2522_vm1, %v3016_v9  ;;  %3079 = vst.msk [vmem:[%s6887_s5 + $0x160] sm:$0xff] %vm2522_vm1, %v3015_v2 }
 0x428   : > { %v2922_v55 = vpop.xlane.xlu1 %2921  ;;  %v2919_v47 = vpop.xlane.xlu0 %2918 }
 0x429   : > { %v3018_v62 = vadd.f32 %v2922_v55, %v2634_v28  ;;  %v3017_v0 = vadd.f32 %v2919_v47, %v2633_v52 }
 0x42b   : > { %3082 = vst.msk [vmem:[%s6887_s5 + $0x178] sm:$0xff] %vm2522_vm1, %v3018_v62  ;;  %3081 = vst.msk [vmem:[%s6887_s5 + $0x170] sm:$0xff] %vm2522_vm1, %v3017_v0 }
 0x42c   : > { %v2928_v63 = vpop.xlane.xlu1 %2927  ;;  %v2925_v38 = vpop.xlane.xlu0 %2924 }
 0x42d   : > { %v3020_v48 = vadd.f32 %v2928_v63, %v2636_v12  ;;  %v3019_v44 = vadd.f32 %v2925_v38, %v2635_v36 }
 0x42f   : > { %3084 = vst.msk [vmem:[%s6887_s5 + $0x188] sm:$0xff] %vm2522_vm1, %v3020_v48  ;;  %3083 = vst.msk [vmem:[%s6887_s5 + $0x180] sm:$0xff] %vm2522_vm1, %v3019_v44 }
 0x430   : > { %v2934_v33 = vpop.xlane.xlu1 %2933  ;;  %v2931_v45 = vpop.xlane.xlu0 %2930 }
 0x431   : > { %v3022_v10 = vadd.f32 %v2934_v33, %v2638_v51  ;;  %v3021_v50 = vadd.f32 %v2931_v45, %v2637_v39 }
 0x433   : > { %3086 = vst.msk [vmem:[%s6887_s5 + $0x198] sm:$0xff] %vm2522_vm1, %v3022_v10  ;;  %3085 = vst.msk [vmem:[%s6887_s5 + $0x190] sm:$0xff] %vm2522_vm1, %v3021_v50 }
 0x434   : > { %v2940_v14 = vpop.xlane.xlu1 %2939  ;;  %v2937_v61 = vpop.xlane.xlu0 %2936 }
 0x435   : > { %v3024_v60 = vadd.f32 %v2940_v14, %v2640_v22  ;;  %v3023_v43 = vadd.f32 %v2937_v61, %v2639_v26 }
 0x437   : > { %3088 = vst.msk [vmem:[%s6887_s5 + $0x1a8] sm:$0xff] %vm2522_vm1, %v3024_v60  ;;  %3087 = vst.msk [vmem:[%s6887_s5 + $0x1a0] sm:$0xff] %vm2522_vm1, %v3023_v43 }
 0x438   : > { %v2946_v37 = vpop.xlane.xlu1 %2945  ;;  %v2943_v42 = vpop.xlane.xlu0 %2942 }
 0x439   : > { %v3026_v11 = vadd.f32 %v2946_v37, %v2642_v46  ;;  %v3025_v13 = vadd.f32 %v2943_v42, %v2641_v1 }
 0x43b   : > { %3090 = vst.msk [vmem:[%s6887_s5 + $0x1b8] sm:$0xff] %vm2522_vm1, %v3026_v11  ;;  %3089 = vst.msk [vmem:[%s6887_s5 + $0x1b0] sm:$0xff] %vm2522_vm1, %v3025_v13 }
 0x43c   : > { %v2952_v56 = vpop.xlane.xlu1 %2951  ;;  %v2949_v3 = vpop.xlane.xlu0 %2948 }
 0x43d   : > { %v3028_v23 = vadd.f32 %v2952_v56, %v2644_v15  ;;  %v3027_v27 = vadd.f32 %v2949_v3, %v2643_v54 }
 0x43f   : > { %3092 = vst.msk [vmem:[%s6887_s5 + $0x1c8] sm:$0xff] %vm2522_vm1, %v3028_v23  ;;  %3091 = vst.msk [vmem:[%s6887_s5 + $0x1c0] sm:$0xff] %vm2522_vm1, %v3027_v27 }
 0x440   : > { %v2958_v53 = vpop.xlane.xlu1 %2957  ;;  %v2955_v35 = vpop.xlane.xlu0 %2954 }
 0x441   : > { %v3030_v41 = vadd.f32 %v2958_v53, %v2646_v4  ;;  %v3029_v17 = vadd.f32 %v2955_v35, %v2645_v8 }
 0x443   : > { %3094 = vst.msk [vmem:[%s6887_s5 + $0x1d8] sm:$0xff] %vm2522_vm1, %v3030_v41  ;;  %3093 = vst.msk [vmem:[%s6887_s5 + $0x1d0] sm:$0xff] %vm2522_vm1, %v3029_v17 }
 0x444   : > { %v2964_v25 = vpop.xlane.xlu1 %2963  ;;  %v2961_v32 = vpop.xlane.xlu0 %2960 }
 0x445   : > { %v3032_v57 = vadd.f32 %v2964_v25, %v2648_v16  ;;  %v3031_v18 = vadd.f32 %v2961_v32, %v2647_v20 }
 0x447   : > { %3096 = vst.msk [vmem:[%s6887_s5 + $0x1e8] sm:$0xff] %vm2522_vm1, %v3032_v57  ;;  %3095 = vst.msk [vmem:[%s6887_s5 + $0x1e0] sm:$0xff] %vm2522_vm1, %v3031_v18 }
 0x448   : > { %v2970_v21 = vpop.xlane.xlu1 %2969  ;;  %v2967_v7 = vpop.xlane.xlu0 %2966 }
 0x449   : > { %v3034_v40 = vadd.f32 %v2970_v21, %v2650_v34  ;;  %v3033_v29 = vadd.f32 %v2967_v7, %v2649_v5 }
 0x44b   : > { %3098 = vst.msk [vmem:[%s6887_s5 + $0x1f8] sm:$0xff] %vm2522_vm1, %v3034_v40  ;;  %3097 = vst.msk [vmem:[%s6887_s5 + $0x1f0] sm:$0xff] %vm2522_vm1, %v3033_v29 }
 0x44c PF: > { %s3142_s8 = sand.u32 1, %s3836_s18   ;;  %p7299_p10 = scmp.ne.s32.totalorder %s7055_s29, 0 }
 0x44d   : > { %p7300_p11 = scmp.ge.s32.totalorder %s3856_s23, 2  ;;  %s3143_s21 = scalar_lea.sflag [#allocation4], %s3142_s8 }
 0x44f   : > { %p3646_p0 = pnand %p7300_p11, %p7299_p10 }
 0x451   : > { %3831 = dma.done.wait (!%p3646_p0), %s3143_s21, 16384  }
 0x452   : > { %3833 = vsyncadd (!%p3646_p0), %s3143_s21, 4294950912  ;;  %s23_s23 = sadd.s32 1, %s3856_s23   ;;  %s7301_s18 = smov %s3840_s19 }
 0x453   : > { %p20_p5 = scmp.ge.s32.totalorder %s23_s23, 4   ;;  %s7302_s19 = smov %s3844_s20 }
 0x454   : > { %s7303_s20 = smov %s4004_s15  ;;  %s7304_s21 = smov %s3852_s22 }
 0x455   : > { %s7305_s22 = smov %s7307_s9  ;;  %22 = sbr.rel (!%p20_p5) target bundleno = 7 (0x7), region = 101 }
 0x45c   :  { %3148 = vsyncpa [#allocation3], 1 }
 0x45d   :  { %3150 = vsyncpa [#allocation3 + $0x1], 1 }
 0x45e   :  { %3151 = vsyncpa [#allocation6], 1 }
 0x45f   :  { %3152 = vsyncpa [#allocation4], 1 }
 0x460   :  { %3154 = vsyncpa [#allocation4 + $0x1], 1 }

</bundles_post_ra>
